<compile_context>
chip_gen: v7x
topology: tpu7x:2x2x1
jax: 0.10.0
libtpu: 0.0.40
codegen_flags: <defaults>
</compile_context>

<pallas_src>
import jax
import jax.numpy as jnp
from jax import lax
from jax.experimental import pallas as pl
from jax.experimental.pallas import tpu as pltpu


# ------------------------------ fused kernel -------------------------------

def _lenet_fused_kernel(p1_ref, w1_ref, b1_ref, w2_ref, b2_ref,
                        wf1_ref, bf1_ref, wf2_ref, bf2_ref,
                        out_ref, pool1_ref):
    f32 = jnp.float32

    # ---- conv1: one MXU matmul over the pre-gathered 5x5 patches ----------
    patches = p1_ref[0]                                            # [576, 25]
    h1 = jnp.dot(patches, w1_ref[...],
                 preferred_element_type=f32) + b1_ref[...]         # [576, 20]

    # ---- max-pool 2x2/2 + ReLU ---------------------------------------------
    # Patch rows were pre-grouped by pooling-window parity:
    #   rows [g*144:(g+1)*144) hold window tap g at pooled position i*12+j.
    pool1 = jnp.maximum(jnp.maximum(h1[0:144], h1[144:288]),
                        jnp.maximum(h1[288:432], h1[432:576]))
    pool1 = jnp.maximum(pool1, 0.0)                                # [144, 20]

    # Stash in VMEM scratch; zero the pad rows that the shifted conv2 slabs
    # may touch (they only ever feed discarded accumulator rows).
    pool1_ref[144:152, :] = jnp.zeros((8, 20), f32)
    pool1_ref[0:144, :] = pool1

    # ---- conv2: 25 shifted-slab matmuls accumulated in registers -----------
    # Accumulator row a = oh2*12 + ow2 (only ow2 < 8 is a real output).
    acc2 = jnp.zeros((96, 50), f32) + b2_ref[...]                  # [96, 50]
    for di in range(5):
        for dj in range(5):
            start = 12 * di + dj
            slab = pool1_ref[start:start + 96, :]                  # [96, 20]
            acc2 = acc2 + jnp.dot(slab, w2_ref[di * 5 + dj],
                                  preferred_element_type=f32)

    # ---- max-pool 2x2/2 + ReLU + fc1 (torch C,H,W flatten folded in) -------
    # fc1 weight is pre-permuted to [16 spatial positions, 50 ch, 500].
    fc1 = bf1_ref[...]                                             # [1, 500]
    for h in range(4):
        for w in range(4):
            base = 24 * h + 2 * w                                  # row oh2=2h, ow2=2w
            v = jnp.maximum(
                jnp.maximum(acc2[base:base + 1, :],
                            acc2[base + 1:base + 2, :]),
                jnp.maximum(acc2[base + 12:base + 13, :],
                            acc2[base + 13:base + 14, :]))
            v = jnp.maximum(v, 0.0)                                # [1, 50]
            fc1 = fc1 + jnp.dot(v, wf1_ref[h * 4 + w],
                                preferred_element_type=f32)

    # ---- fc2 (NOTE: no activation between fc1 and fc2, as in the spec) -----
    out = jnp.dot(fc1, wf2_ref[...],
                  preferred_element_type=f32) + bf2_ref[...]       # [1, 10]
    out_ref[0] = out


def _lenet_pallas(patches1, kp):
    B = patches1.shape[0]
    res2 = lambda b: (0, 0)        # VMEM-resident (constant block index)
    res3 = lambda b: (0, 0, 0)
    return pl.pallas_call(
        _lenet_fused_kernel,
        out_shape=jax.ShapeDtypeStruct((B, 1, 10), jnp.float32),
        grid=(B,),
        in_specs=[
            pl.BlockSpec((1, 576, 25), lambda b: (b, 0, 0)),   # per-image patches
            pl.BlockSpec((25, 20), res2),                      # conv1 weight (matmul form)
            pl.BlockSpec((1, 20), res2),                       # conv1 bias
            pl.BlockSpec((25, 20, 50), res3),                  # conv2 weight [tap, ci, co]
            pl.BlockSpec((1, 50), res2),                       # conv2 bias
            pl.BlockSpec((16, 50, 500), res3),                 # fc1 weight [pos, ch, out]
            pl.BlockSpec((1, 500), res2),                      # fc1 bias
            pl.BlockSpec((500, 10), res2),                     # fc2 weight (pre-transposed)
            pl.BlockSpec((1, 10), res2),                       # fc2 bias
        ],
        out_specs=pl.BlockSpec((1, 1, 10), lambda b: (b, 0, 0)),
        scratch_shapes=[pltpu.VMEM((152, 20), jnp.float32)],   # pool1 (+8 pad rows)
        compiler_params=pltpu.CompilerParams(
            dimension_semantics=("parallel",)),                # shard batch across TCs
    )(patches1, kp["w1m"], kp["b1"], kp["w2m"], kp["b2"],
      kp["wf1"], kp["bf1"], kp["wf2"], kp["bf2"])


# ------------------------------- JAX glue ----------------------------------

def init_params(key):
    # Deterministic synthetic init (PyTorch-default-style uniform bounds),
    # stored in the original PyTorch layouts.
    ks = jax.random.split(key, 8)

    def u(k, shape, fan_in):
        bound = 1.0 / (fan_in ** 0.5)
        return jax.random.uniform(k, shape, jnp.float32, -bound, bound)

    return {
        "conv1_w": u(ks[0], (20, 1, 5, 5), 1 * 5 * 5),
        "conv1_b": u(ks[1], (20,), 1 * 5 * 5),
        "conv2_w": u(ks[2], (50, 20, 5, 5), 20 * 5 * 5),
        "conv2_b": u(ks[3], (50,), 20 * 5 * 5),
        "fc1_w": u(ks[4], (500, 4 * 4 * 50), 4 * 4 * 50),
        "fc1_b": u(ks[5], (500,), 4 * 4 * 50),
        "fc2_w": u(ks[6], (10, 500), 500),
        "fc2_b": u(ks[7], (10,), 500),
    }


def prepare_params(params):
    """One-time re-layout of the PyTorch weights into kernel-ready form."""
    # conv1 [20,1,5,5] -> [25,20]   (row t = di*5+dj)
    w1m = jnp.transpose(params["conv1_w"].reshape(20, 25), (1, 0))
    # conv2 [50,20,5,5] -> [25,20,50]  (tap, ci, co)
    w2m = jnp.transpose(params["conv2_w"], (2, 3, 1, 0)).reshape(25, 20, 50)
    # fc1 [500,800] with k = c*16 + h*4 + w  ->  [16 (h*4+w), 50 (c), 500]
    wf1 = jnp.transpose(params["fc1_w"].reshape(500, 50, 16), (2, 1, 0))
    # fc2 [10,500] -> [500,10]
    wf2 = jnp.transpose(params["fc2_w"], (1, 0))
    return {
        "w1m": w1m, "b1": params["conv1_b"].reshape(1, 20),
        "w2m": w2m, "b2": params["conv2_b"].reshape(1, 50),
        "wf1": wf1, "bf1": params["fc1_b"].reshape(1, 500),
        "wf2": wf2, "bf2": params["fc2_b"].reshape(1, 10),
    }


@jax.jit
def lenet_forward(x_nchw, kparams):
    # x_nchw: [B, 1, 28, 28] float32 (PyTorch NCHW input layout).
    B = x_nchw.shape[0]
    x = x_nchw[:, 0]                                   # [B, 28, 28]
    # im2col of the raw input for conv1 (cheap XLA plumbing, ~57 KB/image).
    taps = [x[:, di:di + 24, dj:dj + 24]
            for di in range(5) for dj in range(5)]
    p = jnp.stack(taps, axis=-1)                       # [B, 24, 24, 25]
    # Reorder rows by 2x2-pool parity: r = (a*2+b)*144 + i*12 + j,
    # where (oh, ow) = (2i+a, 2j+b).  This makes pool1 three block-maxes.
    p = p.reshape(B, 12, 2, 12, 2, 25)
    p = jnp.transpose(p, (0, 2, 4, 1, 3, 5))           # [B, 2, 2, 12, 12, 25]
    patches1 = p.reshape(B, 576, 25)
    out = _lenet_pallas(patches1, kparams)             # [B, 1, 10]
    return out[:, 0, :]


# --------------------------- pure-JAX reference ----------------------------

def lenet_reference(x_nchw, params):
    hp = lax.Precision.HIGHEST
    dn1 = lax.conv_dimension_numbers(x_nchw.shape, params["conv1_w"].shape,
                                     ("NCHW", "OIHW", "NCHW"))
    x = lax.conv_general_dilated(x_nchw, params["conv1_w"], (1, 1), "VALID",
                                 dimension_numbers=dn1, precision=hp)
    x = x + params["conv1_b"][None, :, None, None]
    x = lax.reduce_window(x, -jnp.inf, lax.max, (1, 1, 2, 2), (1, 1, 2, 2), "VALID")
    x = jnp.maximum(x, 0.0)
    dn2 = lax.conv_dimension_numbers(x.shape, params["conv2_w"].shape,
                                     ("NCHW", "OIHW", "NCHW"))
    x = lax.conv_general_dilated(x, params["conv2_w"], (1, 1), "VALID",
                                 dimension_numbers=dn2, precision=hp)
    x = x + params["conv2_b"][None, :, None, None]
    x = lax.reduce_window(x, -jnp.inf, lax.max, (1, 1, 2, 2), (1, 1, 2, 2), "VALID")
    x = jnp.maximum(x, 0.0)
    x = x.reshape(x.shape[0], 4 * 4 * 50)              # torch view: (C, H, W) order
    x = jnp.dot(x, params["fc1_w"].T, precision=hp) + params["fc1_b"]
    x = jnp.dot(x, params["fc2_w"].T, precision=hp) + params["fc2_b"]
    return x


if __name__ == "__main__":
    key = jax.random.PRNGKey(0)
    kx, kp = jax.random.split(key)
    x = jax.random.normal(kx, (2, 1, 28, 28), jnp.float32)   # batch=2, MNIST-sized
    params = init_params(kp)
    kparams = prepare_params(params)

    out = lenet_forward(x, kparams)
    jax.block_until_ready(out)
    assert out.shape == (2, 10) and out.dtype == jnp.float32

    ref = lenet_reference(x, params)
    err = float(jnp.max(jnp.abs(out - ref)))
    assert err < 2e-3, f"max abs error vs reference: {err}"
    print("KERNEL_OK")
</pallas_src>

<mosaic_0001>
module attributes {stable_mosaic.version = 11 : i64} {
  func.func @_lenet_fused_kernel(%arg0: i32, %arg1: memref<1x576x25xf32, #tpu.memory_space<vmem>>, %arg2: memref<25x20xf32, #tpu.memory_space<vmem>>, %arg3: memref<1x20xf32, #tpu.memory_space<vmem>>, %arg4: memref<25x20x50xf32, #tpu.memory_space<vmem>>, %arg5: memref<1x50xf32, #tpu.memory_space<vmem>>, %arg6: memref<16x50x500xf32, #tpu.memory_space<vmem>>, %arg7: memref<1x500xf32, #tpu.memory_space<vmem>>, %arg8: memref<500x10xf32, #tpu.memory_space<vmem>>, %arg9: memref<1x10xf32, #tpu.memory_space<vmem>>, %arg10: memref<1x1x10xf32, #tpu.memory_space<vmem>>, %arg11: memref<152x20xf32, #tpu.memory_space<vmem>>) attributes {dimension_semantics = [#tpu.dimension_semantics<parallel>], iteration_bounds = array<i64: 2>, scalar_prefetch = 0 : i64, scratch_operands = 1 : i64, tpu.core_type = #tpu.core_type<tc>, window_params = [{transform_indices = @transform_0, window_bounds = array<i64: 1, 576, 25>}, {pipeline_mode = #tpu.pipeline_mode<synchronous>, transform_indices = @transform_1, window_bounds = array<i64: 25, 20>}, {pipeline_mode = #tpu.pipeline_mode<synchronous>, transform_indices = @transform_2, window_bounds = array<i64: 1, 20>}, {pipeline_mode = #tpu.pipeline_mode<synchronous>, transform_indices = @transform_3, window_bounds = array<i64: 25, 20, 50>}, {pipeline_mode = #tpu.pipeline_mode<synchronous>, transform_indices = @transform_4, window_bounds = array<i64: 1, 50>}, {pipeline_mode = #tpu.pipeline_mode<synchronous>, transform_indices = @transform_5, window_bounds = array<i64: 16, 50, 500>}, {pipeline_mode = #tpu.pipeline_mode<synchronous>, transform_indices = @transform_6, window_bounds = array<i64: 1, 500>}, {pipeline_mode = #tpu.pipeline_mode<synchronous>, transform_indices = @transform_7, window_bounds = array<i64: 500, 10>}, {pipeline_mode = #tpu.pipeline_mode<synchronous>, transform_indices = @transform_8, window_bounds = array<i64: 1, 10>}, {transform_indices = @transform_9, window_bounds = array<i64: 1, 1, 10>}]} {
    %c0 = arith.constant 0 : index
    %c0_0 = arith.constant 0 : index
    %c0_1 = arith.constant 0 : index
    %0 = vector.load %arg1[%c0, %c0_0, %c0_1] : memref<1x576x25xf32, #tpu.memory_space<vmem>>, vector<1x576x25xf32>
    %1 = vector.shape_cast %0 : vector<1x576x25xf32> to vector<576x25xf32>
    %c0_2 = arith.constant 0 : index
    %c0_3 = arith.constant 0 : index
    %2 = vector.load %arg2[%c0_2, %c0_3] : memref<25x20xf32, #tpu.memory_space<vmem>>, vector<25x20xf32>
    %cst = arith.constant dense<0.000000e+00> : vector<576x20xf32>
    %3 = tpu.matmul %1, %2, %cst {dimension_numbers = #tpu.dot_dimension_numbers<[1], [0], [0], [1], [0, 0, 1, 1], [], []>} : vector<576x25xf32>, vector<25x20xf32>, vector<576x20xf32> -> vector<576x20xf32>
    %c0_4 = arith.constant 0 : index
    %c0_5 = arith.constant 0 : index
    %4 = vector.load %arg3[%c0_4, %c0_5] : memref<1x20xf32, #tpu.memory_space<vmem>>, vector<1x20xf32>
    %5 = vector.broadcast %4 : vector<1x20xf32> to vector<576x20xf32>
    %6 = arith.addf %3, %5 : vector<576x20xf32>
    %7 = vector.extract_strided_slice %6 {offsets = [0, 0], sizes = [144, 20], strides = [1, 1]} : vector<576x20xf32> to vector<144x20xf32>
    %8 = vector.extract_strided_slice %6 {offsets = [144, 0], sizes = [144, 20], strides = [1, 1]} : vector<576x20xf32> to vector<144x20xf32>
    %9 = arith.maximumf %7, %8 : vector<144x20xf32>
    %10 = vector.extract_strided_slice %6 {offsets = [288, 0], sizes = [144, 20], strides = [1, 1]} : vector<576x20xf32> to vector<144x20xf32>
    %11 = vector.extract_strided_slice %6 {offsets = [432, 0], sizes = [144, 20], strides = [1, 1]} : vector<576x20xf32> to vector<144x20xf32>
    %12 = arith.maximumf %10, %11 : vector<144x20xf32>
    %13 = arith.maximumf %9, %12 : vector<144x20xf32>
    %cst_6 = arith.constant 0.000000e+00 : f32
    %14 = vector.broadcast %cst_6 : f32 to vector<144x20xf32>
    %15 = arith.maximumf %13, %14 : vector<144x20xf32>
    %cst_7 = arith.constant 0.000000e+00 : f32
    %16 = vector.broadcast %cst_7 : f32 to vector<8x20xf32>
    %c144 = arith.constant 144 : index
    %c0_8 = arith.constant 0 : index
    %17 = vector.load %arg11[%c144, %c0_8] : memref<152x20xf32, #tpu.memory_space<vmem>>, vector<8x20xf32>
    tpu.vector_store %arg11[%c144, %c0_8], %16 {strides = array<i32>} : memref<152x20xf32, #tpu.memory_space<vmem>>, vector<8x20xf32>,
    %c0_9 = arith.constant 0 : index
    %c0_10 = arith.constant 0 : index
    %18 = vector.load %arg11[%c0_9, %c0_10] : memref<152x20xf32, #tpu.memory_space<vmem>>, vector<144x20xf32>
    tpu.vector_store %arg11[%c0_9, %c0_10], %15 {strides = array<i32>} : memref<152x20xf32, #tpu.memory_space<vmem>>, vector<144x20xf32>,
    %cst_11 = arith.constant 0.000000e+00 : f32
    %19 = vector.broadcast %cst_11 : f32 to vector<96x50xf32>
    %c0_12 = arith.constant 0 : index
    %c0_13 = arith.constant 0 : index
    %20 = vector.load %arg5[%c0_12, %c0_13] : memref<1x50xf32, #tpu.memory_space<vmem>>, vector<1x50xf32>
    %21 = vector.broadcast %20 : vector<1x50xf32> to vector<96x50xf32>
    %22 = arith.addf %19, %21 : vector<96x50xf32>
    %c0_14 = arith.constant 0 : index
    %c0_15 = arith.constant 0 : index
    %23 = vector.load %arg11[%c0_14, %c0_15] : memref<152x20xf32, #tpu.memory_space<vmem>>, vector<96x20xf32>
    %c0_16 = arith.constant 0 : index
    %c0_17 = arith.constant 0 : index
    %c0_18 = arith.constant 0 : index
    %24 = vector.load %arg4[%c0_16, %c0_17, %c0_18] : memref<25x20x50xf32, #tpu.memory_space<vmem>>, vector<1x20x50xf32>
    %25 = vector.shape_cast %24 : vector<1x20x50xf32> to vector<20x50xf32>
    %cst_19 = arith.constant dense<0.000000e+00> : vector<96x50xf32>
    %26 = tpu.matmul %23, %25, %cst_19 {dimension_numbers = #tpu.dot_dimension_numbers<[1], [0], [0], [1], [0, 0, 1, 1], [], []>} : vector<96x20xf32>, vector<20x50xf32>, vector<96x50xf32> -> vector<96x50xf32>
    %27 = arith.addf %22, %26 : vector<96x50xf32>
    %c1 = arith.constant 1 : index
    %c0_20 = arith.constant 0 : index
    %28 = vector.load %arg11[%c1, %c0_20] : memref<152x20xf32, #tpu.memory_space<vmem>>, vector<96x20xf32>
    %c1_21 = arith.constant 1 : index
    %c0_22 = arith.constant 0 : index
    %c0_23 = arith.constant 0 : index
    %29 = vector.load %arg4[%c1_21, %c0_22, %c0_23] : memref<25x20x50xf32, #tpu.memory_space<vmem>>, vector<1x20x50xf32>
    %30 = vector.shape_cast %29 : vector<1x20x50xf32> to vector<20x50xf32>
    %cst_24 = arith.constant dense<0.000000e+00> : vector<96x50xf32>
    %31 = tpu.matmul %28, %30, %cst_24 {dimension_numbers = #tpu.dot_dimension_numbers<[1], [0], [0], [1], [0, 0, 1, 1], [], []>} : vector<96x20xf32>, vector<20x50xf32>, vector<96x50xf32> -> vector<96x50xf32>
    %32 = arith.addf %27, %31 : vector<96x50xf32>
    %c2 = arith.constant 2 : index
    %c0_25 = arith.constant 0 : index
    %33 = vector.load %arg11[%c2, %c0_25] : memref<152x20xf32, #tpu.memory_space<vmem>>, vector<96x20xf32>
    %c2_26 = arith.constant 2 : index
    %c0_27 = arith.constant 0 : index
    %c0_28 = arith.constant 0 : index
    %34 = vector.load %arg4[%c2_26, %c0_27, %c0_28] : memref<25x20x50xf32, #tpu.memory_space<vmem>>, vector<1x20x50xf32>
    %35 = vector.shape_cast %34 : vector<1x20x50xf32> to vector<20x50xf32>
    %cst_29 = arith.constant dense<0.000000e+00> : vector<96x50xf32>
    %36 = tpu.matmul %33, %35, %cst_29 {dimension_numbers = #tpu.dot_dimension_numbers<[1], [0], [0], [1], [0, 0, 1, 1], [], []>} : vector<96x20xf32>, vector<20x50xf32>, vector<96x50xf32> -> vector<96x50xf32>
    %37 = arith.addf %32, %36 : vector<96x50xf32>
    %c3 = arith.constant 3 : index
    %c0_30 = arith.constant 0 : index
    %38 = vector.load %arg11[%c3, %c0_30] : memref<152x20xf32, #tpu.memory_space<vmem>>, vector<96x20xf32>
    %c3_31 = arith.constant 3 : index
    %c0_32 = arith.constant 0 : index
    %c0_33 = arith.constant 0 : index
    %39 = vector.load %arg4[%c3_31, %c0_32, %c0_33] : memref<25x20x50xf32, #tpu.memory_space<vmem>>, vector<1x20x50xf32>
    %40 = vector.shape_cast %39 : vector<1x20x50xf32> to vector<20x50xf32>
    %cst_34 = arith.constant dense<0.000000e+00> : vector<96x50xf32>
    %41 = tpu.matmul %38, %40, %cst_34 {dimension_numbers = #tpu.dot_dimension_numbers<[1], [0], [0], [1], [0, 0, 1, 1], [], []>} : vector<96x20xf32>, vector<20x50xf32>, vector<96x50xf32> -> vector<96x50xf32>
    %42 = arith.addf %37, %41 : vector<96x50xf32>
    %c4 = arith.constant 4 : index
    %c0_35 = arith.constant 0 : index
    %43 = vector.load %arg11[%c4, %c0_35] : memref<152x20xf32, #tpu.memory_space<vmem>>, vector<96x20xf32>
    %c4_36 = arith.constant 4 : index
    %c0_37 = arith.constant 0 : index
    %c0_38 = arith.constant 0 : index
    %44 = vector.load %arg4[%c4_36, %c0_37, %c0_38] : memref<25x20x50xf32, #tpu.memory_space<vmem>>, vector<1x20x50xf32>
    %45 = vector.shape_cast %44 : vector<1x20x50xf32> to vector<20x50xf32>
    %cst_39 = arith.constant dense<0.000000e+00> : vector<96x50xf32>
    %46 = tpu.matmul %43, %45, %cst_39 {dimension_numbers = #tpu.dot_dimension_numbers<[1], [0], [0], [1], [0, 0, 1, 1], [], []>} : vector<96x20xf32>, vector<20x50xf32>, vector<96x50xf32> -> vector<96x50xf32>
    %47 = arith.addf %42, %46 : vector<96x50xf32>
    %c12 = arith.constant 12 : index
    %c0_40 = arith.constant 0 : index
    %48 = vector.load %arg11[%c12, %c0_40] : memref<152x20xf32, #tpu.memory_space<vmem>>, vector<96x20xf32>
    %c5 = arith.constant 5 : index
    %c0_41 = arith.constant 0 : index
    %c0_42 = arith.constant 0 : index
    %49 = vector.load %arg4[%c5, %c0_41, %c0_42] : memref<25x20x50xf32, #tpu.memory_space<vmem>>, vector<1x20x50xf32>
    %50 = vector.shape_cast %49 : vector<1x20x50xf32> to vector<20x50xf32>
    %cst_43 = arith.constant dense<0.000000e+00> : vector<96x50xf32>
    %51 = tpu.matmul %48, %50, %cst_43 {dimension_numbers = #tpu.dot_dimension_numbers<[1], [0], [0], [1], [0, 0, 1, 1], [], []>} : vector<96x20xf32>, vector<20x50xf32>, vector<96x50xf32> -> vector<96x50xf32>
    %52 = arith.addf %47, %51 : vector<96x50xf32>
    %c13 = arith.constant 13 : index
    %c0_44 = arith.constant 0 : index
    %53 = vector.load %arg11[%c13, %c0_44] : memref<152x20xf32, #tpu.memory_space<vmem>>, vector<96x20xf32>
    %c6 = arith.constant 6 : index
    %c0_45 = arith.constant 0 : index
    %c0_46 = arith.constant 0 : index
    %54 = vector.load %arg4[%c6, %c0_45, %c0_46] : memref<25x20x50xf32, #tpu.memory_space<vmem>>, vector<1x20x50xf32>
    %55 = vector.shape_cast %54 : vector<1x20x50xf32> to vector<20x50xf32>
    %cst_47 = arith.constant dense<0.000000e+00> : vector<96x50xf32>
    %56 = tpu.matmul %53, %55, %cst_47 {dimension_numbers = #tpu.dot_dimension_numbers<[1], [0], [0], [1], [0, 0, 1, 1], [], []>} : vector<96x20xf32>, vector<20x50xf32>, vector<96x50xf32> -> vector<96x50xf32>
    %57 = arith.addf %52, %56 : vector<96x50xf32>
    %c14 = arith.constant 14 : index
    %c0_48 = arith.constant 0 : index
    %58 = vector.load %arg11[%c14, %c0_48] : memref<152x20xf32, #tpu.memory_space<vmem>>, vector<96x20xf32>
    %c7 = arith.constant 7 : index
    %c0_49 = arith.constant 0 : index
    %c0_50 = arith.constant 0 : index
    %59 = vector.load %arg4[%c7, %c0_49, %c0_50] : memref<25x20x50xf32, #tpu.memory_space<vmem>>, vector<1x20x50xf32>
    %60 = vector.shape_cast %59 : vector<1x20x50xf32> to vector<20x50xf32>
    %cst_51 = arith.constant dense<0.000000e+00> : vector<96x50xf32>
    %61 = tpu.matmul %58, %60, %cst_51 {dimension_numbers = #tpu.dot_dimension_numbers<[1], [0], [0], [1], [0, 0, 1, 1], [], []>} : vector<96x20xf32>, vector<20x50xf32>, vector<96x50xf32> -> vector<96x50xf32>
    %62 = arith.addf %57, %61 : vector<96x50xf32>
    %c15 = arith.constant 15 : index
    %c0_52 = arith.constant 0 : index
    %63 = vector.load %arg11[%c15, %c0_52] : memref<152x20xf32, #tpu.memory_space<vmem>>, vector<96x20xf32>
    %c8 = arith.constant 8 : index
    %c0_53 = arith.constant 0 : index
    %c0_54 = arith.constant 0 : index
    %64 = vector.load %arg4[%c8, %c0_53, %c0_54] : memref<25x20x50xf32, #tpu.memory_space<vmem>>, vector<1x20x50xf32>
    %65 = vector.shape_cast %64 : vector<1x20x50xf32> to vector<20x50xf32>
    %cst_55 = arith.constant dense<0.000000e+00> : vector<96x50xf32>
    %66 = tpu.matmul %63, %65, %cst_55 {dimension_numbers = #tpu.dot_dimension_numbers<[1], [0], [0], [1], [0, 0, 1, 1], [], []>} : vector<96x20xf32>, vector<20x50xf32>, vector<96x50xf32> -> vector<96x50xf32>
    %67 = arith.addf %62, %66 : vector<96x50xf32>
    %c16 = arith.constant 16 : index
    %c0_56 = arith.constant 0 : index
    %68 = vector.load %arg11[%c16, %c0_56] : memref<152x20xf32, #tpu.memory_space<vmem>>, vector<96x20xf32>
    %c9 = arith.constant 9 : index
    %c0_57 = arith.constant 0 : index
    %c0_58 = arith.constant 0 : index
    %69 = vector.load %arg4[%c9, %c0_57, %c0_58] : memref<25x20x50xf32, #tpu.memory_space<vmem>>, vector<1x20x50xf32>
    %70 = vector.shape_cast %69 : vector<1x20x50xf32> to vector<20x50xf32>
    %cst_59 = arith.constant dense<0.000000e+00> : vector<96x50xf32>
    %71 = tpu.matmul %68, %70, %cst_59 {dimension_numbers = #tpu.dot_dimension_numbers<[1], [0], [0], [1], [0, 0, 1, 1], [], []>} : vector<96x20xf32>, vector<20x50xf32>, vector<96x50xf32> -> vector<96x50xf32>
    %72 = arith.addf %67, %71 : vector<96x50xf32>
    %c24 = arith.constant 24 : index
    %c0_60 = arith.constant 0 : index
    %73 = vector.load %arg11[%c24, %c0_60] : memref<152x20xf32, #tpu.memory_space<vmem>>, vector<96x20xf32>
    %c10 = arith.constant 10 : index
    %c0_61 = arith.constant 0 : index
    %c0_62 = arith.constant 0 : index
    %74 = vector.load %arg4[%c10, %c0_61, %c0_62] : memref<25x20x50xf32, #tpu.memory_space<vmem>>, vector<1x20x50xf32>
    %75 = vector.shape_cast %74 : vector<1x20x50xf32> to vector<20x50xf32>
    %cst_63 = arith.constant dense<0.000000e+00> : vector<96x50xf32>
    %76 = tpu.matmul %73, %75, %cst_63 {dimension_numbers = #tpu.dot_dimension_numbers<[1], [0], [0], [1], [0, 0, 1, 1], [], []>} : vector<96x20xf32>, vector<20x50xf32>, vector<96x50xf32> -> vector<96x50xf32>
    %77 = arith.addf %72, %76 : vector<96x50xf32>
    %c25 = arith.constant 25 : index
    %c0_64 = arith.constant 0 : index
    %78 = vector.load %arg11[%c25, %c0_64] : memref<152x20xf32, #tpu.memory_space<vmem>>, vector<96x20xf32>
    %c11 = arith.constant 11 : index
    %c0_65 = arith.constant 0 : index
    %c0_66 = arith.constant 0 : index
    %79 = vector.load %arg4[%c11, %c0_65, %c0_66] : memref<25x20x50xf32, #tpu.memory_space<vmem>>, vector<1x20x50xf32>
    %80 = vector.shape_cast %79 : vector<1x20x50xf32> to vector<20x50xf32>
    %cst_67 = arith.constant dense<0.000000e+00> : vector<96x50xf32>
    %81 = tpu.matmul %78, %80, %cst_67 {dimension_numbers = #tpu.dot_dimension_numbers<[1], [0], [0], [1], [0, 0, 1, 1], [], []>} : vector<96x20xf32>, vector<20x50xf32>, vector<96x50xf32> -> vector<96x50xf32>
    %82 = arith.addf %77, %81 : vector<96x50xf32>
    %c26 = arith.constant 26 : index
    %c0_68 = arith.constant 0 : index
    %83 = vector.load %arg11[%c26, %c0_68] : memref<152x20xf32, #tpu.memory_space<vmem>>, vector<96x20xf32>
    %c12_69 = arith.constant 12 : index
    %c0_70 = arith.constant 0 : index
    %c0_71 = arith.constant 0 : index
    %84 = vector.load %arg4[%c12_69, %c0_70, %c0_71] : memref<25x20x50xf32, #tpu.memory_space<vmem>>, vector<1x20x50xf32>
    %85 = vector.shape_cast %84 : vector<1x20x50xf32> to vector<20x50xf32>
    %cst_72 = arith.constant dense<0.000000e+00> : vector<96x50xf32>
    %86 = tpu.matmul %83, %85, %cst_72 {dimension_numbers = #tpu.dot_dimension_numbers<[1], [0], [0], [1], [0, 0, 1, 1], [], []>} : vector<96x20xf32>, vector<20x50xf32>, vector<96x50xf32> -> vector<96x50xf32>
    %87 = arith.addf %82, %86 : vector<96x50xf32>
    %c27 = arith.constant 27 : index
    %c0_73 = arith.constant 0 : index
    %88 = vector.load %arg11[%c27, %c0_73] : memref<152x20xf32, #tpu.memory_space<vmem>>, vector<96x20xf32>
    %c13_74 = arith.constant 13 : index
    %c0_75 = arith.constant 0 : index
    %c0_76 = arith.constant 0 : index
    %89 = vector.load %arg4[%c13_74, %c0_75, %c0_76] : memref<25x20x50xf32, #tpu.memory_space<vmem>>, vector<1x20x50xf32>
    %90 = vector.shape_cast %89 : vector<1x20x50xf32> to vector<20x50xf32>
    %cst_77 = arith.constant dense<0.000000e+00> : vector<96x50xf32>
    %91 = tpu.matmul %88, %90, %cst_77 {dimension_numbers = #tpu.dot_dimension_numbers<[1], [0], [0], [1], [0, 0, 1, 1], [], []>} : vector<96x20xf32>, vector<20x50xf32>, vector<96x50xf32> -> vector<96x50xf32>
    %92 = arith.addf %87, %91 : vector<96x50xf32>
    %c28 = arith.constant 28 : index
    %c0_78 = arith.constant 0 : index
    %93 = vector.load %arg11[%c28, %c0_78] : memref<152x20xf32, #tpu.memory_space<vmem>>, vector<96x20xf32>
    %c14_79 = arith.constant 14 : index
    %c0_80 = arith.constant 0 : index
    %c0_81 = arith.constant 0 : index
    %94 = vector.load %arg4[%c14_79, %c0_80, %c0_81] : memref<25x20x50xf32, #tpu.memory_space<vmem>>, vector<1x20x50xf32>
    %95 = vector.shape_cast %94 : vector<1x20x50xf32> to vector<20x50xf32>
    %cst_82 = arith.constant dense<0.000000e+00> : vector<96x50xf32>
    %96 = tpu.matmul %93, %95, %cst_82 {dimension_numbers = #tpu.dot_dimension_numbers<[1], [0], [0], [1], [0, 0, 1, 1], [], []>} : vector<96x20xf32>, vector<20x50xf32>, vector<96x50xf32> -> vector<96x50xf32>
    %97 = arith.addf %92, %96 : vector<96x50xf32>
    %c36 = arith.constant 36 : index
    %c0_83 = arith.constant 0 : index
    %98 = vector.load %arg11[%c36, %c0_83] : memref<152x20xf32, #tpu.memory_space<vmem>>, vector<96x20xf32>
    %c15_84 = arith.constant 15 : index
    %c0_85 = arith.constant 0 : index
    %c0_86 = arith.constant 0 : index
    %99 = vector.load %arg4[%c15_84, %c0_85, %c0_86] : memref<25x20x50xf32, #tpu.memory_space<vmem>>, vector<1x20x50xf32>
    %100 = vector.shape_cast %99 : vector<1x20x50xf32> to vector<20x50xf32>
    %cst_87 = arith.constant dense<0.000000e+00> : vector<96x50xf32>
    %101 = tpu.matmul %98, %100, %cst_87 {dimension_numbers = #tpu.dot_dimension_numbers<[1], [0], [0], [1], [0, 0, 1, 1], [], []>} : vector<96x20xf32>, vector<20x50xf32>, vector<96x50xf32> -> vector<96x50xf32>
    %102 = arith.addf %97, %101 : vector<96x50xf32>
    %c37 = arith.constant 37 : index
    %c0_88 = arith.constant 0 : index
    %103 = vector.load %arg11[%c37, %c0_88] : memref<152x20xf32, #tpu.memory_space<vmem>>, vector<96x20xf32>
    %c16_89 = arith.constant 16 : index
    %c0_90 = arith.constant 0 : index
    %c0_91 = arith.constant 0 : index
    %104 = vector.load %arg4[%c16_89, %c0_90, %c0_91] : memref<25x20x50xf32, #tpu.memory_space<vmem>>, vector<1x20x50xf32>
    %105 = vector.shape_cast %104 : vector<1x20x50xf32> to vector<20x50xf32>
    %cst_92 = arith.constant dense<0.000000e+00> : vector<96x50xf32>
    %106 = tpu.matmul %103, %105, %cst_92 {dimension_numbers = #tpu.dot_dimension_numbers<[1], [0], [0], [1], [0, 0, 1, 1], [], []>} : vector<96x20xf32>, vector<20x50xf32>, vector<96x50xf32> -> vector<96x50xf32>
    %107 = arith.addf %102, %106 : vector<96x50xf32>
    %c38 = arith.constant 38 : index
    %c0_93 = arith.constant 0 : index
    %108 = vector.load %arg11[%c38, %c0_93] : memref<152x20xf32, #tpu.memory_space<vmem>>, vector<96x20xf32>
    %c17 = arith.constant 17 : index
    %c0_94 = arith.constant 0 : index
    %c0_95 = arith.constant 0 : index
    %109 = vector.load %arg4[%c17, %c0_94, %c0_95] : memref<25x20x50xf32, #tpu.memory_space<vmem>>, vector<1x20x50xf32>
    %110 = vector.shape_cast %109 : vector<1x20x50xf32> to vector<20x50xf32>
    %cst_96 = arith.constant dense<0.000000e+00> : vector<96x50xf32>
    %111 = tpu.matmul %108, %110, %cst_96 {dimension_numbers = #tpu.dot_dimension_numbers<[1], [0], [0], [1], [0, 0, 1, 1], [], []>} : vector<96x20xf32>, vector<20x50xf32>, vector<96x50xf32> -> vector<96x50xf32>
    %112 = arith.addf %107, %111 : vector<96x50xf32>
    %c39 = arith.constant 39 : index
    %c0_97 = arith.constant 0 : index
    %113 = vector.load %arg11[%c39, %c0_97] : memref<152x20xf32, #tpu.memory_space<vmem>>, vector<96x20xf32>
    %c18 = arith.constant 18 : index
    %c0_98 = arith.constant 0 : index
    %c0_99 = arith.constant 0 : index
    %114 = vector.load %arg4[%c18, %c0_98, %c0_99] : memref<25x20x50xf32, #tpu.memory_space<vmem>>, vector<1x20x50xf32>
    %115 = vector.shape_cast %114 : vector<1x20x50xf32> to vector<20x50xf32>
    %cst_100 = arith.constant dense<0.000000e+00> : vector<96x50xf32>
    %116 = tpu.matmul %113, %115, %cst_100 {dimension_numbers = #tpu.dot_dimension_numbers<[1], [0], [0], [1], [0, 0, 1, 1], [], []>} : vector<96x20xf32>, vector<20x50xf32>, vector<96x50xf32> -> vector<96x50xf32>
    %117 = arith.addf %112, %116 : vector<96x50xf32>
    %c40 = arith.constant 40 : index
    %c0_101 = arith.constant 0 : index
    %118 = vector.load %arg11[%c40, %c0_101] : memref<152x20xf32, #tpu.memory_space<vmem>>, vector<96x20xf32>
    %c19 = arith.constant 19 : index
    %c0_102 = arith.constant 0 : index
    %c0_103 = arith.constant 0 : index
    %119 = vector.load %arg4[%c19, %c0_102, %c0_103] : memref<25x20x50xf32, #tpu.memory_space<vmem>>, vector<1x20x50xf32>
    %120 = vector.shape_cast %119 : vector<1x20x50xf32> to vector<20x50xf32>
    %cst_104 = arith.constant dense<0.000000e+00> : vector<96x50xf32>
    %121 = tpu.matmul %118, %120, %cst_104 {dimension_numbers = #tpu.dot_dimension_numbers<[1], [0], [0], [1], [0, 0, 1, 1], [], []>} : vector<96x20xf32>, vector<20x50xf32>, vector<96x50xf32> -> vector<96x50xf32>
    %122 = arith.addf %117, %121 : vector<96x50xf32>
    %c48 = arith.constant 48 : index
    %c0_105 = arith.constant 0 : index
    %123 = vector.load %arg11[%c48, %c0_105] : memref<152x20xf32, #tpu.memory_space<vmem>>, vector<96x20xf32>
    %c20 = arith.constant 20 : index
    %c0_106 = arith.constant 0 : index
    %c0_107 = arith.constant 0 : index
    %124 = vector.load %arg4[%c20, %c0_106, %c0_107] : memref<25x20x50xf32, #tpu.memory_space<vmem>>, vector<1x20x50xf32>
    %125 = vector.shape_cast %124 : vector<1x20x50xf32> to vector<20x50xf32>
    %cst_108 = arith.constant dense<0.000000e+00> : vector<96x50xf32>
    %126 = tpu.matmul %123, %125, %cst_108 {dimension_numbers = #tpu.dot_dimension_numbers<[1], [0], [0], [1], [0, 0, 1, 1], [], []>} : vector<96x20xf32>, vector<20x50xf32>, vector<96x50xf32> -> vector<96x50xf32>
    %127 = arith.addf %122, %126 : vector<96x50xf32>
    %c49 = arith.constant 49 : index
    %c0_109 = arith.constant 0 : index
    %128 = vector.load %arg11[%c49, %c0_109] : memref<152x20xf32, #tpu.memory_space<vmem>>, vector<96x20xf32>
    %c21 = arith.constant 21 : index
    %c0_110 = arith.constant 0 : index
    %c0_111 = arith.constant 0 : index
    %129 = vector.load %arg4[%c21, %c0_110, %c0_111] : memref<25x20x50xf32, #tpu.memory_space<vmem>>, vector<1x20x50xf32>
    %130 = vector.shape_cast %129 : vector<1x20x50xf32> to vector<20x50xf32>
    %cst_112 = arith.constant dense<0.000000e+00> : vector<96x50xf32>
    %131 = tpu.matmul %128, %130, %cst_112 {dimension_numbers = #tpu.dot_dimension_numbers<[1], [0], [0], [1], [0, 0, 1, 1], [], []>} : vector<96x20xf32>, vector<20x50xf32>, vector<96x50xf32> -> vector<96x50xf32>
    %132 = arith.addf %127, %131 : vector<96x50xf32>
    %c50 = arith.constant 50 : index
    %c0_113 = arith.constant 0 : index
    %133 = vector.load %arg11[%c50, %c0_113] : memref<152x20xf32, #tpu.memory_space<vmem>>, vector<96x20xf32>
    %c22 = arith.constant 22 : index
    %c0_114 = arith.constant 0 : index
    %c0_115 = arith.constant 0 : index
    %134 = vector.load %arg4[%c22, %c0_114, %c0_115] : memref<25x20x50xf32, #tpu.memory_space<vmem>>, vector<1x20x50xf32>
    %135 = vector.shape_cast %134 : vector<1x20x50xf32> to vector<20x50xf32>
    %cst_116 = arith.constant dense<0.000000e+00> : vector<96x50xf32>
    %136 = tpu.matmul %133, %135, %cst_116 {dimension_numbers = #tpu.dot_dimension_numbers<[1], [0], [0], [1], [0, 0, 1, 1], [], []>} : vector<96x20xf32>, vector<20x50xf32>, vector<96x50xf32> -> vector<96x50xf32>
    %137 = arith.addf %132, %136 : vector<96x50xf32>
    %c51 = arith.constant 51 : index
    %c0_117 = arith.constant 0 : index
    %138 = vector.load %arg11[%c51, %c0_117] : memref<152x20xf32, #tpu.memory_space<vmem>>, vector<96x20xf32>
    %c23 = arith.constant 23 : index
    %c0_118 = arith.constant 0 : index
    %c0_119 = arith.constant 0 : index
    %139 = vector.load %arg4[%c23, %c0_118, %c0_119] : memref<25x20x50xf32, #tpu.memory_space<vmem>>, vector<1x20x50xf32>
    %140 = vector.shape_cast %139 : vector<1x20x50xf32> to vector<20x50xf32>
    %cst_120 = arith.constant dense<0.000000e+00> : vector<96x50xf32>
    %141 = tpu.matmul %138, %140, %cst_120 {dimension_numbers = #tpu.dot_dimension_numbers<[1], [0], [0], [1], [0, 0, 1, 1], [], []>} : vector<96x20xf32>, vector<20x50xf32>, vector<96x50xf32> -> vector<96x50xf32>
    %142 = arith.addf %137, %141 : vector<96x50xf32>
    %c52 = arith.constant 52 : index
    %c0_121 = arith.constant 0 : index
    %143 = vector.load %arg11[%c52, %c0_121] : memref<152x20xf32, #tpu.memory_space<vmem>>, vector<96x20xf32>
    %c24_122 = arith.constant 24 : index
    %c0_123 = arith.constant 0 : index
    %c0_124 = arith.constant 0 : index
    %144 = vector.load %arg4[%c24_122, %c0_123, %c0_124] : memref<25x20x50xf32, #tpu.memory_space<vmem>>, vector<1x20x50xf32>
    %145 = vector.shape_cast %144 : vector<1x20x50xf32> to vector<20x50xf32>
    %cst_125 = arith.constant dense<0.000000e+00> : vector<96x50xf32>
    %146 = tpu.matmul %143, %145, %cst_125 {dimension_numbers = #tpu.dot_dimension_numbers<[1], [0], [0], [1], [0, 0, 1, 1], [], []>} : vector<96x20xf32>, vector<20x50xf32>, vector<96x50xf32> -> vector<96x50xf32>
    %147 = arith.addf %142, %146 : vector<96x50xf32>
    %c0_126 = arith.constant 0 : index
    %c0_127 = arith.constant 0 : index
    %148 = vector.load %arg7[%c0_126, %c0_127] : memref<1x500xf32, #tpu.memory_space<vmem>>, vector<1x500xf32>
    %149 = vector.extract_strided_slice %147 {offsets = [0, 0], sizes = [1, 50], strides = [1, 1]} : vector<96x50xf32> to vector<1x50xf32>
    %150 = vector.extract_strided_slice %147 {offsets = [1, 0], sizes = [1, 50], strides = [1, 1]} : vector<96x50xf32> to vector<1x50xf32>
    %151 = arith.maximumf %149, %150 : vector<1x50xf32>
    %152 = vector.extract_strided_slice %147 {offsets = [12, 0], sizes = [1, 50], strides = [1, 1]} : vector<96x50xf32> to vector<1x50xf32>
    %153 = vector.extract_strided_slice %147 {offsets = [13, 0], sizes = [1, 50], strides = [1, 1]} : vector<96x50xf32> to vector<1x50xf32>
    %154 = arith.maximumf %152, %153 : vector<1x50xf32>
    %155 = arith.maximumf %151, %154 : vector<1x50xf32>
    %cst_128 = arith.constant 0.000000e+00 : f32
    %156 = vector.broadcast %cst_128 : f32 to vector<1x50xf32>
    %157 = arith.maximumf %155, %156 : vector<1x50xf32>
    %c0_129 = arith.constant 0 : index
    %c0_130 = arith.constant 0 : index
    %c0_131 = arith.constant 0 : index
    %158 = vector.load %arg6[%c0_129, %c0_130, %c0_131] : memref<16x50x500xf32, #tpu.memory_space<vmem>>, vector<1x50x500xf32>
    %159 = vector.shape_cast %158 : vector<1x50x500xf32> to vector<50x500xf32>
    %cst_132 = arith.constant dense<0.000000e+00> : vector<1x500xf32>
    %160 = tpu.matmul %157, %159, %cst_132 {dimension_numbers = #tpu.dot_dimension_numbers<[1], [0], [0], [1], [0, 0, 1, 1], [], []>} : vector<1x50xf32>, vector<50x500xf32>, vector<1x500xf32> -> vector<1x500xf32>
    %161 = arith.addf %148, %160 : vector<1x500xf32>
    %162 = vector.extract_strided_slice %147 {offsets = [2, 0], sizes = [1, 50], strides = [1, 1]} : vector<96x50xf32> to vector<1x50xf32>
    %163 = vector.extract_strided_slice %147 {offsets = [3, 0], sizes = [1, 50], strides = [1, 1]} : vector<96x50xf32> to vector<1x50xf32>
    %164 = arith.maximumf %162, %163 : vector<1x50xf32>
    %165 = vector.extract_strided_slice %147 {offsets = [14, 0], sizes = [1, 50], strides = [1, 1]} : vector<96x50xf32> to vector<1x50xf32>
    %166 = vector.extract_strided_slice %147 {offsets = [15, 0], sizes = [1, 50], strides = [1, 1]} : vector<96x50xf32> to vector<1x50xf32>
    %167 = arith.maximumf %165, %166 : vector<1x50xf32>
    %168 = arith.maximumf %164, %167 : vector<1x50xf32>
    %cst_133 = arith.constant 0.000000e+00 : f32
    %169 = vector.broadcast %cst_133 : f32 to vector<1x50xf32>
    %170 = arith.maximumf %168, %169 : vector<1x50xf32>
    %c1_134 = arith.constant 1 : index
    %c0_135 = arith.constant 0 : index
    %c0_136 = arith.constant 0 : index
    %171 = vector.load %arg6[%c1_134, %c0_135, %c0_136] : memref<16x50x500xf32, #tpu.memory_space<vmem>>, vector<1x50x500xf32>
    %172 = vector.shape_cast %171 : vector<1x50x500xf32> to vector<50x500xf32>
    %cst_137 = arith.constant dense<0.000000e+00> : vector<1x500xf32>
    %173 = tpu.matmul %170, %172, %cst_137 {dimension_numbers = #tpu.dot_dimension_numbers<[1], [0], [0], [1], [0, 0, 1, 1], [], []>} : vector<1x50xf32>, vector<50x500xf32>, vector<1x500xf32> -> vector<1x500xf32>
    %174 = arith.addf %161, %173 : vector<1x500xf32>
    %175 = vector.extract_strided_slice %147 {offsets = [4, 0], sizes = [1, 50], strides = [1, 1]} : vector<96x50xf32> to vector<1x50xf32>
    %176 = vector.extract_strided_slice %147 {offsets = [5, 0], sizes = [1, 50], strides = [1, 1]} : vector<96x50xf32> to vector<1x50xf32>
    %177 = arith.maximumf %175, %176 : vector<1x50xf32>
    %178 = vector.extract_strided_slice %147 {offsets = [16, 0], sizes = [1, 50], strides = [1, 1]} : vector<96x50xf32> to vector<1x50xf32>
    %179 = vector.extract_strided_slice %147 {offsets = [17, 0], sizes = [1, 50], strides = [1, 1]} : vector<96x50xf32> to vector<1x50xf32>
    %180 = arith.maximumf %178, %179 : vector<1x50xf32>
    %181 = arith.maximumf %177, %180 : vector<1x50xf32>
    %cst_138 = arith.constant 0.000000e+00 : f32
    %182 = vector.broadcast %cst_138 : f32 to vector<1x50xf32>
    %183 = arith.maximumf %181, %182 : vector<1x50xf32>
    %c2_139 = arith.constant 2 : index
    %c0_140 = arith.constant 0 : index
    %c0_141 = arith.constant 0 : index
    %184 = vector.load %arg6[%c2_139, %c0_140, %c0_141] : memref<16x50x500xf32, #tpu.memory_space<vmem>>, vector<1x50x500xf32>
    %185 = vector.shape_cast %184 : vector<1x50x500xf32> to vector<50x500xf32>
    %cst_142 = arith.constant dense<0.000000e+00> : vector<1x500xf32>
    %186 = tpu.matmul %183, %185, %cst_142 {dimension_numbers = #tpu.dot_dimension_numbers<[1], [0], [0], [1], [0, 0, 1, 1], [], []>} : vector<1x50xf32>, vector<50x500xf32>, vector<1x500xf32> -> vector<1x500xf32>
    %187 = arith.addf %174, %186 : vector<1x500xf32>
    %188 = vector.extract_strided_slice %147 {offsets = [6, 0], sizes = [1, 50], strides = [1, 1]} : vector<96x50xf32> to vector<1x50xf32>
    %189 = vector.extract_strided_slice %147 {offsets = [7, 0], sizes = [1, 50], strides = [1, 1]} : vector<96x50xf32> to vector<1x50xf32>
    %190 = arith.maximumf %188, %189 : vector<1x50xf32>
    %191 = vector.extract_strided_slice %147 {offsets = [18, 0], sizes = [1, 50], strides = [1, 1]} : vector<96x50xf32> to vector<1x50xf32>
    %192 = vector.extract_strided_slice %147 {offsets = [19, 0], sizes = [1, 50], strides = [1, 1]} : vector<96x50xf32> to vector<1x50xf32>
    %193 = arith.maximumf %191, %192 : vector<1x50xf32>
    %194 = arith.maximumf %190, %193 : vector<1x50xf32>
    %cst_143 = arith.constant 0.000000e+00 : f32
    %195 = vector.broadcast %cst_143 : f32 to vector<1x50xf32>
    %196 = arith.maximumf %194, %195 : vector<1x50xf32>
    %c3_144 = arith.constant 3 : index
    %c0_145 = arith.constant 0 : index
    %c0_146 = arith.constant 0 : index
    %197 = vector.load %arg6[%c3_144, %c0_145, %c0_146] : memref<16x50x500xf32, #tpu.memory_space<vmem>>, vector<1x50x500xf32>
    %198 = vector.shape_cast %197 : vector<1x50x500xf32> to vector<50x500xf32>
    %cst_147 = arith.constant dense<0.000000e+00> : vector<1x500xf32>
    %199 = tpu.matmul %196, %198, %cst_147 {dimension_numbers = #tpu.dot_dimension_numbers<[1], [0], [0], [1], [0, 0, 1, 1], [], []>} : vector<1x50xf32>, vector<50x500xf32>, vector<1x500xf32> -> vector<1x500xf32>
    %200 = arith.addf %187, %199 : vector<1x500xf32>
    %201 = vector.extract_strided_slice %147 {offsets = [24, 0], sizes = [1, 50], strides = [1, 1]} : vector<96x50xf32> to vector<1x50xf32>
    %202 = vector.extract_strided_slice %147 {offsets = [25, 0], sizes = [1, 50], strides = [1, 1]} : vector<96x50xf32> to vector<1x50xf32>
    %203 = arith.maximumf %201, %202 : vector<1x50xf32>
    %204 = vector.extract_strided_slice %147 {offsets = [36, 0], sizes = [1, 50], strides = [1, 1]} : vector<96x50xf32> to vector<1x50xf32>
    %205 = vector.extract_strided_slice %147 {offsets = [37, 0], sizes = [1, 50], strides = [1, 1]} : vector<96x50xf32> to vector<1x50xf32>
    %206 = arith.maximumf %204, %205 : vector<1x50xf32>
    %207 = arith.maximumf %203, %206 : vector<1x50xf32>
    %cst_148 = arith.constant 0.000000e+00 : f32
    %208 = vector.broadcast %cst_148 : f32 to vector<1x50xf32>
    %209 = arith.maximumf %207, %208 : vector<1x50xf32>
    %c4_149 = arith.constant 4 : index
    %c0_150 = arith.constant 0 : index
    %c0_151 = arith.constant 0 : index
    %210 = vector.load %arg6[%c4_149, %c0_150, %c0_151] : memref<16x50x500xf32, #tpu.memory_space<vmem>>, vector<1x50x500xf32>
    %211 = vector.shape_cast %210 : vector<1x50x500xf32> to vector<50x500xf32>
    %cst_152 = arith.constant dense<0.000000e+00> : vector<1x500xf32>
    %212 = tpu.matmul %209, %211, %cst_152 {dimension_numbers = #tpu.dot_dimension_numbers<[1], [0], [0], [1], [0, 0, 1, 1], [], []>} : vector<1x50xf32>, vector<50x500xf32>, vector<1x500xf32> -> vector<1x500xf32>
    %213 = arith.addf %200, %212 : vector<1x500xf32>
    %214 = vector.extract_strided_slice %147 {offsets = [26, 0], sizes = [1, 50], strides = [1, 1]} : vector<96x50xf32> to vector<1x50xf32>
    %215 = vector.extract_strided_slice %147 {offsets = [27, 0], sizes = [1, 50], strides = [1, 1]} : vector<96x50xf32> to vector<1x50xf32>
    %216 = arith.maximumf %214, %215 : vector<1x50xf32>
    %217 = vector.extract_strided_slice %147 {offsets = [38, 0], sizes = [1, 50], strides = [1, 1]} : vector<96x50xf32> to vector<1x50xf32>
    %218 = vector.extract_strided_slice %147 {offsets = [39, 0], sizes = [1, 50], strides = [1, 1]} : vector<96x50xf32> to vector<1x50xf32>
    %219 = arith.maximumf %217, %218 : vector<1x50xf32>
    %220 = arith.maximumf %216, %219 : vector<1x50xf32>
    %cst_153 = arith.constant 0.000000e+00 : f32
    %221 = vector.broadcast %cst_153 : f32 to vector<1x50xf32>
    %222 = arith.maximumf %220, %221 : vector<1x50xf32>
    %c5_154 = arith.constant 5 : index
    %c0_155 = arith.constant 0 : index
    %c0_156 = arith.constant 0 : index
    %223 = vector.load %arg6[%c5_154, %c0_155, %c0_156] : memref<16x50x500xf32, #tpu.memory_space<vmem>>, vector<1x50x500xf32>
    %224 = vector.shape_cast %223 : vector<1x50x500xf32> to vector<50x500xf32>
    %cst_157 = arith.constant dense<0.000000e+00> : vector<1x500xf32>
    %225 = tpu.matmul %222, %224, %cst_157 {dimension_numbers = #tpu.dot_dimension_numbers<[1], [0], [0], [1], [0, 0, 1, 1], [], []>} : vector<1x50xf32>, vector<50x500xf32>, vector<1x500xf32> -> vector<1x500xf32>
    %226 = arith.addf %213, %225 : vector<1x500xf32>
    %227 = vector.extract_strided_slice %147 {offsets = [28, 0], sizes = [1, 50], strides = [1, 1]} : vector<96x50xf32> to vector<1x50xf32>
    %228 = vector.extract_strided_slice %147 {offsets = [29, 0], sizes = [1, 50], strides = [1, 1]} : vector<96x50xf32> to vector<1x50xf32>
    %229 = arith.maximumf %227, %228 : vector<1x50xf32>
    %230 = vector.extract_strided_slice %147 {offsets = [40, 0], sizes = [1, 50], strides = [1, 1]} : vector<96x50xf32> to vector<1x50xf32>
    %231 = vector.extract_strided_slice %147 {offsets = [41, 0], sizes = [1, 50], strides = [1, 1]} : vector<96x50xf32> to vector<1x50xf32>
    %232 = arith.maximumf %230, %231 : vector<1x50xf32>
    %233 = arith.maximumf %229, %232 : vector<1x50xf32>
    %cst_158 = arith.constant 0.000000e+00 : f32
    %234 = vector.broadcast %cst_158 : f32 to vector<1x50xf32>
    %235 = arith.maximumf %233, %234 : vector<1x50xf32>
    %c6_159 = arith.constant 6 : index
    %c0_160 = arith.constant 0 : index
    %c0_161 = arith.constant 0 : index
    %236 = vector.load %arg6[%c6_159, %c0_160, %c0_161] : memref<16x50x500xf32, #tpu.memory_space<vmem>>, vector<1x50x500xf32>
    %237 = vector.shape_cast %236 : vector<1x50x500xf32> to vector<50x500xf32>
    %cst_162 = arith.constant dense<0.000000e+00> : vector<1x500xf32>
    %238 = tpu.matmul %235, %237, %cst_162 {dimension_numbers = #tpu.dot_dimension_numbers<[1], [0], [0], [1], [0, 0, 1, 1], [], []>} : vector<1x50xf32>, vector<50x500xf32>, vector<1x500xf32> -> vector<1x500xf32>
    %239 = arith.addf %226, %238 : vector<1x500xf32>
    %240 = vector.extract_strided_slice %147 {offsets = [30, 0], sizes = [1, 50], strides = [1, 1]} : vector<96x50xf32> to vector<1x50xf32>
    %241 = vector.extract_strided_slice %147 {offsets = [31, 0], sizes = [1, 50], strides = [1, 1]} : vector<96x50xf32> to vector<1x50xf32>
    %242 = arith.maximumf %240, %241 : vector<1x50xf32>
    %243 = vector.extract_strided_slice %147 {offsets = [42, 0], sizes = [1, 50], strides = [1, 1]} : vector<96x50xf32> to vector<1x50xf32>
    %244 = vector.extract_strided_slice %147 {offsets = [43, 0], sizes = [1, 50], strides = [1, 1]} : vector<96x50xf32> to vector<1x50xf32>
    %245 = arith.maximumf %243, %244 : vector<1x50xf32>
    %246 = arith.maximumf %242, %245 : vector<1x50xf32>
    %cst_163 = arith.constant 0.000000e+00 : f32
    %247 = vector.broadcast %cst_163 : f32 to vector<1x50xf32>
    %248 = arith.maximumf %246, %247 : vector<1x50xf32>
    %c7_164 = arith.constant 7 : index
    %c0_165 = arith.constant 0 : index
    %c0_166 = arith.constant 0 : index
    %249 = vector.load %arg6[%c7_164, %c0_165, %c0_166] : memref<16x50x500xf32, #tpu.memory_space<vmem>>, vector<1x50x500xf32>
    %250 = vector.shape_cast %249 : vector<1x50x500xf32> to vector<50x500xf32>
    %cst_167 = arith.constant dense<0.000000e+00> : vector<1x500xf32>
    %251 = tpu.matmul %248, %250, %cst_167 {dimension_numbers = #tpu.dot_dimension_numbers<[1], [0], [0], [1], [0, 0, 1, 1], [], []>} : vector<1x50xf32>, vector<50x500xf32>, vector<1x500xf32> -> vector<1x500xf32>
    %252 = arith.addf %239, %251 : vector<1x500xf32>
    %253 = vector.extract_strided_slice %147 {offsets = [48, 0], sizes = [1, 50], strides = [1, 1]} : vector<96x50xf32> to vector<1x50xf32>
    %254 = vector.extract_strided_slice %147 {offsets = [49, 0], sizes = [1, 50], strides = [1, 1]} : vector<96x50xf32> to vector<1x50xf32>
    %255 = arith.maximumf %253, %254 : vector<1x50xf32>
    %256 = vector.extract_strided_slice %147 {offsets = [60, 0], sizes = [1, 50], strides = [1, 1]} : vector<96x50xf32> to vector<1x50xf32>
    %257 = vector.extract_strided_slice %147 {offsets = [61, 0], sizes = [1, 50], strides = [1, 1]} : vector<96x50xf32> to vector<1x50xf32>
    %258 = arith.maximumf %256, %257 : vector<1x50xf32>
    %259 = arith.maximumf %255, %258 : vector<1x50xf32>
    %cst_168 = arith.constant 0.000000e+00 : f32
    %260 = vector.broadcast %cst_168 : f32 to vector<1x50xf32>
    %261 = arith.maximumf %259, %260 : vector<1x50xf32>
    %c8_169 = arith.constant 8 : index
    %c0_170 = arith.constant 0 : index
    %c0_171 = arith.constant 0 : index
    %262 = vector.load %arg6[%c8_169, %c0_170, %c0_171] : memref<16x50x500xf32, #tpu.memory_space<vmem>>, vector<1x50x500xf32>
    %263 = vector.shape_cast %262 : vector<1x50x500xf32> to vector<50x500xf32>
    %cst_172 = arith.constant dense<0.000000e+00> : vector<1x500xf32>
    %264 = tpu.matmul %261, %263, %cst_172 {dimension_numbers = #tpu.dot_dimension_numbers<[1], [0], [0], [1], [0, 0, 1, 1], [], []>} : vector<1x50xf32>, vector<50x500xf32>, vector<1x500xf32> -> vector<1x500xf32>
    %265 = arith.addf %252, %264 : vector<1x500xf32>
    %266 = vector.extract_strided_slice %147 {offsets = [50, 0], sizes = [1, 50], strides = [1, 1]} : vector<96x50xf32> to vector<1x50xf32>
    %267 = vector.extract_strided_slice %147 {offsets = [51, 0], sizes = [1, 50], strides = [1, 1]} : vector<96x50xf32> to vector<1x50xf32>
    %268 = arith.maximumf %266, %267 : vector<1x50xf32>
    %269 = vector.extract_strided_slice %147 {offsets = [62, 0], sizes = [1, 50], strides = [1, 1]} : vector<96x50xf32> to vector<1x50xf32>
    %270 = vector.extract_strided_slice %147 {offsets = [63, 0], sizes = [1, 50], strides = [1, 1]} : vector<96x50xf32> to vector<1x50xf32>
    %271 = arith.maximumf %269, %270 : vector<1x50xf32>
    %272 = arith.maximumf %268, %271 : vector<1x50xf32>
    %cst_173 = arith.constant 0.000000e+00 : f32
    %273 = vector.broadcast %cst_173 : f32 to vector<1x50xf32>
    %274 = arith.maximumf %272, %273 : vector<1x50xf32>
    %c9_174 = arith.constant 9 : index
    %c0_175 = arith.constant 0 : index
    %c0_176 = arith.constant 0 : index
    %275 = vector.load %arg6[%c9_174, %c0_175, %c0_176] : memref<16x50x500xf32, #tpu.memory_space<vmem>>, vector<1x50x500xf32>
    %276 = vector.shape_cast %275 : vector<1x50x500xf32> to vector<50x500xf32>
    %cst_177 = arith.constant dense<0.000000e+00> : vector<1x500xf32>
    %277 = tpu.matmul %274, %276, %cst_177 {dimension_numbers = #tpu.dot_dimension_numbers<[1], [0], [0], [1], [0, 0, 1, 1], [], []>} : vector<1x50xf32>, vector<50x500xf32>, vector<1x500xf32> -> vector<1x500xf32>
    %278 = arith.addf %265, %277 : vector<1x500xf32>
    %279 = vector.extract_strided_slice %147 {offsets = [52, 0], sizes = [1, 50], strides = [1, 1]} : vector<96x50xf32> to vector<1x50xf32>
    %280 = vector.extract_strided_slice %147 {offsets = [53, 0], sizes = [1, 50], strides = [1, 1]} : vector<96x50xf32> to vector<1x50xf32>
    %281 = arith.maximumf %279, %280 : vector<1x50xf32>
    %282 = vector.extract_strided_slice %147 {offsets = [64, 0], sizes = [1, 50], strides = [1, 1]} : vector<96x50xf32> to vector<1x50xf32>
    %283 = vector.extract_strided_slice %147 {offsets = [65, 0], sizes = [1, 50], strides = [1, 1]} : vector<96x50xf32> to vector<1x50xf32>
    %284 = arith.maximumf %282, %283 : vector<1x50xf32>
    %285 = arith.maximumf %281, %284 : vector<1x50xf32>
    %cst_178 = arith.constant 0.000000e+00 : f32
    %286 = vector.broadcast %cst_178 : f32 to vector<1x50xf32>
    %287 = arith.maximumf %285, %286 : vector<1x50xf32>
    %c10_179 = arith.constant 10 : index
    %c0_180 = arith.constant 0 : index
    %c0_181 = arith.constant 0 : index
    %288 = vector.load %arg6[%c10_179, %c0_180, %c0_181] : memref<16x50x500xf32, #tpu.memory_space<vmem>>, vector<1x50x500xf32>
    %289 = vector.shape_cast %288 : vector<1x50x500xf32> to vector<50x500xf32>
    %cst_182 = arith.constant dense<0.000000e+00> : vector<1x500xf32>
    %290 = tpu.matmul %287, %289, %cst_182 {dimension_numbers = #tpu.dot_dimension_numbers<[1], [0], [0], [1], [0, 0, 1, 1], [], []>} : vector<1x50xf32>, vector<50x500xf32>, vector<1x500xf32> -> vector<1x500xf32>
    %291 = arith.addf %278, %290 : vector<1x500xf32>
    %292 = vector.extract_strided_slice %147 {offsets = [54, 0], sizes = [1, 50], strides = [1, 1]} : vector<96x50xf32> to vector<1x50xf32>
    %293 = vector.extract_strided_slice %147 {offsets = [55, 0], sizes = [1, 50], strides = [1, 1]} : vector<96x50xf32> to vector<1x50xf32>
    %294 = arith.maximumf %292, %293 : vector<1x50xf32>
    %295 = vector.extract_strided_slice %147 {offsets = [66, 0], sizes = [1, 50], strides = [1, 1]} : vector<96x50xf32> to vector<1x50xf32>
    %296 = vector.extract_strided_slice %147 {offsets = [67, 0], sizes = [1, 50], strides = [1, 1]} : vector<96x50xf32> to vector<1x50xf32>
    %297 = arith.maximumf %295, %296 : vector<1x50xf32>
    %298 = arith.maximumf %294, %297 : vector<1x50xf32>
    %cst_183 = arith.constant 0.000000e+00 : f32
    %299 = vector.broadcast %cst_183 : f32 to vector<1x50xf32>
    %300 = arith.maximumf %298, %299 : vector<1x50xf32>
    %c11_184 = arith.constant 11 : index
    %c0_185 = arith.constant 0 : index
    %c0_186 = arith.constant 0 : index
    %301 = vector.load %arg6[%c11_184, %c0_185, %c0_186] : memref<16x50x500xf32, #tpu.memory_space<vmem>>, vector<1x50x500xf32>
    %302 = vector.shape_cast %301 : vector<1x50x500xf32> to vector<50x500xf32>
    %cst_187 = arith.constant dense<0.000000e+00> : vector<1x500xf32>
    %303 = tpu.matmul %300, %302, %cst_187 {dimension_numbers = #tpu.dot_dimension_numbers<[1], [0], [0], [1], [0, 0, 1, 1], [], []>} : vector<1x50xf32>, vector<50x500xf32>, vector<1x500xf32> -> vector<1x500xf32>
    %304 = arith.addf %291, %303 : vector<1x500xf32>
    %305 = vector.extract_strided_slice %147 {offsets = [72, 0], sizes = [1, 50], strides = [1, 1]} : vector<96x50xf32> to vector<1x50xf32>
    %306 = vector.extract_strided_slice %147 {offsets = [73, 0], sizes = [1, 50], strides = [1, 1]} : vector<96x50xf32> to vector<1x50xf32>
    %307 = arith.maximumf %305, %306 : vector<1x50xf32>
    %308 = vector.extract_strided_slice %147 {offsets = [84, 0], sizes = [1, 50], strides = [1, 1]} : vector<96x50xf32> to vector<1x50xf32>
    %309 = vector.extract_strided_slice %147 {offsets = [85, 0], sizes = [1, 50], strides = [1, 1]} : vector<96x50xf32> to vector<1x50xf32>
    %310 = arith.maximumf %308, %309 : vector<1x50xf32>
    %311 = arith.maximumf %307, %310 : vector<1x50xf32>
    %cst_188 = arith.constant 0.000000e+00 : f32
    %312 = vector.broadcast %cst_188 : f32 to vector<1x50xf32>
    %313 = arith.maximumf %311, %312 : vector<1x50xf32>
    %c12_189 = arith.constant 12 : index
    %c0_190 = arith.constant 0 : index
    %c0_191 = arith.constant 0 : index
    %314 = vector.load %arg6[%c12_189, %c0_190, %c0_191] : memref<16x50x500xf32, #tpu.memory_space<vmem>>, vector<1x50x500xf32>
    %315 = vector.shape_cast %314 : vector<1x50x500xf32> to vector<50x500xf32>
    %cst_192 = arith.constant dense<0.000000e+00> : vector<1x500xf32>
    %316 = tpu.matmul %313, %315, %cst_192 {dimension_numbers = #tpu.dot_dimension_numbers<[1], [0], [0], [1], [0, 0, 1, 1], [], []>} : vector<1x50xf32>, vector<50x500xf32>, vector<1x500xf32> -> vector<1x500xf32>
    %317 = arith.addf %304, %316 : vector<1x500xf32>
    %318 = vector.extract_strided_slice %147 {offsets = [74, 0], sizes = [1, 50], strides = [1, 1]} : vector<96x50xf32> to vector<1x50xf32>
    %319 = vector.extract_strided_slice %147 {offsets = [75, 0], sizes = [1, 50], strides = [1, 1]} : vector<96x50xf32> to vector<1x50xf32>
    %320 = arith.maximumf %318, %319 : vector<1x50xf32>
    %321 = vector.extract_strided_slice %147 {offsets = [86, 0], sizes = [1, 50], strides = [1, 1]} : vector<96x50xf32> to vector<1x50xf32>
    %322 = vector.extract_strided_slice %147 {offsets = [87, 0], sizes = [1, 50], strides = [1, 1]} : vector<96x50xf32> to vector<1x50xf32>
    %323 = arith.maximumf %321, %322 : vector<1x50xf32>
    %324 = arith.maximumf %320, %323 : vector<1x50xf32>
    %cst_193 = arith.constant 0.000000e+00 : f32
    %325 = vector.broadcast %cst_193 : f32 to vector<1x50xf32>
    %326 = arith.maximumf %324, %325 : vector<1x50xf32>
    %c13_194 = arith.constant 13 : index
    %c0_195 = arith.constant 0 : index
    %c0_196 = arith.constant 0 : index
    %327 = vector.load %arg6[%c13_194, %c0_195, %c0_196] : memref<16x50x500xf32, #tpu.memory_space<vmem>>, vector<1x50x500xf32>
    %328 = vector.shape_cast %327 : vector<1x50x500xf32> to vector<50x500xf32>
    %cst_197 = arith.constant dense<0.000000e+00> : vector<1x500xf32>
    %329 = tpu.matmul %326, %328, %cst_197 {dimension_numbers = #tpu.dot_dimension_numbers<[1], [0], [0], [1], [0, 0, 1, 1], [], []>} : vector<1x50xf32>, vector<50x500xf32>, vector<1x500xf32> -> vector<1x500xf32>
    %330 = arith.addf %317, %329 : vector<1x500xf32>
    %331 = vector.extract_strided_slice %147 {offsets = [76, 0], sizes = [1, 50], strides = [1, 1]} : vector<96x50xf32> to vector<1x50xf32>
    %332 = vector.extract_strided_slice %147 {offsets = [77, 0], sizes = [1, 50], strides = [1, 1]} : vector<96x50xf32> to vector<1x50xf32>
    %333 = arith.maximumf %331, %332 : vector<1x50xf32>
    %334 = vector.extract_strided_slice %147 {offsets = [88, 0], sizes = [1, 50], strides = [1, 1]} : vector<96x50xf32> to vector<1x50xf32>
    %335 = vector.extract_strided_slice %147 {offsets = [89, 0], sizes = [1, 50], strides = [1, 1]} : vector<96x50xf32> to vector<1x50xf32>
    %336 = arith.maximumf %334, %335 : vector<1x50xf32>
    %337 = arith.maximumf %333, %336 : vector<1x50xf32>
    %cst_198 = arith.constant 0.000000e+00 : f32
    %338 = vector.broadcast %cst_198 : f32 to vector<1x50xf32>
    %339 = arith.maximumf %337, %338 : vector<1x50xf32>
    %c14_199 = arith.constant 14 : index
    %c0_200 = arith.constant 0 : index
    %c0_201 = arith.constant 0 : index
    %340 = vector.load %arg6[%c14_199, %c0_200, %c0_201] : memref<16x50x500xf32, #tpu.memory_space<vmem>>, vector<1x50x500xf32>
    %341 = vector.shape_cast %340 : vector<1x50x500xf32> to vector<50x500xf32>
    %cst_202 = arith.constant dense<0.000000e+00> : vector<1x500xf32>
    %342 = tpu.matmul %339, %341, %cst_202 {dimension_numbers = #tpu.dot_dimension_numbers<[1], [0], [0], [1], [0, 0, 1, 1], [], []>} : vector<1x50xf32>, vector<50x500xf32>, vector<1x500xf32> -> vector<1x500xf32>
    %343 = arith.addf %330, %342 : vector<1x500xf32>
    %344 = vector.extract_strided_slice %147 {offsets = [78, 0], sizes = [1, 50], strides = [1, 1]} : vector<96x50xf32> to vector<1x50xf32>
    %345 = vector.extract_strided_slice %147 {offsets = [79, 0], sizes = [1, 50], strides = [1, 1]} : vector<96x50xf32> to vector<1x50xf32>
    %346 = arith.maximumf %344, %345 : vector<1x50xf32>
    %347 = vector.extract_strided_slice %147 {offsets = [90, 0], sizes = [1, 50], strides = [1, 1]} : vector<96x50xf32> to vector<1x50xf32>
    %348 = vector.extract_strided_slice %147 {offsets = [91, 0], sizes = [1, 50], strides = [1, 1]} : vector<96x50xf32> to vector<1x50xf32>
    %349 = arith.maximumf %347, %348 : vector<1x50xf32>
    %350 = arith.maximumf %346, %349 : vector<1x50xf32>
    %cst_203 = arith.constant 0.000000e+00 : f32
    %351 = vector.broadcast %cst_203 : f32 to vector<1x50xf32>
    %352 = arith.maximumf %350, %351 : vector<1x50xf32>
    %c15_204 = arith.constant 15 : index
    %c0_205 = arith.constant 0 : index
    %c0_206 = arith.constant 0 : index
    %353 = vector.load %arg6[%c15_204, %c0_205, %c0_206] : memref<16x50x500xf32, #tpu.memory_space<vmem>>, vector<1x50x500xf32>
    %354 = vector.shape_cast %353 : vector<1x50x500xf32> to vector<50x500xf32>
    %cst_207 = arith.constant dense<0.000000e+00> : vector<1x500xf32>
    %355 = tpu.matmul %352, %354, %cst_207 {dimension_numbers = #tpu.dot_dimension_numbers<[1], [0], [0], [1], [0, 0, 1, 1], [], []>} : vector<1x50xf32>, vector<50x500xf32>, vector<1x500xf32> -> vector<1x500xf32>
    %356 = arith.addf %343, %355 : vector<1x500xf32>
    %c0_208 = arith.constant 0 : index
    %c0_209 = arith.constant 0 : index
    %357 = vector.load %arg8[%c0_208, %c0_209] : memref<500x10xf32, #tpu.memory_space<vmem>>, vector<500x10xf32>
    %cst_210 = arith.constant dense<0.000000e+00> : vector<1x10xf32>
    %358 = tpu.matmul %356, %357, %cst_210 {dimension_numbers = #tpu.dot_dimension_numbers<[1], [0], [0], [1], [0, 0, 1, 1], [], []>} : vector<1x500xf32>, vector<500x10xf32>, vector<1x10xf32> -> vector<1x10xf32>
    %c0_211 = arith.constant 0 : index
    %c0_212 = arith.constant 0 : index
    %359 = vector.load %arg9[%c0_211, %c0_212] : memref<1x10xf32, #tpu.memory_space<vmem>>, vector<1x10xf32>
    %360 = arith.addf %358, %359 : vector<1x10xf32>
    %c0_213 = arith.constant 0 : index
    %c0_214 = arith.constant 0 : index
    %c0_215 = arith.constant 0 : index
    %361 = vector.load %arg10[%c0_213, %c0_214, %c0_215] : memref<1x1x10xf32, #tpu.memory_space<vmem>>, vector<1x1x10xf32>
    %362 = vector.shape_cast %361 : vector<1x1x10xf32> to vector<1x10xf32>
    %363 = vector.shape_cast %360 : vector<1x10xf32> to vector<1x1x10xf32>
    tpu.vector_store %arg10[%c0_213, %c0_214, %c0_215], %363 {strides = array<i32>} : memref<1x1x10xf32, #tpu.memory_space<vmem>>, vector<1x1x10xf32>,
    return
  }
  func.func @transform_0(%arg0: i32) -> (i32, i32, i32) {
    %c0_i32 = arith.constant 0 : i32
    %c0_i32_0 = arith.constant 0 : i32
    %c0_i32_1 = arith.constant 0 : i32
    return %arg0, %c0_i32, %c0_i32_0 : i32, i32, i32
  }
  func.func @transform_1(%arg0: i32) -> (i32, i32) {
    %c0_i32 = arith.constant 0 : i32
    %c0_i32_0 = arith.constant 0 : i32
    %c0_i32_1 = arith.constant 0 : i32
    return %c0_i32, %c0_i32_0 : i32, i32
  }
  func.func @transform_2(%arg0: i32) -> (i32, i32) {
    %c0_i32 = arith.constant 0 : i32
    %c0_i32_0 = arith.constant 0 : i32
    %c0_i32_1 = arith.constant 0 : i32
    return %c0_i32, %c0_i32_0 : i32, i32
  }
  func.func @transform_3(%arg0: i32) -> (i32, i32, i32) {
    %c0_i32 = arith.constant 0 : i32
    %c0_i32_0 = arith.constant 0 : i32
    %c0_i32_1 = arith.constant 0 : i32
    %c0_i32_2 = arith.constant 0 : i32
    return %c0_i32, %c0_i32_0, %c0_i32_1 : i32, i32, i32
  }
  func.func @transform_4(%arg0: i32) -> (i32, i32) {
    %c0_i32 = arith.constant 0 : i32
    %c0_i32_0 = arith.constant 0 : i32
    %c0_i32_1 = arith.constant 0 : i32
    return %c0_i32, %c0_i32_0 : i32, i32
  }
  func.func @transform_5(%arg0: i32) -> (i32, i32, i32) {
    %c0_i32 = arith.constant 0 : i32
    %c0_i32_0 = arith.constant 0 : i32
    %c0_i32_1 = arith.constant 0 : i32
    %c0_i32_2 = arith.constant 0 : i32
    return %c0_i32, %c0_i32_0, %c0_i32_1 : i32, i32, i32
  }
  func.func @transform_6(%arg0: i32) -> (i32, i32) {
    %c0_i32 = arith.constant 0 : i32
    %c0_i32_0 = arith.constant 0 : i32
    %c0_i32_1 = arith.constant 0 : i32
    return %c0_i32, %c0_i32_0 : i32, i32
  }
  func.func @transform_7(%arg0: i32) -> (i32, i32) {
    %c0_i32 = arith.constant 0 : i32
    %c0_i32_0 = arith.constant 0 : i32
    %c0_i32_1 = arith.constant 0 : i32
    return %c0_i32, %c0_i32_0 : i32, i32
  }
  func.func @transform_8(%arg0: i32) -> (i32, i32) {
    %c0_i32 = arith.constant 0 : i32
    %c0_i32_0 = arith.constant 0 : i32
    %c0_i32_1 = arith.constant 0 : i32
    return %c0_i32, %c0_i32_0 : i32, i32
  }
  func.func @transform_9(%arg0: i32) -> (i32, i32, i32) {
    %c0_i32 = arith.constant 0 : i32
    %c0_i32_0 = arith.constant 0 : i32
    %c0_i32_1 = arith.constant 0 : i32
    return %arg0, %c0_i32, %c0_i32_0 : i32, i32, i32
  }
}

</mosaic_0001>

<bundles_post_ra>
// kernel: lenet_forward.1
= control target key start
LH: loop header
LB: loop body
LE: loop exit
PB: predicated region body
PF: predicated region fallthrough
CT: control target
= control target key end

     0   :  { %14 = vsyncpa [#allocation4], 0  ;;  %s16411_s0 = inlined_call_operand.vmem [shape: f32[2,576,25], index: 0, kind: input, shape index: {}]   ;;  %s16412_s1 = inlined_call_operand.vmem [shape: f32[25,20], index: 1, kind: input, shape index: {}]   ;;  %s16413_s2 = inlined_call_operand.vmem [shape: f32[1,20], index: 2, kind: input, shape index: {}]   ;;  %s16414_s3 = inlined_call_operand.vmem [shape: f32[25,20,50], index: 3, kind: input, shape index: {}]   ;;  %s16415_s4 = inlined_call_operand.vmem [shape: f32[1,50], index: 4, kind: input, shape index: {}]   ;;  %s16416_s5 = inlined_call_operand.vmem [shape: f32[16,50,500], index: 5, kind: input, shape index: {}]   ;;  %s16417_s6 = inlined_call_operand.vmem [shape: f32[1,500], index: 6, kind: input, shape index: {}]   ;;  %s16418_s7 = inlined_call_operand.vmem [shape: f32[500,10], index: 7, kind: input, shape index: {}]   ;;  %s16419_s8 = inlined_call_operand.vmem [shape: f32[1,10], index: 8, kind: input, shape index: {}]   ;;  %s16420_s9 = inlined_call_operand.hbm [shape: f32[2,1,10], index: 9, kind: output, shape index: {}]  }
   0x1   :  { %16 = vsyncpa [#allocation4 + $0x1], 0  ;;  %s13047_s30 = smov 0   ;;  %s13049_s10 = smov 0  }
   0x2   :  { %s13051_s11 = smov 0   ;;  %s13053_s12 = smov 0  }
   0x3 LB: > { %s13068_s13 = sadd.s32 4294967295, %s12990_s12   ;;  %s9809_s14 = sadd.s32 4294967294, %s12990_s12   ;;  %s12990_s12 = sphi %s13053_s12, %s16491_s12   ;;  %s12986_s11 = sphi %s13051_s11, %s16490_s11   ;;  %s12982_s10 = sphi %s13049_s10, %s16489_s10   ;;  %s12978_s30 = sphi %s13047_s30, %s16488_s30  }
   0x4   : > { %s13072_s15 = sadd.s32 1, %s12990_s12   ;;  %s223_s16 = sadd.s32 1, %s12986_s11 }
   0x5   : > { %s220_s17 = ssub.s32 %s12990_s12, %s13072_s15  ;;  %p233_p0 = scmp.ne.s32.totalorder %s12986_s11, %s12982_s10 }
   0x6   : > { %p221_p1 = scmp.eq.s32.totalorder %s220_s17, 0  ;;  %p234_p2 = scmp.eq.s32.totalorder %s13068_s13, 1 }
   0x7   : > { %p239_p3 = scmp.ne.s32.totalorder %s12982_s10, %s12978_s30  ;;  %p240_p4 = scmp.eq.s32.totalorder %s9809_s14, 1 }
   0x8   : > { %s13083_s18 = scalar_select %p221_p1, %s12986_s11, %s223_s16  }
   0x9   : > { %p13085_p5 = por %p234_p2, %p233_p0  ;;  %p13089_p6 = por %p240_p4, %p239_p3 }
   0xa   : > { %p9812_p7 = scmp.ge.s32.totalorder %s12990_s12, 1  ;;  %p290_p8 = scmp.lt.s32.totalorder %s12990_s12, 3 }
   0xc   : > { %p291_p9 = pnand %p9812_p7, %p290_p8 }
   0xe   : > { %294 = sbr.rel (%p291_p9) target bundleno = 2063 (0x80f), region = 56 }
  0x15   : > { %v402_v0 = vld [vmem:[%s16412_s1] sm:$0xff]  ;;  %v403_v1 = vld [vmem:[%s16412_s1 + $0x8] sm:$0xff]  ;;  %v404_v2 = vld [vmem:[%s16412_s1 + $0x10] sm:$0xff]  ;;  %vm630_vm0 = vcmask 1040384   ;;  %p325_p10 = scmp.lt.s32.totalorder %s13068_s13, 1  ;;  %vm12992_vm1 = vmmov 1  }
  0x16   : > { %v12009_v3 = vpack.c.bf16 %v403_v1, %v402_v0  ;;  %v405_v4 = vld [vmem:[%s16412_s1 + $0x18] sm:$0x1]  ;;  %vm13108_vm2 = vmpackc.low %vm630_vm0, %vm12992_vm1  ;;  %vm413_vm3 = vcmask 203776   ;;  %vm1210_vm4 = vcmask 1043456   ;;  %vm1131_vm5 = vcmask 162816   ;;  %s323_s24 = sand.u32 1, %s12982_s10  }
  0x17   : > { %v12013_v5 = vpack.c.bf16 %v405_v4, %v404_v2  ;;  %s326_s29 = scalar_select %p325_p10, %s13068_s13, 1  ;;  %vm6005_vm6 = vcmask 1041408   ;;  %vm6001_vm7 = vcmask 408576   ;;  %vm9593_vm8 = vcmask 949248  }
  0x18   : > { %12010 = vmatprep.subr.bf16.mxu0 %v12009_v3  ;;  %12580 = vmatprep.subr.bf16.mxu1 %v12009_v3  ;;  %s10804_s27 = sshll.u32 %s13068_s13, 4  ;;  %s324_s28 = scalar_lea.vmem [#allocation3], %s323_s24  ;;  %vm9739_vm9 = vcmask 73728  }
  0x19   : > { %12012 = vmatpush3.bf16.msra.mxu0 %v12009_v3  ;;  %s12884_s14 = smul.u32 576, %s326_s29  ;;  %12582 = vmatpush3.bf16.msra.mxu1 %v12009_v3  ;;  %s9754_s29 = sshll.u32 %s324_s28, 4  ;;  %s16371_s29 = int_to_ptr.vmem [resolvable:$true] %s9754_s29 }
  0x1a   : > { %12015 = vmatprep.subr.msk.bf16.mxu0 %vm13108_vm2, %v12013_v5  ;;  %12581 = vmatprep.subr.msk.bf16.mxu1 %vm13108_vm2, %v12013_v5  ;;  %s16369_s17 = scalar_lea.hbm %s16420_s9, %s10804_s27  ;;  %s12928_s22 = scalar_lea.vmem %s16371_s29, 16 }
  0x1b   : > { %s13120_s21 = scalar_lea.vmem %s16411_s0, %s12884_s14  ;;  %p12929_p11 = scmp.ne.s32.totalorder %s16371_s29, %s12928_s22 }
  0x1c   : > { %v330_v7 = vld [vmem:[%s13120_s21] sm:$0xff]  ;;  %v331_v8 = vld [vmem:[%s13120_s21 + $0x8] sm:$0xff]  ;;  %v332_v9 = vld [vmem:[%s13120_s21 + $0x10] sm:$0xff]  ;;  %s12996_s13 = smov [#allocation3]  }
  0x1d   : > { %12018 = vmatpush3.bf16.msk.msra.mxu0 %vm13108_vm2, %v12013_v5  ;;  %11301 = vmatprep.mubr.msk.f32.mxu0 %vm413_vm3, %v330_v7  ;;  %v333_v10 = vld [vmem:[%s13120_s21 + $0x18] sm:$0xff]  ;;  %v334_v11 = vld [vmem:[%s13120_s21 + $0x20] sm:$0xff]  ;;  %v335_v12 = vld [vmem:[%s13120_s21 + $0x28] sm:$0xff]  ;;  %p12930_p12 = pnand %p12929_p11, %p13085_p5  ;;  %s12932_s23 = sshll.u32 %s12996_s13, 4  ;;  %s12933_s23 = int_to_ptr.vmem [resolvable:$false] %s12932_s23 }
  0x1e   : > { %12583 = vmatpush3.bf16.msk.msra.mxu1 %vm13108_vm2, %v12013_v5  ;;  %v336_v13 = vld [vmem:[%s13120_s21 + $0x30] sm:$0xff]  ;;  %v337_v14 = vld [vmem:[%s13120_s21 + $0x38] sm:$0xff]  ;;  %v338_v15 = vld [vmem:[%s13120_s21 + $0x40] sm:$0xff]  ;;  %s12934_s25 = scalar_lea.vmem %s12933_s23, 32  ;;  %p12935_p0 = scmp.lt.s32.totalorder %s16371_s29, %s12933_s23 }
  0x1f   : > { %v394_v16 = vld [vmem:[%s13120_s21 + $0x200] sm:$0xff]  ;;  %v395_v17 = vld [vmem:[%s13120_s21 + $0x208] sm:$0xff]  ;;  %v396_v19 = vld [vmem:[%s13120_s21 + $0x210] sm:$0xff]  ;;  %p12931_p13 = pneg %p12930_p12  ;;  %p12936_p1 = scmp.lt.s32.totalorder %s12934_s25, %s12928_s22 }
  0x20   : > { %11302 = vmatmul.mubr.msk.f32.vlgmr.msra.gmra.mrb[0].mxu0 %vm413_vm3, %v331_v8  ;;  %11397 = vmatprep.mubr.msk.f32.mxu1 %vm413_vm3, %v394_v16  ;;  %v339_v18 = vld [vmem:[%s13120_s21 + $0x48] sm:$0xff]  ;;  %v340_v20 = vld [vmem:[%s13120_s21 + $0x50] sm:$0xff]  ;;  %v397_v21 = vld [vmem:[%s13120_s21 + $0x218] sm:$0xff] }
  0x21   : > { %11304 = vmatprep.mubr.msk.f32.mxu0 %vm413_vm3, %v332_v9  ;;  %11398 = vmatmul.mubr.msk.f32.vlgmr.msra.gmra.mrb[0].mxu1 %vm413_vm3, %v395_v17  ;;  %v398_v22 = vld [vmem:[%s13120_s21 + $0x220] sm:$0xff]  ;;  %v341_v23 = vld [vmem:[%s13120_s21 + $0x58] sm:$0xff]  ;;  %v399_v25 = vld [vmem:[%s13120_s21 + $0x228] sm:$0xff]  ;;  %p12937_p2 = por %p12936_p1, %p12935_p0 }
  0x22   : > { %11400 = vmatprep.mubr.msk.f32.mxu1 %vm413_vm3, %v396_v19  ;;  %v342_v24 = vld [vmem:[%s13120_s21 + $0x60] sm:$0xff]  ;;  %v400_v26 = vld [vmem:[%s13120_s21 + $0x230] sm:$0xff]  ;;  %v343_v27 = vld [vmem:[%s13120_s21 + $0x68] sm:$0xff] }
  0x23   : > { %v344_v28 = vld [vmem:[%s13120_s21 + $0x70] sm:$0xff]  ;;  %v401_v29 = vld [vmem:[%s13120_s21 + $0x238] sm:$0xff]  ;;  %v346_v31 = vld [vmem:[%s13120_s21 + $0x80] sm:$0xff]  ;;  %p12938_p3 = pnand %p12937_p2, %p12931_p13 }
  0x24   : > { %11305 = vmatmul.mubr.msk.f32.gmra.mrb[2].mxu0 %vm413_vm3, %v333_v10  ;;  %v345_v30 = vld [vmem:[%s13120_s21 + $0x78] sm:$0xff]  ;;  %v347_v32 = vld [vmem:[%s13120_s21 + $0x88] sm:$0xff]  ;;  %v348_v33 = vld [vmem:[%s13120_s21 + $0x90] sm:$0xff] }
  0x25   : > { %11307 = vmatprep.mubr.msk.f32.mxu0 %vm413_vm3, %v334_v11  ;;  %11401 = vmatmul.mubr.msk.f32.gmra.mrb[2].mxu1 %vm413_vm3, %v397_v21  ;;  %v349_v34 = vld [vmem:[%s13120_s21 + $0x98] sm:$0xff]  ;;  %v350_v35 = vld [vmem:[%s13120_s21 + $0xa0] sm:$0xff]  ;;  %v351_v36 = vld [vmem:[%s13120_s21 + $0xa8] sm:$0xff] }
  0x26   : > { %11403 = vmatprep.mubr.msk.f32.mxu1 %vm413_vm3, %v398_v22  ;;  %v352_v37 = vld [vmem:[%s13120_s21 + $0xb0] sm:$0xff]  ;;  %v353_v38 = vld [vmem:[%s13120_s21 + $0xb8] sm:$0xff]  ;;  %v354_v39 = vld [vmem:[%s13120_s21 + $0xc0] sm:$0xff] }
  0x27   : > { %v355_v40 = vld [vmem:[%s13120_s21 + $0xc8] sm:$0xff]  ;;  %v356_v41 = vld [vmem:[%s13120_s21 + $0xd0] sm:$0xff]  ;;  %v357_v42 = vld [vmem:[%s13120_s21 + $0xd8] sm:$0xff] }
  0x28   : > { %11308 = vmatmul.mubr.msk.f32.gmra.mrb[4].mxu0 %vm413_vm3, %v335_v12  ;;  %v358_v43 = vld [vmem:[%s13120_s21 + $0xe0] sm:$0xff]  ;;  %v359_v44 = vld [vmem:[%s13120_s21 + $0xe8] sm:$0xff]  ;;  %v360_v45 = vld [vmem:[%s13120_s21 + $0xf0] sm:$0xff] }
  0x29   : > { %11310 = vmatprep.mubr.msk.f32.mxu0 %vm413_vm3, %v336_v13  ;;  %11404 = vmatmul.mubr.msk.f32.gmra.mrb[4].mxu1 %vm413_vm3, %v399_v25  ;;  %v361_v46 = vld [vmem:[%s13120_s21 + $0xf8] sm:$0xff]  ;;  %v362_v47 = vld [vmem:[%s13120_s21 + $0x100] sm:$0xff]  ;;  %v363_v48 = vld [vmem:[%s13120_s21 + $0x108] sm:$0xff] }
  0x2a   : > { %11406 = vmatprep.mubr.msk.f32.mxu1 %vm413_vm3, %v400_v26  ;;  %v364_v49 = vld [vmem:[%s13120_s21 + $0x110] sm:$0xff]  ;;  %v365_v50 = vld [vmem:[%s13120_s21 + $0x118] sm:$0xff]  ;;  %v366_v51 = vld [vmem:[%s13120_s21 + $0x120] sm:$0xff] }
  0x2b   : > { %v367_v52 = vld [vmem:[%s13120_s21 + $0x128] sm:$0xff]  ;;  %v368_v53 = vld [vmem:[%s13120_s21 + $0x130] sm:$0xff]  ;;  %v369_v54 = vld [vmem:[%s13120_s21 + $0x138] sm:$0xff] }
  0x2c   : > { %11311 = vmatmul.mubr.msk.f32.gmra.mrb[6].mxu0 %vm413_vm3, %v337_v14  ;;  %v370_v55 = vld [vmem:[%s13120_s21 + $0x140] sm:$0xff]  ;;  %v371_v56 = vld [vmem:[%s13120_s21 + $0x148] sm:$0xff]  ;;  %v372_v57 = vld [vmem:[%s13120_s21 + $0x150] sm:$0xff] }
  0x2d   : > { %11313 = vmatprep.mubr.msk.f32.mxu0 %vm413_vm3, %v338_v15  ;;  %11407 = vmatmul.mubr.msk.f32.gmra.mrb[6].mxu1 %vm413_vm3, %v401_v29  ;;  %v373_v58 = vld [vmem:[%s13120_s21 + $0x158] sm:$0xff]  ;;  %v374_v59 = vld [vmem:[%s13120_s21 + $0x160] sm:$0xff]  ;;  %v375_v60 = vld [vmem:[%s13120_s21 + $0x168] sm:$0xff] }
  0x2e   : > { %v376_v61 = vld [vmem:[%s13120_s21 + $0x170] sm:$0xff]  ;;  %v377_v62 = vld [vmem:[%s13120_s21 + $0x178] sm:$0xff]  ;;  %v378_v63 = vld [vmem:[%s13120_s21 + $0x180] sm:$0xff] }
  0x2f   : > { %v379_v0 = vld [vmem:[%s13120_s21 + $0x188] sm:$0xff]  ;;  %v380_v1 = vld [vmem:[%s13120_s21 + $0x190] sm:$0xff]  ;;  %v381_v2 = vld [vmem:[%s13120_s21 + $0x198] sm:$0xff] }
  0x30   : > { %11314 = vmatmul.mubr.msk.f32.gmra.mrb[8].mxu0 %vm413_vm3, %v339_v18  ;;  %v382_v3 = vld [vmem:[%s13120_s21 + $0x1a0] sm:$0xff]  ;;  %v383_v4 = vld [vmem:[%s13120_s21 + $0x1a8] sm:$0xff]  ;;  %v384_v5 = vld [vmem:[%s13120_s21 + $0x1b0] sm:$0xff] }
  0x31   : > { %11316 = vmatprep.mubr.msk.f32.mxu0 %vm413_vm3, %v340_v20  ;;  %v385_v6 = vld [vmem:[%s13120_s21 + $0x1b8] sm:$0xff]  ;;  %v386_v7 = vld [vmem:[%s13120_s21 + $0x1c0] sm:$0xff]  ;;  %v387_v8 = vld [vmem:[%s13120_s21 + $0x1c8] sm:$0xff] }
  0x32   : > { %v388_v9 = vld [vmem:[%s13120_s21 + $0x1d0] sm:$0xff]  ;;  %v389_v10 = vld [vmem:[%s13120_s21 + $0x1d8] sm:$0xff]  ;;  %v390_v11 = vld [vmem:[%s13120_s21 + $0x1e0] sm:$0xff] }
  0x33   : > { %v391_v12 = vld [vmem:[%s13120_s21 + $0x1e8] sm:$0xff]  ;;  %v392_v13 = vld [vmem:[%s13120_s21 + $0x1f0] sm:$0xff]  ;;  %v393_v14 = vld [vmem:[%s13120_s21 + $0x1f8] sm:$0xff]  ;;  %s9742_s21 = scalar_lea.sflag [#allocation4], %s323_s24 }
  0x34   : > { %11317 = vmatmul.mubr.msk.f32.gmra.mrb[10].mxu0 %vm413_vm3, %v341_v23  ;;  %v1171_v15 = vld [vmem:[%s16414_s3] sm:$0xff]  ;;  %v1172_v16 = vld [vmem:[%s16414_s3 + $0x8] sm:$0xff]  ;;  %v1173_v18 = vld [vmem:[%s16414_s3 + $0x10] sm:$0xf] }
  0x35   : > { %11319 = vmatprep.mubr.msk.f32.mxu0 %vm413_vm3, %v342_v24  ;;  %v12019_v17 = vpack.c.bf16 %v1172_v16, %v1171_v15  ;;  %v9902_v23 = vld [vmem:[%s16414_s3 + $0x18] sm:$0xff]  ;;  %v9903_v24 = vld [vmem:[%s16414_s3 + $0x20] sm:$0xff] }
  0x36   : > { %v13287_v25 = vpack.c.bf16 %v9903_v24, %v9902_v23 }
  0x37   : > { %12020 = vmatprep.subr.bf16.mxu1 %v12019_v17 }
  0x38   : > { %11320 = vmatmul.mubr.msk.f32.gmra.mrb[12].mxu0 %vm413_vm3, %v343_v27  ;;  %12022 = vmatpush3.bf16.msra.mxu1 %v12019_v17 }
  0x39   : > { %11322 = vmatprep.mubr.msk.f32.mxu0 %vm413_vm3, %v344_v28  ;;  %11413 = vmatprep.subr.msk.mxu1 %vm1210_vm4, %v1173_v18 }
  0x3c   : > { %11323 = vmatmul.mubr.msk.f32.gmra.mrb[14].mxu0 %vm413_vm3, %v345_v30  ;;  %11414 = vmatpush3.msk.msra.mxu1 %vm1210_vm4, %v1173_v18 }
  0x3d   : > { %11325 = vmatprep.mubr.msk.f32.mxu0 %vm413_vm3, %v346_v31  ;;  %12024 = vmatprep.subr.bf16.mxu1 %v13287_v25 }
  0x40   : > { %11326 = vmatmul.mubr.msk.f32.gmra.mrb[16].mxu0 %vm413_vm3, %v347_v32 }
  0x41   : > { %11328 = vmatprep.mubr.msk.f32.mxu0 %vm413_vm3, %v348_v33 }
  0x44   : > { %11329 = vmatmul.mubr.msk.f32.gmra.mrb[18].mxu0 %vm413_vm3, %v349_v34 }
  0x45   : > { %11331 = vmatprep.mubr.msk.f32.mxu0 %vm413_vm3, %v350_v35 }
  0x48   : > { %11332 = vmatmul.mubr.msk.f32.gmra.mrb[20].mxu0 %vm413_vm3, %v351_v36 }
  0x49   : > { %11334 = vmatprep.mubr.msk.f32.mxu0 %vm413_vm3, %v352_v37  ;;  %v16421_v37 = vmov 0.0  }
  0x4a   : > { %1132 = vst.msk [vmem:[#allocation2 + $0x90] sm:$0xff] %vm1131_vm5, %v16421_v37 }
  0x4c   : > { %11335 = vmatmul.mubr.msk.f32.gmra.mrb[22].mxu0 %vm413_vm3, %v353_v38 }
  0x4d   : > { %11337 = vmatprep.mubr.msk.f32.mxu0 %vm413_vm3, %v354_v39 }
  0x50   : > { %11338 = vmatmul.mubr.msk.f32.gmra.mrb[24].mxu0 %vm413_vm3, %v355_v40 }
  0x51   : > { %11340 = vmatprep.mubr.msk.f32.mxu0 %vm413_vm3, %v356_v41 }
  0x54   : > { %11341 = vmatmul.mubr.msk.f32.gmra.mrb[26].mxu0 %vm413_vm3, %v357_v42 }
  0x55   : > { %11343 = vmatprep.mubr.msk.f32.mxu0 %vm413_vm3, %v358_v43 }
  0x58   : > { %11344 = vmatmul.mubr.msk.f32.gmra.mrb[28].mxu0 %vm413_vm3, %v359_v44 }
  0x59   : > { %11346 = vmatprep.mubr.msk.f32.mxu0 %vm413_vm3, %v360_v45 }
  0x5c   : > { %11347 = vmatmul.mubr.msk.f32.gmra.mrb[30].mxu0 %vm413_vm3, %v361_v46 }
  0x5d   : > { %11349 = vmatprep.mubr.msk.f32.mxu0 %vm413_vm3, %v362_v47 }
  0x60   : > { %11350 = vmatmul.mubr.msk.f32.gmra.mrb[32].mxu0 %vm413_vm3, %v363_v48 }
  0x61   : > { %11352 = vmatprep.mubr.msk.f32.mxu0 %vm413_vm3, %v364_v49  ;;  %v13318_v49 = vld [vmem:[%s16413_s2] ss:$0 sm:$0xff] }
  0x64   : > { %11353 = vmatmul.mubr.msk.f32.gmra.mrb[34].mxu0 %vm413_vm3, %v365_v50 }
  0x65   : > { %11355 = vmatprep.mubr.msk.f32.mxu0 %vm413_vm3, %v366_v51 }
  0x68   : > { %11356 = vmatmul.mubr.msk.f32.gmra.mrb[36].mxu0 %vm413_vm3, %v367_v52 }
  0x69   : > { %11358 = vmatprep.mubr.msk.f32.mxu0 %vm413_vm3, %v368_v53 }
  0x6c   : > { %11359 = vmatmul.mubr.msk.f32.gmra.mrb[38].mxu0 %vm413_vm3, %v369_v54 }
  0x6d   : > { %11361 = vmatprep.mubr.msk.f32.mxu0 %vm413_vm3, %v370_v55 }
  0x70   : > { %11362 = vmatmul.mubr.msk.f32.gmra.mrb[40].mxu0 %vm413_vm3, %v371_v56 }
  0x71   : > { %11364 = vmatprep.mubr.msk.f32.mxu0 %vm413_vm3, %v372_v57 }
  0x74   : > { %11365 = vmatmul.mubr.msk.f32.gmra.mrb[42].mxu0 %vm413_vm3, %v373_v58 }
  0x75   : > { %11367 = vmatprep.mubr.msk.f32.mxu0 %vm413_vm3, %v374_v59 }
  0x78   : > { %11368 = vmatmul.mubr.msk.f32.gmra.mrb[44].mxu0 %vm413_vm3, %v375_v60 }
  0x79   : > { %11370 = vmatprep.mubr.msk.f32.mxu0 %vm413_vm3, %v376_v61 }
  0x7c   : > { %11371 = vmatmul.mubr.msk.f32.gmra.mrb[46].mxu0 %vm413_vm3, %v377_v62 }
  0x7d   : > { %11373 = vmatprep.mubr.msk.f32.mxu0 %vm413_vm3, %v378_v63 }
  0x80   : > { %11374 = vmatmul.mubr.msk.f32.gmra.mrb[48].mxu0 %vm413_vm3, %v379_v0 }
  0x81   : > { %11376 = vmatprep.mubr.msk.f32.mxu0 %vm413_vm3, %v380_v1 }
  0x84   : > { %11377 = vmatmul.mubr.msk.f32.gmra.mrb[50].mxu0 %vm413_vm3, %v381_v2 }
  0x85   : > { %11379 = vmatprep.mubr.msk.f32.mxu0 %vm413_vm3, %v382_v3 }
  0x88   : > { %11380 = vmatmul.mubr.msk.f32.gmra.mrb[52].mxu0 %vm413_vm3, %v383_v4 }
  0x89   : > { %11382 = vmatprep.mubr.msk.f32.mxu0 %vm413_vm3, %v384_v5 }
  0x8c   : > { %11383 = vmatmul.mubr.msk.f32.gmra.mrb[54].mxu0 %vm413_vm3, %v385_v6 }
  0x8d   : > { %11385 = vmatprep.mubr.msk.f32.mxu0 %vm413_vm3, %v386_v7 }
  0x90   : > { %11386 = vmatmul.mubr.msk.f32.gmra.mrb[56].mxu0 %vm413_vm3, %v387_v8 }
  0x91   : > { %11388 = vmatprep.mubr.msk.f32.mxu0 %vm413_vm3, %v388_v9 }
  0x94   : > { %11389 = vmatmul.mubr.msk.f32.gmra.mrb[58].mxu0 %vm413_vm3, %v389_v10 }
  0x95   : > { %11391 = vmatprep.mubr.msk.f32.mxu0 %vm413_vm3, %v390_v11 }
  0x98   : > { %11392 = vmatmul.mubr.msk.f32.gmra.mrb[60].mxu0 %vm413_vm3, %v391_v12 }
  0x99   : > { %11394 = vmatprep.mubr.msk.f32.mxu0 %vm413_vm3, %v392_v13 }
  0x9c   : > { %11395 = vmatmul.mubr.msk.f32.gmra.mrb[62].mxu0 %vm413_vm3, %v393_v14 }
  0x9d   : > { %6082 = vmatprep.mubr.f32.mxu0 %v16421_v37 }
  0xf3   : > { %v11303_v19 = vpop.f32.mrb[0].mxu0 }
  0xf4   : > { %v700_v20 = vpop.f32.mrb[1].mxu0  ;;  %v13290_v30 = vpop.f32.mrb[0].mxu1  ;;  %v13321_v51 = vadd.f32 %v11303_v19, %v13318_v49 }
  0xf5   : > { %v13292_v31 = vpop.f32.mrb[1].mxu1  ;;  %v13327_v54 = vadd.f32 %v13318_v49, %v700_v20 }
  0xf7   : > { %v11306_v21 = vpop.f32.mrb[2].mxu0 }
  0xf8   : > { %v710_v22 = vpop.f32.mrb[3].mxu0  ;;  %v13294_v34 = vpop.f32.mrb[2].mxu1  ;;  %v13337_v59 = vadd.f32 %v11306_v21, %v13318_v49 }
  0xf9   : > { %v13296_v35 = vpop.f32.mrb[3].mxu1  ;;  %v13343_v62 = vadd.f32 %v13318_v49, %v710_v22  ;;  %v1036_v8 = vadd.f32 %v13294_v34, %v13318_v49 }
  0xfa   : > { %v1031_v57 = vadd.f32 %v13318_v49, %v13296_v35 }
  0xfb   : > { %v11309_v26 = vpop.f32.mrb[4].mxu0 }
  0xfc   : > { %v720_v27 = vpop.f32.mrb[5].mxu0  ;;  %v13301_v39 = vpop.f32.mrb[4].mxu1  ;;  %v13353_v3 = vadd.f32 %v11309_v26, %v13318_v49  ;;  %v1021_v26 = vadd.f32 %v13318_v49, %v13292_v31 }
  0xfd   : > { %v13303_v40 = vpop.f32.mrb[5].mxu1  ;;  %v13359_v6 = vadd.f32 %v13318_v49, %v720_v27 }
  0xff   : > { %v11312_v28 = vpop.f32.mrb[6].mxu0 }
 0x100   : > { %v730_v29 = vpop.f32.mrb[7].mxu0  ;;  %v13305_v43 = vpop.f32.mrb[6].mxu1  ;;  %v13369_v11 = vadd.f32 %v11312_v28, %v13318_v49 }
 0x101   : > { %v13307_v44 = vpop.f32.mrb[7].mxu1  ;;  %v13375_v14 = vadd.f32 %v13318_v49, %v730_v29 }
 0x103   : > { %v11315_v32 = vpop.f32.mrb[8].mxu0 }
 0x104   : > { %v740_v33 = vpop.f32.mrb[9].mxu0  ;;  %v13385_v19 = vadd.f32 %v11315_v32, %v13318_v49 }
 0x105   : > { %v13391_v22 = vadd.f32 %v13318_v49, %v740_v33 }
 0x107   : > { %v11318_v36 = vpop.f32.mrb[10].mxu0 }
 0x108   : > { %v750_v38 = vpop.f32.mrb[11].mxu0  ;;  %v756_v28 = vadd.f32 %v11318_v36, %v13318_v49 }
 0x10b   : > { %v11321_v41 = vpop.f32.mrb[12].mxu0 }
 0x10c   : > { %v760_v42 = vpop.f32.mrb[13].mxu0 }
 0x10f   : > { %v11324_v45 = vpop.f32.mrb[14].mxu0 }
 0x110   : > { %v13309_v46 = vpop.f32.mrb[15].mxu0  ;;  %v13409_v37 = vadd.f32 %v11324_v45, %v13318_v49 }
 0x113   : > { %v13311_v47 = vpop.f32.mrb[16].mxu0 }
 0x114   : > { %v13313_v48 = vpop.f32.mrb[17].mxu0  ;;  %v13427_v45 = vadd.f32 %v13311_v47, %v13318_v49 }
 0x117   : > { %v11330_v50 = vpop.f32.mrb[18].mxu0 }
 0x118   : > { %v13324_v52 = vadd.f32 %v11330_v50, %v13318_v49  ;;  %v790_v53 = vpop.f32.mrb[19].mxu0  ;;  %v751_v50 = vadd.f32 %v13318_v49, %v750_v38 }
 0x119   : > { %v13330_v55 = vadd.f32 %v13318_v49, %v790_v53 }
 0x11b   : > { %v11333_v58 = vpop.f32.mrb[20].mxu0 }
 0x11c   : > { %v13340_v60 = vadd.f32 %v11333_v58, %v13318_v49  ;;  %v800_v61 = vpop.f32.mrb[21].mxu0 }
 0x11d   : > { %v13346_v63 = vadd.f32 %v13318_v49, %v800_v61 }
 0x11f   : > { %v11336_v2 = vpop.f32.mrb[22].mxu0 }
 0x120   : > { %v13356_v4 = vadd.f32 %v11336_v2, %v13318_v49  ;;  %v810_v5 = vpop.f32.mrb[23].mxu0  ;;  %v766_v2 = vadd.f32 %v11321_v41, %v13318_v49  ;;  %v13416_v41 = vadd.f32 %v13318_v49, %v13309_v46  ;;  %v13434_v46 = vadd.f32 %v13318_v49, %v13313_v48 }
 0x121   : > { %v13362_v7 = vadd.f32 %v13318_v49, %v810_v5 }
 0x123   : > { %v11339_v10 = vpop.f32.mrb[24].mxu0 }
 0x124   : > { %v13372_v12 = vadd.f32 %v11339_v10, %v13318_v49  ;;  %v820_v13 = vpop.f32.mrb[25].mxu0 }
 0x125   : > { %v13378_v15 = vadd.f32 %v13318_v49, %v820_v13  ;;  %v761_v13 = vadd.f32 %v13318_v49, %v760_v42 }
 0x127   : > { %v11342_v18 = vpop.f32.mrb[26].mxu0 }
 0x128   : > { %v13388_v20 = vadd.f32 %v11342_v18, %v13318_v49  ;;  %v830_v21 = vpop.f32.mrb[27].mxu0 }
 0x129   : > { %v13394_v23 = vadd.f32 %v13318_v49, %v830_v21 }
 0x12b   : > { %16443 = vst [vmem:[#allocation6_spill] sm:$0xff] %v13394_v23  ;;  %v11345_v27 = vpop.f32.mrb[28].mxu0 }
 0x12c   : > { %v846_v29 = vadd.f32 %v11345_v27, %v13318_v49  ;;  %v840_v32 = vpop.f32.mrb[29].mxu0 }
 0x12d   : > { %v841_v33 = vadd.f32 %v13318_v49, %v840_v32 }
 0x12e   : > { %v1070_v53 = vmax.f32 %v756_v28, %v846_v29 }
 0x12f   : > { %v1069_v58 = vmax.f32 %v751_v50, %v841_v33  ;;  %v11348_v61 = vpop.f32.mrb[30].mxu0 }
 0x130   : > { %v856_v5 = vadd.f32 %v11348_v61, %v13318_v49  ;;  %v850_v10 = vpop.f32.mrb[31].mxu0 }
 0x131   : > { %v851_v18 = vadd.f32 %v13318_v49, %v850_v10 }
 0x132   : > { %v1072_v36 = vmax.f32 %v766_v2, %v856_v5 }
 0x133   : > { %v1071_v21 = vmax.f32 %v761_v13, %v851_v18  ;;  %v11351_v27 = vpop.f32.mrb[32].mxu0 }
 0x134   : > { %v13412_v38 = vadd.f32 %v11351_v27, %v13318_v49  ;;  %v860_v28 = vpop.f32.mrb[33].mxu0 }
 0x135   : > { %v13419_v29 = vadd.f32 %v13318_v49, %v860_v28 }
 0x136   : > { %v1074_v42 = vmax.f32 %v13409_v37, %v13412_v38 }
 0x137   : > { %v1073_v32 = vmax.f32 %v13416_v41, %v13419_v29  ;;  %v11354_v50 = vpop.f32.mrb[34].mxu0 }
 0x138   : > { %v13430_v33 = vadd.f32 %v11354_v50, %v13318_v49  ;;  %v870_v61 = vpop.f32.mrb[35].mxu0  ;;  %v1026_v50 = vadd.f32 %v13290_v30, %v13318_v49 }
 0x139   : > { %v13437_v2 = vadd.f32 %v13318_v49, %v870_v61 }
 0x13b   : > { %v11357_v10 = vpop.f32.mrb[36].mxu0 }
 0x13c   : > { %v13443_v47 = vpop.f32.mrb[37].mxu0 }
 0x13f   : > { %v13445_v13 = vpop.f32.mrb[38].mxu0 }
 0x140   : > { %v13447_v18 = vpop.f32.mrb[39].mxu0 }
 0x143   : > { %v13449_v27 = vpop.f32.mrb[40].mxu0 }
 0x144   : > { %v13451_v48 = vpop.f32.mrb[41].mxu0 }
 0x147   : > { %v13453_v38 = vpop.f32.mrb[42].mxu0 }
 0x148   : > { %v13455_v28 = vpop.f32.mrb[43].mxu0 }
 0x14b   : > { %v13457_v41 = vpop.f32.mrb[44].mxu0 }
 0x14c   : > { %v13459_v29 = vpop.f32.mrb[45].mxu0 }
 0x14f   : > { %v11372_v61 = vpop.f32.mrb[46].mxu0 }
 0x150   : > { %v936_v24 = vadd.f32 %v11372_v61, %v13318_v49  ;;  %v930_v17 = vpop.f32.mrb[47].mxu0 }
 0x151   : > { %v931_v16 = vadd.f32 %v13318_v49, %v930_v17  ;;  %v1046_v17 = vadd.f32 %v13301_v39, %v13318_v49  ;;  %v1056_v39 = vadd.f32 %v13305_v43, %v13318_v49 }
 0x152   : > { %v1088_v9 = vmax.f32 %v936_v24, %v1026_v50 }
 0x153   : > { %v1087_v1 = vmax.f32 %v931_v16, %v1021_v26  ;;  %v11375_v0 = vpop.f32.mrb[48].mxu0  ;;  %v1041_v16 = vadd.f32 %v13318_v49, %v13303_v40  ;;  %v1051_v40 = vadd.f32 %v13318_v49, %v13307_v44  ;;  %v16444_v44 = vmax.f32 %v13427_v45, %v13430_v33 }
 0x154   : > { %v1106_v56 = vmax.f32 %v1070_v53, %v1088_v9  ;;  %v946_v30 = vadd.f32 %v11375_v0, %v13318_v49  ;;  %v940_v5 = vpop.f32.mrb[49].mxu0  ;;  %v896_v33 = vadd.f32 %v13445_v13, %v13318_v49 }
 0x155   : > { %v1105_v37 = vmax.f32 %v1069_v58, %v1087_v1  ;;  %v941_v31 = vadd.f32 %v13318_v49, %v940_v5 }
 0x156   : > { %v1124_v61 = vmax.f32 %v1106_v56, 0.0  ;;  %v1090_v23 = vmax.f32 %v946_v30, %v1036_v8 }
 0x157   : > { %v1123_v24 = vmax.f32 %v1105_v37, 0.0  ;;  %v1089_v50 = vmax.f32 %v941_v31, %v1031_v57  ;;  %v11378_v34 = vpop.f32.mrb[50].mxu0 }
 0x158   : > { %1144 = vst.msk [vmem:[#allocation2 + $0x58] sm:$0xff] %vm1131_vm5, %v1124_v61  ;;  %v1108_v35 = vmax.f32 %v1072_v36, %v1090_v23  ;;  %v956_v0 = vadd.f32 %v11378_v34, %v13318_v49  ;;  %v950_v9 = vpop.f32.mrb[51].mxu0 }
 0x159   : > { %1143 = vst.msk [vmem:[#allocation2 + $0x50] sm:$0xff] %vm1131_vm5, %v1123_v24  ;;  %v1107_v1 = vmax.f32 %v1071_v21, %v1089_v50  ;;  %v951_v56 = vadd.f32 %v13318_v49, %v950_v9  ;;  %v886_v24 = vadd.f32 %v11357_v10, %v13318_v49 }
 0x15a   : > { %v1126_v8 = vmax.f32 %v1108_v35, 0.0  ;;  %v1092_v26 = vmax.f32 %v956_v0, %v1046_v17 }
 0x15b   : > { %v1125_v57 = vmax.f32 %v1107_v1, 0.0  ;;  %v1091_v53 = vmax.f32 %v951_v56, %v1041_v16  ;;  %v11381_v58 = vpop.f32.mrb[52].mxu0  ;;  %v16445_v16 = vmax.f32 %v13434_v46, %v13437_v2  ;;  %v891_v2 = vadd.f32 %v13318_v49, %v13447_v18 }
 0x15c   : > { %1146 = vst.msk [vmem:[#allocation2 + $0x68] sm:$0xff] %vm1131_vm5, %v1126_v8  ;;  %v1110_v23 = vmax.f32 %v1074_v42, %v1092_v26  ;;  %v966_v36 = vadd.f32 %v11381_v58, %v13318_v49  ;;  %v960_v37 = vpop.f32.mrb[53].mxu0  ;;  %v16448_v18 = vmax.f32 %v13337_v59, %v13340_v60  ;;  %v916_v60 = vadd.f32 %v13453_v38, %v13318_v49 }
 0x15d   : > { %1145 = vst.msk [vmem:[#allocation2 + $0x60] sm:$0xff] %vm1131_vm5, %v1125_v57  ;;  %v1109_v21 = vmax.f32 %v1073_v32, %v1091_v53  ;;  %v961_v5 = vadd.f32 %v13318_v49, %v960_v37  ;;  %v881_v32 = vadd.f32 %v13318_v49, %v13443_v47  ;;  %v16446_v47 = vmax.f32 %v13321_v51, %v13324_v52 }
 0x15e   : > { %v1128_v30 = vmax.f32 %v1110_v23, 0.0  ;;  %v1094_v31 = vmax.f32 %v966_v36, %v1056_v39  ;;  %v16447_v39 = vmax.f32 %v13327_v54, %v13330_v55  ;;  %v906_v52 = vadd.f32 %v13449_v27, %v13318_v49 }
 0x15f   : > { %v1127_v43 = vmax.f32 %v1109_v21, 0.0  ;;  %v1093_v61 = vmax.f32 %v961_v5, %v1051_v40  ;;  %v11384_v17 = vpop.f32.mrb[54].mxu0  ;;  %v901_v55 = vadd.f32 %v13318_v49, %v13451_v48  ;;  %v16449_v21 = vmax.f32 %v13343_v62, %v13346_v63 }
 0x160   : > { %1148 = vst.msk [vmem:[#allocation2 + $0x78] sm:$0xff] %vm1131_vm5, %v1128_v30  ;;  %v1112_v42 = vmax.f32 %v16444_v44, %v1094_v31  ;;  %v976_v50 = vadd.f32 %v11384_v17, %v13318_v49  ;;  %v970_v34 = vpop.f32.mrb[55].mxu0  ;;  %v16450_v48 = vmax.f32 %v13353_v3, %v13356_v4  ;;  %v911_v63 = vadd.f32 %v13318_v49, %v13455_v28 }
 0x161   : > { %1147 = vst.msk [vmem:[#allocation2 + $0x70] sm:$0xff] %vm1131_vm5, %v1127_v43  ;;  %v1111_v35 = vmax.f32 %v16445_v16, %v1093_v61  ;;  %v971_v10 = vadd.f32 %v13318_v49, %v970_v34  ;;  %v16451_v44 = vmax.f32 %v13359_v6, %v13362_v7  ;;  %v926_v4 = vadd.f32 %v13457_v41, %v13318_v49 }
 0x162   : > { %v1130_v0 = vmax.f32 %v1112_v42, 0.0  ;;  %v1078_v9 = vmax.f32 %v886_v24, %v976_v50  ;;  %v16452_v28 = vmax.f32 %v13369_v11, %v13372_v12  ;;  %v16453_v41 = vmax.f32 %v13375_v14, %v13378_v15 }
 0x163   : > { %v1129_v1 = vmax.f32 %v1111_v35, 0.0  ;;  %v1077_v56 = vmax.f32 %v881_v32, %v971_v10  ;;  %v11387_v45 = vpop.f32.mrb[56].mxu0 }
 0x164   : > { %1150 = vst.msk [vmem:[#allocation2 + $0x88] sm:$0xff] %vm1131_vm5, %v1130_v0  ;;  %v1096_v8 = vmax.f32 %v16446_v47, %v1078_v9  ;;  %v986_v26 = vadd.f32 %v11387_v45, %v13318_v49  ;;  %v980_v46 = vpop.f32.mrb[57].mxu0  ;;  %v9904_v0 = vld [vmem:[%s16414_s3 + $0x28] sm:$0xf]  ;;  %v921_v9 = vadd.f32 %v13318_v49, %v13459_v29  ;;  %v9919_v45 = vld [vmem:[%s16414_s3 + $0x38] sm:$0xff] }
 0x165   : > { %1149 = vst.msk [vmem:[#allocation2 + $0x80] sm:$0xff] %vm1131_vm5, %v1129_v1  ;;  %v1095_v57 = vmax.f32 %v16447_v39, %v1077_v56  ;;  %v981_v13 = vadd.f32 %v13318_v49, %v980_v46  ;;  %v9918_v56 = vld [vmem:[%s16414_s3 + $0x30] sm:$0xff]  ;;  %v16455_v46 = vld [vmem:[#allocation6_spill] sm:$0xff] }
 0x166   : > { %v1114_v53 = vmax.f32 %v1096_v8, 0.0  ;;  %v1080_v58 = vmax.f32 %v896_v33, %v986_v26  ;;  %v12027_v26 = vpack.c.bf16 %v9919_v45, %v9918_v56 }
 0x167   : > { %v1113_v40 = vmax.f32 %v1095_v57, 0.0  ;;  %v1079_v23 = vmax.f32 %v891_v2, %v981_v13  ;;  %v11390_v51 = vpop.f32.mrb[58].mxu0  ;;  %v16456_v2 = vmax.f32 %v13391_v22, %v16455_v46  ;;  %v9968_v46 = vld [vmem:[%s16414_s3 + $0x88] sm:$0xf] }
 0x168   : > { %1134 = vst.msk [vmem:[#allocation2 + $0x8] sm:$0xff] %vm1131_vm5, %v1114_v53  ;;  %v1098_v36 = vmax.f32 %v16448_v18, %v1080_v58  ;;  %v996_v37 = vadd.f32 %v11390_v51, %v13318_v49  ;;  %v990_v54 = vpop.f32.mrb[59].mxu0  ;;  %v13618_v51 = vld [vmem:[#allocation2 + $0x58] sm:$0xff]  ;;  %v9920_v18 = vld [vmem:[%s16414_s3 + $0x40] sm:$0xf] }
 0x169   : > { %1133 = vst.msk [vmem:[#allocation2] sm:$0xff] %vm1131_vm5, %v1113_v40  ;;  %v1097_v5 = vmax.f32 %v16449_v21, %v1079_v23  ;;  %v991_v27 = vadd.f32 %v13318_v49, %v990_v54  ;;  %v13614_v23 = vld [vmem:[#allocation2 + $0x50] sm:$0xff] }
 0x16a   : > { %v1116_v30 = vmax.f32 %v1098_v36, 0.0  ;;  %v1082_v31 = vmax.f32 %v906_v52, %v996_v37  ;;  %v9934_v37 = vld [vmem:[%s16414_s3 + $0x48] sm:$0xff]  ;;  %v9935_v54 = vld [vmem:[%s16414_s3 + $0x50] sm:$0xff] }
 0x16b   : > { %v1115_v43 = vmax.f32 %v1097_v5, 0.0  ;;  %v1081_v61 = vmax.f32 %v901_v55, %v991_v27  ;;  %v11393_v59 = vpop.f32.mrb[60].mxu0  ;;  %v12031_v21 = vpack.c.bf16 %v9935_v54, %v9934_v37 }
 0x16c   : > { %1136 = vst.msk [vmem:[#allocation2 + $0x18] sm:$0xff] %vm1131_vm5, %v1116_v30  ;;  %v1100_v17 = vmax.f32 %v16450_v48, %v1082_v31  ;;  %v1006_v24 = vadd.f32 %v11393_v59, %v13318_v49  ;;  %v1000_v62 = vpop.f32.mrb[61].mxu0  ;;  %v13668_v48 = vld [vmem:[#allocation2 + $0x59] sm:$0xff] }
 0x16d   : > { %1135 = vst.msk [vmem:[#allocation2 + $0x10] sm:$0xff] %vm1131_vm5, %v1115_v43  ;;  %v1099_v42 = vmax.f32 %v16451_v44, %v1081_v61  ;;  %v1001_v38 = vadd.f32 %v13318_v49, %v1000_v62  ;;  %v9951_v44 = vld [vmem:[%s16414_s3 + $0x68] sm:$0xff] }
 0x16e   : > { %v1118_v50 = vmax.f32 %v1100_v17, 0.0  ;;  %v1084_v34 = vmax.f32 %v916_v60, %v1006_v24  ;;  %v13664_v60 = vld [vmem:[#allocation2 + $0x51] sm:$0xff] }
 0x16f   : > { %v1117_v32 = vmax.f32 %v1099_v42, 0.0  ;;  %v1083_v16 = vmax.f32 %v911_v63, %v1001_v38  ;;  %v11396_v3 = vpop.f32.mrb[62].mxu0  ;;  %v1160_v12 = vld [vmem:[#allocation2 + $0x8] sm:$0xff]  ;;  %v9936_v24 = vld [vmem:[%s16414_s3 + $0x58] sm:$0xf]  ;;  %v9950_v63 = vld [vmem:[%s16414_s3 + $0x60] sm:$0xff] }
 0x170   : > { %1138 = vst.msk [vmem:[#allocation2 + $0x28] sm:$0xff] %vm1131_vm5, %v1118_v50  ;;  %v1102_v35 = vmax.f32 %v16452_v28, %v1084_v34  ;;  %v1016_v10 = vadd.f32 %v11396_v3, %v13318_v49  ;;  %v1010_v6 = vpop.f32.mrb[63].mxu0  ;;  %v1159_v7 = vld [vmem:[#allocation2] sm:$0xff]  ;;  %v12035_v38 = vpack.c.bf16 %v9951_v44, %v9950_v63  ;;  %v9998_v44 = vld [vmem:[%s16414_s3 + $0xa8] sm:$0xff] }
 0x171   : > { %1137 = vst.msk [vmem:[#allocation2 + $0x20] sm:$0xff] %vm1131_vm5, %v1117_v32  ;;  %v1101_v1 = vmax.f32 %v16453_v41, %v1083_v16  ;;  %v1011_v11 = vadd.f32 %v13318_v49, %v1010_v6  ;;  %11415 = vmatprep.mubr.msk.f32.mxu1 %vm1131_vm5, %v1159_v7  ;;  %v16454_v49 = vmax.f32 %v13385_v19, %v13388_v20  ;;  %v1351_v52 = vld [vmem:[#allocation2 + $0x1] sm:$0xff]  ;;  %v9952_v7 = vld [vmem:[%s16414_s3 + $0x70] sm:$0xf] }
 0x172   : > { %v1120_v29 = vmax.f32 %v1102_v35, 0.0  ;;  %v1086_v33 = vmax.f32 %v926_v4, %v1016_v10  ;;  %11416 = vmatmul.mubr.msk.f32.vlgmr.msra.gmra.mrb[8].mxu1 %vm1131_vm5, %v1160_v12  ;;  %v1543_v17 = vld [vmem:[#allocation2 + $0x2] sm:$0xff]  ;;  %v13714_v35 = vld [vmem:[#allocation2 + $0x52] sm:$0xff]  ;;  %v13718_v10 = vld [vmem:[#allocation2 + $0x5a] sm:$0xff] }
 0x173   : > { %v1119_v47 = vmax.f32 %v1101_v1, 0.0  ;;  %v1085_v14 = vmax.f32 %v921_v9, %v1011_v11  ;;  %12026 = vmatpush3.bf16.msra.mxu1 %v13287_v25  ;;  %v13583_v25 = vld [vmem:[#allocation2 + $0x18] sm:$0xff]  ;;  %v1735_v6 = vld [vmem:[#allocation2 + $0x3] sm:$0xff] }
 0x174   : > { %1140 = vst.msk [vmem:[#allocation2 + $0x38] sm:$0xff] %vm1131_vm5, %v1120_v29  ;;  %v1104_v15 = vmax.f32 %v16454_v49, %v1086_v33  ;;  %v13574_v8 = vld [vmem:[#allocation2 + $0x10] sm:$0xff]  ;;  %11437 = vmatprep.subr.msk.mxu1 %vm1210_vm4, %v9904_v0  ;;  %v9966_v9 = vld [vmem:[%s16414_s3 + $0x78] sm:$0xff]  ;;  %v9967_v41 = vld [vmem:[%s16414_s3 + $0x80] sm:$0xff] }
 0x175   : > { %1139 = vst.msk [vmem:[#allocation2 + $0x30] sm:$0xff] %vm1131_vm5, %v1119_v47  ;;  %v1103_v39 = vmax.f32 %v16456_v2, %v1085_v14  ;;  %11418 = vmatprep.mubr.msk.f32.mxu1 %vm1131_vm5, %v13574_v8  ;;  %v1352_v36 = vld [vmem:[#allocation2 + $0x9] sm:$0xff]  ;;  %v1353_v55 = vld [vmem:[#allocation2 + $0x11] sm:$0xff]  ;;  %v12039_v11 = vpack.c.bf16 %v9967_v41, %v9966_v9  ;;  %v9984_v63 = vld [vmem:[%s16414_s3 + $0xa0] sm:$0xf] }
 0x176   : > { %v1122_v57 = vmax.f32 %v1104_v15, 0.0  ;;  %11419 = vmatmul.mubr.msk.f32.gmra.mrb[10].mxu1 %vm1131_vm5, %v13583_v25  ;;  %v1544_v62 = vld [vmem:[#allocation2 + $0xa] sm:$0xff]  ;;  %v1545_v42 = vld [vmem:[#allocation2 + $0x12] sm:$0xff]  ;;  %v13768_v15 = vld [vmem:[#allocation2 + $0x5b] sm:$0xff] }
 0x177   : > { %v1121_v19 = vmax.f32 %v1103_v39, 0.0  ;;  %11438 = vmatpush3.msk.msra.mxu1 %vm1210_vm4, %v9904_v0  ;;  %v13594_v22 = vld [vmem:[#allocation2 + $0x28] sm:$0xff]  ;;  %v1737_v1 = vld [vmem:[#allocation2 + $0x13] sm:$0xff]  ;;  %v10014_v41 = vld [vmem:[%s16414_s3 + $0xc0] sm:$0xff] }
 0x178   : > { %1142 = vst.msk [vmem:[#allocation2 + $0x48] sm:$0xff] %vm1131_vm5, %v1122_v57  ;;  %v13589_v20 = vld [vmem:[#allocation2 + $0x20] sm:$0xff]  ;;  %12028 = vmatprep.subr.bf16.mxu1 %v12027_v26  ;;  %v1736_v0 = vld [vmem:[#allocation2 + $0xb] sm:$0xff]  ;;  %v13764_v49 = vld [vmem:[#allocation2 + $0x53] sm:$0xff] }
 0x179   : > { %1141 = vst.msk [vmem:[#allocation2 + $0x40] sm:$0xff] %vm1131_vm5, %v1121_v19  ;;  %11421 = vmatprep.mubr.msk.f32.mxu1 %vm1131_vm5, %v13589_v20  ;;  %v13635_v5 = vld [vmem:[#allocation2 + $0x19] sm:$0xff]  ;;  %v13639_v27 = vld [vmem:[#allocation2 + $0x21] sm:$0xff]  ;;  %v1928_v2 = vld [vmem:[#allocation2 + $0xc] sm:$0xff] }
 0x17a   : > { %11422 = vmatmul.mubr.msk.f32.gmra.mrb[12].mxu1 %vm1131_vm5, %v13594_v22  ;;  %v13685_v50 = vld [vmem:[#allocation2 + $0x1a] sm:$0xff]  ;;  %v13689_v34 = vld [vmem:[#allocation2 + $0x22] sm:$0xff]  ;;  %v9982_v39 = vld [vmem:[%s16414_s3 + $0x90] sm:$0xff] }
 0x17b   : > { %v13602_v53 = vld [vmem:[#allocation2 + $0x38] sm:$0xff]  ;;  %v13739_v56 = vld [vmem:[#allocation2 + $0x23] sm:$0xff] }
 0x17c   : > { %v13598_v13 = vld [vmem:[#allocation2 + $0x30] sm:$0xff]  ;;  %v13735_v12 = vld [vmem:[#allocation2 + $0x1b] sm:$0xff] }
 0x17d   : > { %11424 = vmatprep.mubr.msk.f32.mxu1 %vm1131_vm5, %v13598_v13  ;;  %v13644_v30 = vld [vmem:[#allocation2 + $0x29] sm:$0xff]  ;;  %v13648_v31 = vld [vmem:[#allocation2 + $0x31] sm:$0xff] }
 0x17e   : > { %11425 = vmatmul.mubr.msk.f32.gmra.mrb[14].mxu1 %vm1131_vm5, %v13602_v53  ;;  %v13694_v32 = vld [vmem:[#allocation2 + $0x2a] sm:$0xff]  ;;  %v13698_v16 = vld [vmem:[#allocation2 + $0x32] sm:$0xff] }
 0x17f   : > { %v13610_v40 = vld [vmem:[#allocation2 + $0x48] sm:$0xff]  ;;  %v13748_v29 = vld [vmem:[#allocation2 + $0x33] sm:$0xff] }
 0x180   : > { %v13606_v58 = vld [vmem:[#allocation2 + $0x40] sm:$0xff]  ;;  %v13660_v59 = vld [vmem:[#allocation2 + $0x49] sm:$0xff]  ;;  %v9983_v57 = vld [vmem:[%s16414_s3 + $0x98] sm:$0xff] }
 0x181   : > { %11427 = vmatprep.mubr.msk.f32.mxu1 %vm1131_vm5, %v13606_v58  ;;  %v13652_v43 = vld [vmem:[#allocation2 + $0x39] sm:$0xff]  ;;  %v13656_v61 = vld [vmem:[#allocation2 + $0x41] sm:$0xff]  ;;  %v13710_v28 = vld [vmem:[#allocation2 + $0x4a] sm:$0xff] }
 0x182   : > { %11428 = vmatmul.mubr.msk.f32.gmra.mrb[16].mxu1 %vm1131_vm5, %v13610_v40  ;;  %v13702_v3 = vld [vmem:[#allocation2 + $0x3a] sm:$0xff]  ;;  %v13706_v4 = vld [vmem:[#allocation2 + $0x42] sm:$0xff]  ;;  %v13744_v45 = vld [vmem:[#allocation2 + $0x2b] sm:$0xff] }
 0x183   : > { %11430 = vmatprep.mubr.msk.f32.mxu1 %vm1131_vm5, %v13614_v23  ;;  %v13752_v33 = vld [vmem:[#allocation2 + $0x3b] sm:$0xff]  ;;  %v13756_v47 = vld [vmem:[#allocation2 + $0x43] sm:$0xff]  ;;  %v13760_v14 = vld [vmem:[#allocation2 + $0x4b] sm:$0xff] }
 0x184   : > { %v1929_v19 = vld [vmem:[#allocation2 + $0x14] sm:$0xff]  ;;  %v13794_v37 = vld [vmem:[#allocation2 + $0x2c] sm:$0xff] }
 0x185   : > { %v13798_v54 = vld [vmem:[#allocation2 + $0x34] sm:$0xff] }
 0x186   : > { %11431 = vmatmul.mubr.msk.f32.gmra.mrb[18].mxu1 %vm1131_vm5, %v13618_v51  ;;  %v10000_v9 = vld [vmem:[%s16414_s3 + $0xb8] sm:$0xf] }
 0x187   : > { %11439 = vmatprep.mubr.msk.f32.mxu1 %vm1131_vm5, %v1351_v52  ;;  %v12043_v52 = vpack.c.bf16 %v9983_v57, %v9982_v39  ;;  %v13879_v39 = vld [vmem:[#allocation2 + $0x35] sm:$0xff]  ;;  %v13883_v57 = vld [vmem:[#allocation2 + $0x3d] sm:$0xff] }
 0x18a   : > { %11440 = vmatmul.mubr.msk.f32.vlgmr.msra.gmra.mrb[8].mxu1 %vm1131_vm5, %v1352_v36  ;;  %v13789_v36 = vld [vmem:[#allocation2 + $0x24] sm:$0xff] }
 0x18b   : > { %12030 = vmatpush3.bf16.msra.mxu1 %v12027_v26  ;;  %11442 = vmatprep.mubr.msk.f32.mxu1 %vm1131_vm5, %v1353_v55  ;;  %v1927_v26 = vld [vmem:[#allocation2 + $0x4] sm:$0xff]  ;;  %v13802_v55 = vld [vmem:[#allocation2 + $0x3c] sm:$0xff] }
 0x18c   : > { %11461 = vmatprep.subr.msk.mxu1 %vm1210_vm4, %v9920_v18 }
 0x18e   : > { %11443 = vmatmul.mubr.msk.f32.gmra.mrb[10].mxu1 %vm1131_vm5, %v13635_v5 }
 0x18f   : > { %11445 = vmatprep.mubr.msk.f32.mxu1 %vm1131_vm5, %v13639_v27  ;;  %11462 = vmatpush3.msk.msra.mxu1 %vm1210_vm4, %v9920_v18  ;;  %v13785_v18 = vld [vmem:[#allocation2 + $0x1c] sm:$0xff] }
 0x190   : > { %12032 = vmatprep.subr.bf16.mxu1 %v12031_v21 }
 0x192   : > { %11446 = vmatmul.mubr.msk.f32.gmra.mrb[12].mxu1 %vm1131_vm5, %v13644_v30 }
 0x193   : > { %11448 = vmatprep.mubr.msk.f32.mxu1 %vm1131_vm5, %v13648_v31 }
 0x196   : > { %11449 = vmatmul.mubr.msk.f32.gmra.mrb[14].mxu1 %vm1131_vm5, %v13652_v43 }
 0x197   : > { %11451 = vmatprep.mubr.msk.f32.mxu1 %vm1131_vm5, %v13656_v61 }
 0x19a   : > { %11452 = vmatmul.mubr.msk.f32.gmra.mrb[16].mxu1 %vm1131_vm5, %v13660_v59 }
 0x19b   : > { %11454 = vmatprep.mubr.msk.f32.mxu1 %vm1131_vm5, %v13664_v60 }
 0x19e   : > { %11455 = vmatmul.mubr.msk.f32.gmra.mrb[18].mxu1 %vm1131_vm5, %v13668_v48 }
 0x19f   : > { %11463 = vmatprep.mubr.msk.f32.mxu1 %vm1131_vm5, %v1543_v17  ;;  %v13810_v17 = vld [vmem:[#allocation2 + $0x4c] sm:$0xff] }
 0x1a2   : > { %11464 = vmatmul.mubr.msk.f32.vlgmr.msra.gmra.mrb[8].mxu1 %vm1131_vm5, %v1544_v62  ;;  %v13818_v62 = vld [vmem:[#allocation2 + $0x5c] sm:$0xff] }
 0x1a3   : > { %12034 = vmatpush3.bf16.msra.mxu1 %v12031_v21  ;;  %11466 = vmatprep.mubr.msk.f32.mxu1 %vm1131_vm5, %v1545_v42  ;;  %v13806_v21 = vld [vmem:[#allocation2 + $0x44] sm:$0xff]  ;;  %v9999_v42 = vld [vmem:[%s16414_s3 + $0xb0] sm:$0xff] }
 0x1a4   : > { %11485 = vmatprep.subr.msk.mxu1 %vm1210_vm4, %v9936_v24 }
 0x1a6   : > { %11467 = vmatmul.mubr.msk.f32.gmra.mrb[10].mxu1 %vm1131_vm5, %v13685_v50 }
 0x1a7   : > { %11469 = vmatprep.mubr.msk.f32.mxu1 %vm1131_vm5, %v13689_v34  ;;  %11486 = vmatpush3.msk.msra.mxu1 %vm1210_vm4, %v9936_v24  ;;  %v13814_v24 = vld [vmem:[#allocation2 + $0x54] sm:$0xff] }
 0x1a8   : > { %12036 = vmatprep.subr.bf16.mxu1 %v12035_v38 }
 0x1aa   : > { %11470 = vmatmul.mubr.msk.f32.gmra.mrb[12].mxu1 %vm1131_vm5, %v13694_v32 }
 0x1ab   : > { %11472 = vmatprep.mubr.msk.f32.mxu1 %vm1131_vm5, %v13698_v16 }
 0x1ae   : > { %11473 = vmatmul.mubr.msk.f32.gmra.mrb[14].mxu1 %vm1131_vm5, %v13702_v3 }
 0x1af   : > { %11475 = vmatprep.mubr.msk.f32.mxu1 %vm1131_vm5, %v13706_v4 }
 0x1b2   : > { %11476 = vmatmul.mubr.msk.f32.gmra.mrb[16].mxu1 %vm1131_vm5, %v13710_v28 }
 0x1b3   : > { %11478 = vmatprep.mubr.msk.f32.mxu1 %vm1131_vm5, %v13714_v35 }
 0x1b6   : > { %11479 = vmatmul.mubr.msk.f32.gmra.mrb[18].mxu1 %vm1131_vm5, %v13718_v10 }
 0x1b7   : > { %11487 = vmatprep.mubr.msk.f32.mxu1 %vm1131_vm5, %v1735_v6  ;;  %v13853_v6 = vld [vmem:[#allocation2 + $0x64] sm:$0xff] }
 0x1ba   : > { %11488 = vmatmul.mubr.msk.f32.vlgmr.msra.gmra.mrb[8].mxu1 %vm1131_vm5, %v1736_v0  ;;  %v2312_v0 = vld [vmem:[#allocation2 + $0x15] sm:$0xff] }
 0x1bb   : > { %12038 = vmatpush3.bf16.msra.mxu1 %v12035_v38  ;;  %11490 = vmatprep.mubr.msk.f32.mxu1 %vm1131_vm5, %v1737_v1  ;;  %v12047_v38 = vpack.c.bf16 %v9999_v42, %v9998_v44  ;;  %v10015_v1 = vld [vmem:[%s16414_s3 + $0xc8] sm:$0xff]  ;;  %v13899_v44 = vld [vmem:[#allocation2 + $0x5d] sm:$0xff] }
 0x1bc   : > { %11509 = vmatprep.subr.msk.mxu1 %vm1210_vm4, %v9952_v7  ;;  %v13903_v42 = vld [vmem:[#allocation2 + $0x65] sm:$0xff] }
 0x1bd   : > { %16457 = vst [vmem:[#allocation6_spill] sm:$0xff] %v13903_v42 }
 0x1be   : > { %11491 = vmatmul.mubr.msk.f32.gmra.mrb[10].mxu1 %vm1131_vm5, %v13735_v12 }
 0x1bf   : > { %11493 = vmatprep.mubr.msk.f32.mxu1 %vm1131_vm5, %v13739_v56  ;;  %11510 = vmatpush3.msk.msra.mxu1 %vm1210_vm4, %v9952_v7  ;;  %v2311_v7 = vld [vmem:[#allocation2 + $0xd] sm:$0xff] }
 0x1c0   : > { %12040 = vmatprep.subr.bf16.mxu1 %v12039_v11 }
 0x1c2   : > { %11494 = vmatmul.mubr.msk.f32.gmra.mrb[12].mxu1 %vm1131_vm5, %v13744_v45 }
 0x1c3   : > { %11496 = vmatprep.mubr.msk.f32.mxu1 %vm1131_vm5, %v13748_v29 }
 0x1c6   : > { %11497 = vmatmul.mubr.msk.f32.gmra.mrb[14].mxu1 %vm1131_vm5, %v13752_v33 }
 0x1c7   : > { %11499 = vmatprep.mubr.msk.f32.mxu1 %vm1131_vm5, %v13756_v47 }
 0x1ca   : > { %11500 = vmatmul.mubr.msk.f32.gmra.mrb[16].mxu1 %vm1131_vm5, %v13760_v14 }
 0x1cb   : > { %11502 = vmatprep.mubr.msk.f32.mxu1 %vm1131_vm5, %v13764_v49 }
 0x1ce   : > { %11503 = vmatmul.mubr.msk.f32.gmra.mrb[18].mxu1 %vm1131_vm5, %v13768_v15 }
 0x1cf   : > { %11511 = vmatprep.mubr.msk.f32.mxu1 %vm1131_vm5, %v1927_v26  ;;  %v12051_v26 = vpack.c.bf16 %v10015_v1, %v10014_v41  ;;  %v10031_v41 = vld [vmem:[%s16414_s3 + $0xe0] sm:$0xff] }
 0x1d0   : > { %v2505_v1 = vld [vmem:[#allocation2 + $0x1e] sm:$0xff] }
 0x1d2   : > { %11512 = vmatmul.mubr.msk.f32.vlgmr.msra.gmra.mrb[8].mxu1 %vm1131_vm5, %v1928_v2 }
 0x1d3   : > { %12042 = vmatpush3.bf16.msra.mxu1 %v12039_v11  ;;  %11514 = vmatprep.mubr.msk.f32.mxu1 %vm1131_vm5, %v1929_v19  ;;  %v2313_v11 = vld [vmem:[#allocation2 + $0x1d] sm:$0xff] }
 0x1d4   : > { %11533 = vmatprep.subr.msk.mxu1 %vm1210_vm4, %v9968_v46 }
 0x1d6   : > { %11515 = vmatmul.mubr.msk.f32.gmra.mrb[10].mxu1 %vm1131_vm5, %v13785_v18 }
 0x1d7   : > { %11517 = vmatprep.mubr.msk.f32.mxu1 %vm1131_vm5, %v13789_v36  ;;  %11534 = vmatpush3.msk.msra.mxu1 %vm1210_vm4, %v9968_v46  ;;  %v13870_v46 = vld [vmem:[#allocation2 + $0x25] sm:$0xff] }
 0x1d8   : > { %12044 = vmatprep.subr.bf16.mxu1 %v12043_v52 }
 0x1da   : > { %11518 = vmatmul.mubr.msk.f32.gmra.mrb[12].mxu1 %vm1131_vm5, %v13794_v37 }
 0x1db   : > { %11520 = vmatprep.mubr.msk.f32.mxu1 %vm1131_vm5, %v13798_v54 }
 0x1de   : > { %11521 = vmatmul.mubr.msk.f32.gmra.mrb[14].mxu1 %vm1131_vm5, %v13802_v55 }
 0x1df   : > { %11523 = vmatprep.mubr.msk.f32.mxu1 %vm1131_vm5, %v13806_v21 }
 0x1e2   : > { %11524 = vmatmul.mubr.msk.f32.gmra.mrb[16].mxu1 %vm1131_vm5, %v13810_v17 }
 0x1e3   : > { %11526 = vmatprep.mubr.msk.f32.mxu1 %vm1131_vm5, %v13814_v24 }
 0x1e6   : > { %11527 = vmatmul.mubr.msk.f32.gmra.mrb[18].mxu1 %vm1131_vm5, %v13818_v62 }
 0x1e7   : > { %11535 = vmatprep.mubr.msk.f32.mxu1 %vm1131_vm5, %v1928_v2  ;;  %v13874_v2 = vld [vmem:[#allocation2 + $0x2d] sm:$0xff] }
 0x1ea   : > { %11536 = vmatmul.mubr.msk.f32.vlgmr.msra.gmra.mrb[8].mxu1 %vm1131_vm5, %v1929_v19  ;;  %v13887_v19 = vld [vmem:[#allocation2 + $0x45] sm:$0xff] }
 0x1eb   : > { %12046 = vmatpush3.bf16.msra.mxu1 %v12043_v52  ;;  %11538 = vmatprep.mubr.msk.f32.mxu1 %vm1131_vm5, %v13785_v18  ;;  %v13891_v52 = vld [vmem:[#allocation2 + $0x4d] sm:$0xff] }
 0x1ec   : > { %11557 = vmatprep.subr.msk.mxu1 %vm1210_vm4, %v9984_v63 }
 0x1ee   : > { %11539 = vmatmul.mubr.msk.f32.gmra.mrb[10].mxu1 %vm1131_vm5, %v13789_v36 }
 0x1ef   : > { %11541 = vmatprep.mubr.msk.f32.mxu1 %vm1131_vm5, %v13794_v37  ;;  %11558 = vmatpush3.msk.msra.mxu1 %vm1210_vm4, %v9984_v63  ;;  %v13895_v63 = vld [vmem:[#allocation2 + $0x55] sm:$0xff] }
 0x1f0   : > { %12048 = vmatprep.subr.bf16.mxu1 %v12047_v38 }
 0x1f2   : > { %11542 = vmatmul.mubr.msk.f32.gmra.mrb[12].mxu1 %vm1131_vm5, %v13798_v54 }
 0x1f3   : > { %11544 = vmatprep.mubr.msk.f32.mxu1 %vm1131_vm5, %v13802_v55 }
 0x1f6   : > { %11545 = vmatmul.mubr.msk.f32.gmra.mrb[14].mxu1 %vm1131_vm5, %v13806_v21 }
 0x1f7   : > { %11547 = vmatprep.mubr.msk.f32.mxu1 %vm1131_vm5, %v13810_v17 }
 0x1fa   : > { %11548 = vmatmul.mubr.msk.f32.gmra.mrb[16].mxu1 %vm1131_vm5, %v13814_v24 }
 0x1fb   : > { %11550 = vmatprep.mubr.msk.f32.mxu1 %vm1131_vm5, %v13818_v62 }
 0x1fe   : > { %11551 = vmatmul.mubr.msk.f32.gmra.mrb[18].mxu1 %vm1131_vm5, %v13853_v6 }
 0x1ff   : > { %11559 = vmatprep.mubr.msk.f32.mxu1 %vm1131_vm5, %v2311_v7  ;;  %v2504_v7 = vld [vmem:[#allocation2 + $0x16] sm:$0xff] }
 0x202   : > { %11560 = vmatmul.mubr.msk.f32.vlgmr.msra.gmra.mrb[8].mxu1 %vm1131_vm5, %v2312_v0  ;;  %v10016_v0 = vld [vmem:[%s16414_s3 + $0xd0] sm:$0xf] }
 0x203   : > { %12050 = vmatpush3.bf16.msra.mxu1 %v12047_v38  ;;  %11562 = vmatprep.mubr.msk.f32.mxu1 %vm1131_vm5, %v2313_v11  ;;  %v2503_v38 = vld [vmem:[#allocation2 + $0xe] sm:$0xff] }
 0x204   : > { %11581 = vmatprep.subr.msk.mxu1 %vm1210_vm4, %v10000_v9 }
 0x206   : > { %11563 = vmatmul.mubr.msk.f32.gmra.mrb[10].mxu1 %vm1131_vm5, %v13870_v46 }
 0x207   : > { %11565 = vmatprep.mubr.msk.f32.mxu1 %vm1131_vm5, %v13874_v2  ;;  %11582 = vmatpush3.msk.msra.mxu1 %vm1210_vm4, %v10000_v9  ;;  %v10030_v9 = vld [vmem:[%s16414_s3 + $0xd8] sm:$0xff] }
 0x208   : > { %12052 = vmatprep.subr.bf16.mxu1 %v12051_v26  ;;  %v12055_v11 = vpack.c.bf16 %v10031_v41, %v10030_v9  ;;  %v13937_v9 = vld [vmem:[#allocation2 + $0x46] sm:$0xff]  ;;  %v13941_v41 = vld [vmem:[#allocation2 + $0x4e] sm:$0xff] }
 0x209   : > { %16462 = vst [vmem:[#allocation11_spill] sm:$0xff] %v13937_v9  ;;  %16463 = vst [vmem:[#allocation12_spill] sm:$0xff] %v13941_v41 }
 0x20a   : > { %11566 = vmatmul.mubr.msk.f32.gmra.mrb[12].mxu1 %vm1131_vm5, %v13879_v39 }
 0x20b   : > { %11568 = vmatprep.mubr.msk.f32.mxu1 %vm1131_vm5, %v13883_v57 }
 0x20e   : > { %11569 = vmatmul.mubr.msk.f32.gmra.mrb[14].mxu1 %vm1131_vm5, %v13887_v19 }
 0x20f   : > { %11571 = vmatprep.mubr.msk.f32.mxu1 %vm1131_vm5, %v13891_v52 }
 0x212   : > { %11572 = vmatmul.mubr.msk.f32.gmra.mrb[16].mxu1 %vm1131_vm5, %v13895_v63 }
 0x213   : > { %11574 = vmatprep.mubr.msk.f32.mxu1 %vm1131_vm5, %v13899_v44 }
 0x216   : > { %11575 = vmatmul.mubr.msk.f32.gmra.mrb[18].mxu1 %vm1131_vm5, %v13903_v42  ;;  %v13924_v42 = vld [vmem:[#allocation2 + $0x2e] sm:$0xff] }
 0x217   : > { %11583 = vmatprep.mubr.msk.f32.mxu1 %vm1131_vm5, %v2503_v38  ;;  %v13920_v38 = vld [vmem:[#allocation2 + $0x26] sm:$0xff]  ;;  %16459 = vst [vmem:[#allocation8_spill] sm:$0xff] %v13924_v42 }
 0x218   : > { %16458 = vst [vmem:[#allocation7_spill] sm:$0xff] %v13920_v38 }
 0x21a   : > { %11584 = vmatmul.mubr.msk.f32.vlgmr.msra.gmra.mrb[8].mxu1 %vm1131_vm5, %v2504_v7  ;;  %v13929_v7 = vld [vmem:[#allocation2 + $0x36] sm:$0xff] }
 0x21b   : > { %12054 = vmatpush3.bf16.msra.mxu1 %v12051_v26  ;;  %11586 = vmatprep.mubr.msk.f32.mxu1 %vm1131_vm5, %v2505_v1  ;;  %16460 = vst [vmem:[#allocation9_spill] sm:$0xff] %v13929_v7  ;;  %v13933_v26 = vld [vmem:[#allocation2 + $0x3e] sm:$0xff] }
 0x21c   : > { %11605 = vmatprep.subr.msk.mxu1 %vm1210_vm4, %v10016_v0  ;;  %16461 = vst [vmem:[#allocation10_spill] sm:$0xff] %v13933_v26  ;;  %v13949_v1 = vld [vmem:[#allocation2 + $0x5e] sm:$0xff] }
 0x21d   : > { %16465 = vst [vmem:[#allocation14_spill] sm:$0xff] %v13949_v1 }
 0x21e   : > { %11587 = vmatmul.mubr.msk.f32.gmra.mrb[10].mxu1 %vm1131_vm5, %v13920_v38  ;;  %v13974_v38 = vld [vmem:[#allocation2 + $0x2f] sm:$0xff] }
 0x21f   : > { %11589 = vmatprep.mubr.msk.f32.mxu1 %vm1131_vm5, %v13924_v42  ;;  %11606 = vmatpush3.msk.msra.mxu1 %vm1210_vm4, %v10016_v0  ;;  %v13945_v0 = vld [vmem:[#allocation2 + $0x56] sm:$0xff]  ;;  %v2697_v42 = vld [vmem:[#allocation2 + $0x1f] sm:$0xff] }
 0x220   : > { %12056 = vmatprep.subr.bf16.mxu1 %v12055_v11  ;;  %16464 = vst [vmem:[#allocation13_spill] sm:$0xff] %v13945_v0 }
 0x222   : > { %11590 = vmatmul.mubr.msk.f32.gmra.mrb[12].mxu1 %vm1131_vm5, %v13929_v7  ;;  %v2696_v7 = vld [vmem:[#allocation2 + $0x17] sm:$0xff] }
 0x223   : > { %11592 = vmatprep.mubr.msk.f32.mxu1 %vm1131_vm5, %v13933_v26  ;;  %v13953_v26 = vld [vmem:[#allocation2 + $0x66] sm:$0xff] }
 0x224   : > { %16466 = vst [vmem:[#allocation15_spill] sm:$0xff] %v13953_v26 }
 0x226   : > { %11593 = vmatmul.mubr.msk.f32.gmra.mrb[14].mxu1 %vm1131_vm5, %v13937_v9  ;;  %v2695_v9 = vld [vmem:[#allocation2 + $0xf] sm:$0xff] }
 0x227   : > { %11595 = vmatprep.mubr.msk.f32.mxu1 %vm1131_vm5, %v13941_v41  ;;  %v10032_v41 = vld [vmem:[%s16414_s3 + $0xe8] sm:$0xf] }
 0x22a   : > { %11596 = vmatmul.mubr.msk.f32.gmra.mrb[16].mxu1 %vm1131_vm5, %v13945_v0  ;;  %v10046_v0 = vld [vmem:[%s16414_s3 + $0xf0] sm:$0xff] }
 0x22b   : > { %11598 = vmatprep.mubr.msk.f32.mxu1 %vm1131_vm5, %v13949_v1  ;;  %v10047_v1 = vld [vmem:[%s16414_s3 + $0xf8] sm:$0xff] }
 0x22e   : > { %11599 = vmatmul.mubr.msk.f32.gmra.mrb[18].mxu1 %vm1131_vm5, %v13953_v26  ;;  %v13970_v26 = vld [vmem:[#allocation2 + $0x27] sm:$0xff] }
 0x22f   : > { %11607 = vmatprep.mubr.msk.f32.mxu1 %vm1131_vm5, %v2695_v9  ;;  %v12059_v9 = vpack.c.bf16 %v10047_v1, %v10046_v0  ;;  %v13991_v0 = vld [vmem:[#allocation2 + $0x4f] sm:$0xff]  ;;  %v13999_v1 = vld [vmem:[#allocation2 + $0x5f] sm:$0xff] }
 0x230   : > { %16468 = vst [vmem:[#allocation17_spill] sm:$0xff] %v13991_v0  ;;  %16470 = vst [vmem:[#allocation19_spill] sm:$0xff] %v13999_v1 }
 0x232   : > { %11608 = vmatmul.mubr.msk.f32.vlgmr.msra.gmra.mrb[8].mxu1 %vm1131_vm5, %v2696_v7  ;;  %v13979_v7 = vld [vmem:[#allocation2 + $0x37] sm:$0xff] }
 0x233   : > { %12058 = vmatpush3.bf16.msra.mxu1 %v12055_v11  ;;  %11610 = vmatprep.mubr.msk.f32.mxu1 %vm1131_vm5, %v2697_v42  ;;  %v13983_v42 = vld [vmem:[#allocation2 + $0x3f] sm:$0xff]  ;;  %v13987_v11 = vld [vmem:[#allocation2 + $0x47] sm:$0xff] }
 0x234   : > { %11629 = vmatprep.subr.msk.mxu1 %vm1210_vm4, %v10032_v41  ;;  %16467 = vst [vmem:[#allocation16_spill] sm:$0xff] %v13983_v42 }
 0x236   : > { %11611 = vmatmul.mubr.msk.f32.gmra.mrb[10].mxu1 %vm1131_vm5, %v13970_v26 }
 0x237   : > { %11613 = vmatprep.mubr.msk.f32.mxu1 %vm1131_vm5, %v13974_v38  ;;  %11630 = vmatpush3.msk.msra.mxu1 %vm1210_vm4, %v10032_v41  ;;  %v13995_v41 = vld [vmem:[#allocation2 + $0x57] sm:$0xff] }
 0x238   : > { %12060 = vmatprep.subr.bf16.mxu1 %v12059_v9  ;;  %16469 = vst [vmem:[#allocation18_spill] sm:$0xff] %v13995_v41 }
 0x23a   : > { %11614 = vmatmul.mubr.msk.f32.gmra.mrb[12].mxu1 %vm1131_vm5, %v13979_v7 }
 0x23b   : > { %11616 = vmatprep.mubr.msk.f32.mxu1 %vm1131_vm5, %v13983_v42  ;;  %v14003_v42 = vld [vmem:[#allocation2 + $0x67] sm:$0xff] }
 0x23c   : > { %16471 = vst [vmem:[#allocation20_spill] sm:$0xff] %v14003_v42 }
 0x23e   : > { %11617 = vmatmul.mubr.msk.f32.gmra.mrb[14].mxu1 %vm1131_vm5, %v13987_v11 }
 0x23f   : > { %11619 = vmatprep.mubr.msk.f32.mxu1 %vm1131_vm5, %v13991_v0  ;;  %v10048_v0 = vld [vmem:[%s16414_s3 + $0x100] sm:$0xf] }
 0x242   : > { %11620 = vmatmul.mubr.msk.f32.gmra.mrb[16].mxu1 %vm1131_vm5, %v13995_v41  ;;  %v10062_v41 = vld [vmem:[%s16414_s3 + $0x108] sm:$0xff] }
 0x243   : > { %11622 = vmatprep.mubr.msk.f32.mxu1 %vm1131_vm5, %v13999_v1  ;;  %v10063_v1 = vld [vmem:[%s16414_s3 + $0x110] sm:$0xff] }
 0x246   : > { %11623 = vmatmul.mubr.msk.f32.gmra.mrb[18].mxu1 %vm1131_vm5, %v14003_v42  ;;  %v10079_v42 = vld [vmem:[%s16414_s3 + $0x128] sm:$0xff] }
 0x247   : > { %11631 = vmatprep.mubr.msk.f32.mxu1 %vm1131_vm5, %v13574_v8  ;;  %v12063_v8 = vpack.c.bf16 %v10063_v1, %v10062_v41  ;;  %v10064_v41 = vld [vmem:[%s16414_s3 + $0x118] sm:$0xf]  ;;  %v10078_v1 = vld [vmem:[%s16414_s3 + $0x120] sm:$0xff] }
 0x24a   : > { %11632 = vmatmul.mubr.msk.f32.vlgmr.msra.gmra.mrb[8].mxu1 %vm1131_vm5, %v13583_v25 }
 0x24b   : > { %12062 = vmatpush3.bf16.msra.mxu1 %v12059_v9  ;;  %11634 = vmatprep.mubr.msk.f32.mxu1 %vm1131_vm5, %v13589_v20  ;;  %v14038_v9 = vld [vmem:[#allocation2 + $0x60] sm:$0xff] }
 0x24c   : > { %11653 = vmatprep.subr.msk.mxu1 %vm1210_vm4, %v10048_v0 }
 0x24e   : > { %11635 = vmatmul.mubr.msk.f32.gmra.mrb[10].mxu1 %vm1131_vm5, %v13594_v22 }
 0x24f   : > { %11637 = vmatprep.mubr.msk.f32.mxu1 %vm1131_vm5, %v13598_v13  ;;  %11654 = vmatpush3.msk.msra.mxu1 %vm1210_vm4, %v10048_v0  ;;  %v14042_v0 = vld [vmem:[#allocation2 + $0x68] sm:$0xff] }
 0x250   : > { %12064 = vmatprep.subr.bf16.mxu1 %v12063_v8 }
 0x252   : > { %11638 = vmatmul.mubr.msk.f32.gmra.mrb[12].mxu1 %vm1131_vm5, %v13602_v53 }
 0x253   : > { %11640 = vmatprep.mubr.msk.f32.mxu1 %vm1131_vm5, %v13606_v58 }
 0x256   : > { %11641 = vmatmul.mubr.msk.f32.gmra.mrb[14].mxu1 %vm1131_vm5, %v13610_v40 }
 0x257   : > { %11643 = vmatprep.mubr.msk.f32.mxu1 %vm1131_vm5, %v13614_v23 }
 0x25a   : > { %11644 = vmatmul.mubr.msk.f32.gmra.mrb[16].mxu1 %vm1131_vm5, %v13618_v51 }
 0x25b   : > { %11646 = vmatprep.mubr.msk.f32.mxu1 %vm1131_vm5, %v14038_v9 }
 0x25e   : > { %11647 = vmatmul.mubr.msk.f32.gmra.mrb[18].mxu1 %vm1131_vm5, %v14042_v0 }
 0x25f   : > { %11655 = vmatprep.mubr.msk.f32.mxu1 %vm1131_vm5, %v13583_v25  ;;  %v12067_v25 = vpack.c.bf16 %v10079_v42, %v10078_v1  ;;  %v16481_v42 = vld [vmem:[#allocation15_spill] sm:$0xff] }
 0x260   : > { %v4434_v1 = vld [vmem:[#allocation2 + $0x7e] sm:$0xff] }
 0x262   : > { %11656 = vmatmul.mubr.msk.f32.vlgmr.msra.gmra.mrb[8].mxu1 %vm1131_vm5, %v13589_v20  ;;  %v14079_v20 = vld [vmem:[#allocation2 + $0x70] sm:$0xff] }
 0x263   : > { %12066 = vmatpush3.bf16.msra.mxu1 %v12063_v8  ;;  %11658 = vmatprep.mubr.msk.f32.mxu1 %vm1131_vm5, %v13594_v22  ;;  %v10080_v22 = vld [vmem:[%s16414_s3 + $0x130] sm:$0xf] }
 0x264   : > { %11677 = vmatprep.subr.msk.mxu1 %vm1210_vm4, %v10064_v41  ;;  %v4432_v8 = vld [vmem:[#allocation2 + $0x6e] sm:$0xff] }
 0x266   : > { %11659 = vmatmul.mubr.msk.f32.gmra.mrb[10].mxu1 %vm1131_vm5, %v13598_v13  ;;  %v10094_v13 = vld [vmem:[%s16414_s3 + $0x138] sm:$0xff] }
 0x267   : > { %11661 = vmatprep.mubr.msk.f32.mxu1 %vm1131_vm5, %v13602_v53  ;;  %11678 = vmatpush3.msk.msra.mxu1 %vm1210_vm4, %v10064_v41  ;;  %v10095_v53 = vld [vmem:[%s16414_s3 + $0x140] sm:$0xff]  ;;  %v4433_v41 = vld [vmem:[#allocation2 + $0x76] sm:$0xff] }
 0x268   : > { %12068 = vmatprep.subr.bf16.mxu1 %v12067_v25 }
 0x26a   : > { %11662 = vmatmul.mubr.msk.f32.gmra.mrb[12].mxu1 %vm1131_vm5, %v13606_v58  ;;  %v12071_v58 = vpack.c.bf16 %v10095_v53, %v10094_v13  ;;  %v10207_v13 = vld [vmem:[%s16414_s3 + $0x1e8] sm:$0xff] }
 0x26b   : > { %11664 = vmatprep.mubr.msk.f32.mxu1 %vm1131_vm5, %v13610_v40  ;;  %v14112_v40 = vld [vmem:[#allocation2 + $0x61] sm:$0xff]  ;;  %v16482_v53 = vld [vmem:[#allocation16_spill] sm:$0xff] }
 0x26e   : > { %11665 = vmatmul.mubr.msk.f32.gmra.mrb[14].mxu1 %vm1131_vm5, %v13614_v23  ;;  %v14116_v23 = vld [vmem:[#allocation2 + $0x69] sm:$0xff] }
 0x26f   : > { %11667 = vmatprep.mubr.msk.f32.mxu1 %vm1131_vm5, %v13618_v51  ;;  %v14120_v51 = vld [vmem:[#allocation2 + $0x71] sm:$0xff] }
 0x272   : > { %11668 = vmatmul.mubr.msk.f32.gmra.mrb[16].mxu1 %vm1131_vm5, %v14038_v9 }
 0x273   : > { %11670 = vmatprep.mubr.msk.f32.mxu1 %vm1131_vm5, %v14042_v0 }
 0x276   : > { %11671 = vmatmul.mubr.msk.f32.gmra.mrb[18].mxu1 %vm1131_vm5, %v14079_v20 }
 0x277   : > { %11679 = vmatprep.mubr.msk.f32.mxu1 %vm1131_vm5, %v13635_v5  ;;  %v10096_v5 = vld [vmem:[%s16414_s3 + $0x148] sm:$0xf] }
 0x27a   : > { %11680 = vmatmul.mubr.msk.f32.vlgmr.msra.gmra.mrb[8].mxu1 %vm1131_vm5, %v13639_v27  ;;  %v10110_v27 = vld [vmem:[%s16414_s3 + $0x150] sm:$0xff] }
 0x27b   : > { %12070 = vmatpush3.bf16.msra.mxu1 %v12067_v25  ;;  %11682 = vmatprep.mubr.msk.f32.mxu1 %vm1131_vm5, %v13644_v30  ;;  %v10111_v30 = vld [vmem:[%s16414_s3 + $0x158] sm:$0xff] }
 0x27c   : > { %11701 = vmatprep.subr.msk.mxu1 %vm1210_vm4, %v10080_v22  ;;  %v10192_v25 = vld [vmem:[%s16414_s3 + $0x1d8] sm:$0xf] }
 0x27e   : > { %11683 = vmatmul.mubr.msk.f32.gmra.mrb[10].mxu1 %vm1131_vm5, %v13648_v31  ;;  %v12075_v31 = vpack.c.bf16 %v10111_v30, %v10110_v27  ;;  %v4624_v27 = vld [vmem:[#allocation2 + $0x6f] sm:$0xff]  ;;  %v4625_v30 = vld [vmem:[#allocation2 + $0x77] sm:$0xff] }
 0x27f   : > { %11685 = vmatprep.mubr.msk.f32.mxu1 %vm1131_vm5, %v13652_v43  ;;  %11702 = vmatpush3.msk.msra.mxu1 %vm1210_vm4, %v10080_v22  ;;  %v14153_v43 = vld [vmem:[#allocation2 + $0x62] sm:$0xff] }
 0x280   : > { %12072 = vmatprep.subr.bf16.mxu1 %v12071_v58  ;;  %v10206_v22 = vld [vmem:[%s16414_s3 + $0x1e0] sm:$0xff] }
 0x282   : > { %11686 = vmatmul.mubr.msk.f32.gmra.mrb[12].mxu1 %vm1131_vm5, %v13656_v61  ;;  %v14157_v61 = vld [vmem:[#allocation2 + $0x6a] sm:$0xff] }
 0x283   : > { %11688 = vmatprep.mubr.msk.f32.mxu1 %vm1131_vm5, %v13660_v59  ;;  %v14161_v59 = vld [vmem:[#allocation2 + $0x72] sm:$0xff] }
 0x286   : > { %11689 = vmatmul.mubr.msk.f32.gmra.mrb[14].mxu1 %vm1131_vm5, %v13664_v60  ;;  %v10112_v60 = vld [vmem:[%s16414_s3 + $0x160] sm:$0xf] }
 0x287   : > { %11691 = vmatprep.mubr.msk.f32.mxu1 %vm1131_vm5, %v13668_v48  ;;  %v10126_v48 = vld [vmem:[%s16414_s3 + $0x168] sm:$0xff] }
 0x28a   : > { %11692 = vmatmul.mubr.msk.f32.gmra.mrb[16].mxu1 %vm1131_vm5, %v14112_v40 }
 0x28b   : > { %11694 = vmatprep.mubr.msk.f32.mxu1 %vm1131_vm5, %v14116_v23 }
 0x28e   : > { %11695 = vmatmul.mubr.msk.f32.gmra.mrb[18].mxu1 %vm1131_vm5, %v14120_v51 }
 0x28f   : > { %11703 = vmatprep.mubr.msk.f32.mxu1 %vm1131_vm5, %v13685_v50  ;;  %v10127_v50 = vld [vmem:[%s16414_s3 + $0x170] sm:$0xff] }
 0x292   : > { %11704 = vmatmul.mubr.msk.f32.vlgmr.msra.gmra.mrb[8].mxu1 %vm1131_vm5, %v13689_v34  ;;  %v12079_v34 = vpack.c.bf16 %v10127_v50, %v10126_v48  ;;  %v10208_v48 = vld [vmem:[%s16414_s3 + $0x1f0] sm:$0xf]  ;;  %v10222_v50 = vld [vmem:[%s16414_s3 + $0x1f8] sm:$0xff] }
 0x293   : > { %12074 = vmatpush3.bf16.msra.mxu1 %v12071_v58  ;;  %11706 = vmatprep.mubr.msk.f32.mxu1 %vm1131_vm5, %v13694_v32  ;;  %v14194_v32 = vld [vmem:[#allocation2 + $0x63] sm:$0xff]  ;;  %v16483_v58 = vld [vmem:[#allocation17_spill] sm:$0xff] }
 0x294   : > { %11725 = vmatprep.subr.msk.mxu1 %vm1210_vm4, %v10096_v5 }
 0x296   : > { %11707 = vmatmul.mubr.msk.f32.gmra.mrb[10].mxu1 %vm1131_vm5, %v13698_v16  ;;  %v14198_v16 = vld [vmem:[#allocation2 + $0x6b] sm:$0xff] }
 0x297   : > { %11709 = vmatprep.mubr.msk.f32.mxu1 %vm1131_vm5, %v13702_v3  ;;  %11726 = vmatpush3.msk.msra.mxu1 %vm1210_vm4, %v10096_v5  ;;  %v14202_v3 = vld [vmem:[#allocation2 + $0x73] sm:$0xff]  ;;  %v16485_v5 = vld [vmem:[#allocation19_spill] sm:$0xff] }
 0x298   : > { %12076 = vmatprep.subr.bf16.mxu1 %v12075_v31 }
 0x29a   : > { %11710 = vmatmul.mubr.msk.f32.gmra.mrb[12].mxu1 %vm1131_vm5, %v13706_v4  ;;  %v10128_v4 = vld [vmem:[%s16414_s3 + $0x178] sm:$0xf] }
 0x29b   : > { %11712 = vmatprep.mubr.msk.f32.mxu1 %vm1131_vm5, %v13710_v28  ;;  %v10142_v28 = vld [vmem:[%s16414_s3 + $0x180] sm:$0xff] }
 0x29e   : > { %11713 = vmatmul.mubr.msk.f32.gmra.mrb[14].mxu1 %vm1131_vm5, %v13714_v35  ;;  %v10143_v35 = vld [vmem:[%s16414_s3 + $0x188] sm:$0xff] }
 0x29f   : > { %11715 = vmatprep.mubr.msk.f32.mxu1 %vm1131_vm5, %v13718_v10  ;;  %v12083_v10 = vpack.c.bf16 %v10143_v35, %v10142_v28  ;;  %v4810_v35 = vld [vmem:[#allocation2 + $0x40] sm:$0xff] }
 0x2a2   : > { %11716 = vmatmul.mubr.msk.f32.gmra.mrb[16].mxu1 %vm1131_vm5, %v14153_v43 }
 0x2a3   : > { %11718 = vmatprep.mubr.msk.f32.mxu1 %vm1131_vm5, %v14157_v61 }
 0x2a6   : > { %11719 = vmatmul.mubr.msk.f32.gmra.mrb[18].mxu1 %vm1131_vm5, %v14161_v59 }
 0x2a7   : > { %11727 = vmatprep.mubr.msk.f32.mxu1 %vm1131_vm5, %v13735_v12  ;;  %v14237_v12 = vld [vmem:[#allocation2 + $0x6c] sm:$0xff] }
 0x2aa   : > { %11728 = vmatmul.mubr.msk.f32.vlgmr.msra.gmra.mrb[8].mxu1 %vm1131_vm5, %v13739_v56  ;;  %v14241_v56 = vld [vmem:[#allocation2 + $0x74] sm:$0xff] }
 0x2ab   : > { %12078 = vmatpush3.bf16.msra.mxu1 %v12075_v31  ;;  %11730 = vmatprep.mubr.msk.f32.mxu1 %vm1131_vm5, %v13744_v45  ;;  %v10144_v45 = vld [vmem:[%s16414_s3 + $0x190] sm:$0xf]  ;;  %v4807_v31 = vld [vmem:[#allocation2 + $0x28] sm:$0xff] }
 0x2ac   : > { %11749 = vmatprep.subr.msk.mxu1 %vm1210_vm4, %v10112_v60 }
 0x2ae   : > { %11731 = vmatmul.mubr.msk.f32.gmra.mrb[10].mxu1 %vm1131_vm5, %v13748_v29  ;;  %v10158_v29 = vld [vmem:[%s16414_s3 + $0x198] sm:$0xff] }
 0x2af   : > { %11733 = vmatprep.mubr.msk.f32.mxu1 %vm1131_vm5, %v13752_v33  ;;  %11750 = vmatpush3.msk.msra.mxu1 %vm1210_vm4, %v10112_v60  ;;  %v10159_v33 = vld [vmem:[%s16414_s3 + $0x1a0] sm:$0xff]  ;;  %v4808_v60 = vld [vmem:[#allocation2 + $0x30] sm:$0xff] }
 0x2b0   : > { %12080 = vmatprep.subr.bf16.mxu1 %v12079_v34 }
 0x2b2   : > { %11734 = vmatmul.mubr.msk.f32.gmra.mrb[12].mxu1 %vm1131_vm5, %v13756_v47  ;;  %v12087_v47 = vpack.c.bf16 %v10159_v33, %v10158_v29  ;;  %v4813_v29 = vld [vmem:[#allocation2 + $0x58] sm:$0xff]  ;;  %v5974_v33 = vld [vmem:[%s16416_s5 + $0x8] sm:$0xff] }
 0x2b3   : > { %11736 = vmatprep.mubr.msk.f32.mxu1 %vm1131_vm5, %v13760_v14  ;;  %v14278_v14 = vld [vmem:[#allocation2 + $0x7c] sm:$0xff] }
 0x2b6   : > { %11737 = vmatmul.mubr.msk.f32.gmra.mrb[14].mxu1 %vm1131_vm5, %v13764_v49  ;;  %v10160_v49 = vld [vmem:[%s16414_s3 + $0x1a8] sm:$0xf] }
 0x2b7   : > { %11739 = vmatprep.mubr.msk.f32.mxu1 %vm1131_vm5, %v13768_v15  ;;  %v10174_v15 = vld [vmem:[%s16414_s3 + $0x1b0] sm:$0xff] }
 0x2ba   : > { %11740 = vmatmul.mubr.msk.f32.gmra.mrb[16].mxu1 %vm1131_vm5, %v14194_v32 }
 0x2bb   : > { %11742 = vmatprep.mubr.msk.f32.mxu1 %vm1131_vm5, %v14198_v16 }
 0x2be   : > { %11743 = vmatmul.mubr.msk.f32.gmra.mrb[18].mxu1 %vm1131_vm5, %v14202_v3 }
 0x2bf   : > { %11751 = vmatprep.mubr.msk.f32.mxu1 %vm1131_vm5, %v13785_v18  ;;  %v10175_v18 = vld [vmem:[%s16414_s3 + $0x1b8] sm:$0xff] }
 0x2c2   : > { %11752 = vmatmul.mubr.msk.f32.vlgmr.msra.gmra.mrb[8].mxu1 %vm1131_vm5, %v13789_v36 }
 0x2c3   : > { %12082 = vmatpush3.bf16.msra.mxu1 %v12079_v34  ;;  %11754 = vmatprep.mubr.msk.f32.mxu1 %vm1131_vm5, %v13794_v37  ;;  %v10223_v34 = vld [vmem:[%s16414_s3 + $0x200] sm:$0xff] }
 0x2c4   : > { %11773 = vmatprep.subr.msk.mxu1 %vm1210_vm4, %v10128_v4  ;;  %v12103_v28 = vpack.c.bf16 %v10223_v34, %v10222_v50  ;;  %v5386_v50 = vld [vmem:[#allocation2 + $0x4a] sm:$0xff]  ;;  %v5387_v34 = vld [vmem:[#allocation2 + $0x52] sm:$0xff] }
 0x2c6   : > { %11755 = vmatmul.mubr.msk.f32.gmra.mrb[10].mxu1 %vm1131_vm5, %v13798_v54 }
 0x2c7   : > { %11757 = vmatprep.mubr.msk.f32.mxu1 %vm1131_vm5, %v13802_v55  ;;  %11774 = vmatpush3.msk.msra.mxu1 %vm1210_vm4, %v10128_v4  ;;  %v4809_v4 = vld [vmem:[#allocation2 + $0x38] sm:$0xff] }
 0x2c8   : > { %12084 = vmatprep.subr.bf16.mxu1 %v12083_v10 }
 0x2ca   : > { %11758 = vmatmul.mubr.msk.f32.gmra.mrb[12].mxu1 %vm1131_vm5, %v13806_v21 }
 0x2cb   : > { %11760 = vmatprep.mubr.msk.f32.mxu1 %vm1131_vm5, %v13810_v17 }
 0x2ce   : > { %11761 = vmatmul.mubr.msk.f32.gmra.mrb[14].mxu1 %vm1131_vm5, %v13814_v24 }
 0x2cf   : > { %11763 = vmatprep.mubr.msk.f32.mxu1 %vm1131_vm5, %v13818_v62 }
 0x2d2   : > { %11764 = vmatmul.mubr.msk.f32.gmra.mrb[16].mxu1 %vm1131_vm5, %v13853_v6 }
 0x2d3   : > { %11766 = vmatprep.mubr.msk.f32.mxu1 %vm1131_vm5, %v14237_v12 }
 0x2d6   : > { %11767 = vmatmul.mubr.msk.f32.gmra.mrb[18].mxu1 %vm1131_vm5, %v14241_v56 }
 0x2d7   : > { %11775 = vmatprep.mubr.msk.f32.mxu1 %vm1131_vm5, %v13789_v36  ;;  %v12091_v36 = vpack.c.bf16 %v10175_v18, %v10174_v15  ;;  %v5977_v18 = vld [vmem:[%s16416_s5 + $0x20] sm:$0xff] }
 0x2da   : > { %11776 = vmatmul.mubr.msk.f32.vlgmr.msra.gmra.mrb[8].mxu1 %vm1131_vm5, %v13794_v37  ;;  %v16472_v37 = vld [vmem:[#allocation6_spill] sm:$0xff] }
 0x2db   : > { %12086 = vmatpush3.bf16.msra.mxu1 %v12083_v10  ;;  %11778 = vmatprep.mubr.msk.f32.mxu1 %vm1131_vm5, %v13798_v54  ;;  %v4240_v54 = vld [vmem:[#allocation2 + $0x6d] sm:$0xff] }
 0x2dc   : > { %11797 = vmatprep.subr.msk.mxu1 %vm1210_vm4, %v10144_v45  ;;  %v4811_v10 = vld [vmem:[#allocation2 + $0x48] sm:$0xff] }
 0x2de   : > { %11779 = vmatmul.mubr.msk.f32.gmra.mrb[10].mxu1 %vm1131_vm5, %v13802_v55  ;;  %v4241_v55 = vld [vmem:[#allocation2 + $0x75] sm:$0xff] }
 0x2df   : > { %11781 = vmatprep.mubr.msk.f32.mxu1 %vm1131_vm5, %v13806_v21  ;;  %11798 = vmatpush3.msk.msra.mxu1 %vm1210_vm4, %v10144_v45  ;;  %v4242_v21 = vld [vmem:[#allocation2 + $0x7d] sm:$0xff]  ;;  %v4812_v45 = vld [vmem:[#allocation2 + $0x50] sm:$0xff] }
 0x2e0   : > { %12088 = vmatprep.subr.bf16.mxu1 %v12087_v47 }
 0x2e2   : > { %11782 = vmatmul.mubr.msk.f32.gmra.mrb[12].mxu1 %vm1131_vm5, %v13810_v17  ;;  %v16473_v17 = vld [vmem:[#allocation7_spill] sm:$0xff] }
 0x2e3   : > { %11784 = vmatprep.mubr.msk.f32.mxu1 %vm1131_vm5, %v13814_v24  ;;  %v10176_v24 = vld [vmem:[%s16414_s3 + $0x1c0] sm:$0xf] }
 0x2e6   : > { %11785 = vmatmul.mubr.msk.f32.gmra.mrb[14].mxu1 %vm1131_vm5, %v13818_v62  ;;  %v10190_v62 = vld [vmem:[%s16414_s3 + $0x1c8] sm:$0xff] }
 0x2e7   : > { %11787 = vmatprep.mubr.msk.f32.mxu1 %vm1131_vm5, %v13853_v6  ;;  %v10191_v6 = vld [vmem:[%s16414_s3 + $0x1d0] sm:$0xff] }
 0x2ea   : > { %11788 = vmatmul.mubr.msk.f32.gmra.mrb[16].mxu1 %vm1131_vm5, %v14237_v12 }
 0x2eb   : > { %11790 = vmatprep.mubr.msk.f32.mxu1 %vm1131_vm5, %v14241_v56 }
 0x2ee   : > { %11791 = vmatmul.mubr.msk.f32.gmra.mrb[18].mxu1 %vm1131_vm5, %v14278_v14 }
 0x2ef   : > { %11799 = vmatprep.mubr.msk.f32.mxu1 %vm1131_vm5, %v13870_v46  ;;  %v16474_v46 = vld [vmem:[#allocation8_spill] sm:$0xff] }
 0x2f2   : > { %11800 = vmatmul.mubr.msk.f32.vlgmr.msra.gmra.mrb[8].mxu1 %vm1131_vm5, %v13874_v2  ;;  %v16475_v2 = vld [vmem:[#allocation9_spill] sm:$0xff] }
 0x2f3   : > { %12090 = vmatpush3.bf16.msra.mxu1 %v12087_v47  ;;  %11802 = vmatprep.mubr.msk.f32.mxu1 %vm1131_vm5, %v13879_v39  ;;  %v12095_v39 = vpack.c.bf16 %v10191_v6, %v10190_v62  ;;  %v5978_v47 = vld [vmem:[%s16416_s5 + $0x28] sm:$0xff]  ;;  %v4817_v6 = vld [vmem:[#allocation2 + $0x78] sm:$0xff] }
 0x2f4   : > { %11821 = vmatprep.subr.msk.mxu1 %vm1210_vm4, %v10160_v49  ;;  %v12119_v15 = vpack.c.bf16 %v5978_v47, %v5974_v33  ;;  %v5994_v62 = vld [vmem:[%s16416_s5 + $0xa8] sm:$0xff]  ;;  %v5579_v33 = vld [vmem:[#allocation2 + $0x53] sm:$0xff]  ;;  %v5580_v47 = vld [vmem:[#allocation2 + $0x5b] sm:$0xff] }
 0x2f6   : > { %11803 = vmatmul.mubr.msk.f32.gmra.mrb[10].mxu1 %vm1131_vm5, %v13883_v57  ;;  %v16476_v57 = vld [vmem:[#allocation10_spill] sm:$0xff]  ;;  %12120 = vmatprep.subr.bf16.mxu0 %v12119_v15  ;;  %v5585_v15 = vld [vmem:[#allocation2 + $0x83] sm:$0xff] }
 0x2f7   : > { %11805 = vmatprep.mubr.msk.f32.mxu1 %vm1131_vm5, %v13887_v19  ;;  %11822 = vmatpush3.msk.msra.mxu1 %vm1210_vm4, %v10160_v49  ;;  %v16477_v19 = vld [vmem:[#allocation11_spill] sm:$0xff] }
 0x2f8   : > { %12092 = vmatprep.subr.bf16.mxu1 %v12091_v36  ;;  %v5973_v49 = vld [vmem:[%s16416_s5] sm:$0xff] }
 0x2fa   : > { %11806 = vmatmul.mubr.msk.f32.gmra.mrb[12].mxu1 %vm1131_vm5, %v13891_v52  ;;  %v16478_v52 = vld [vmem:[#allocation12_spill] sm:$0xff] }
 0x2fb   : > { %11808 = vmatprep.mubr.msk.f32.mxu1 %vm1131_vm5, %v13895_v63  ;;  %v16479_v63 = vld [vmem:[#allocation13_spill] sm:$0xff] }
 0x2fe   : > { %11809 = vmatmul.mubr.msk.f32.gmra.mrb[14].mxu1 %vm1131_vm5, %v13899_v44  ;;  %v16480_v44 = vld [vmem:[#allocation14_spill] sm:$0xff] }
 0x2ff   : > { %11811 = vmatprep.mubr.msk.f32.mxu1 %vm1131_vm5, %v16472_v37  ;;  %v5986_v37 = vld [vmem:[%s16416_s5 + $0x68] sm:$0xff] }
 0x302   : > { %11812 = vmatmul.mubr.msk.f32.gmra.mrb[16].mxu1 %vm1131_vm5, %v4240_v54  ;;  %v12121_v54 = vpack.c.bf16 %v5977_v18, %v5973_v49  ;;  %v5584_v49 = vld [vmem:[#allocation2 + $0x7b] sm:$0xff]  ;;  %v5586_v18 = vld [vmem:[#allocation2 + $0x8b] sm:$0xff] }
 0x303   : > { %11814 = vmatprep.mubr.msk.f32.mxu1 %vm1131_vm5, %v4241_v55 }
 0x304   : > { %12122 = vmatpush1.bf16.msra.mxu0 %v12121_v54  ;;  %v5772_v54 = vld [vmem:[#allocation2 + $0x5c] sm:$0xff] }
 0x306   : > { %11815 = vmatmul.mubr.msk.f32.gmra.mrb[18].mxu1 %vm1131_vm5, %v4242_v21  ;;  %v5981_v21 = vld [vmem:[%s16416_s5 + $0x40] sm:$0xff] }
 0x307   : > { %11823 = vmatprep.mubr.msk.f32.mxu1 %vm1131_vm5, %v16473_v17  ;;  %v5985_v17 = vld [vmem:[%s16416_s5 + $0x60] sm:$0xff] }
 0x30a   : > { %11824 = vmatmul.mubr.msk.f32.vlgmr.msra.gmra.mrb[8].mxu1 %vm1131_vm5, %v16474_v46  ;;  %v12125_v46 = vpack.c.bf16 %v5985_v17, %v5981_v21  ;;  %v5777_v21 = vld [vmem:[#allocation2 + $0x84] sm:$0xff]  ;;  %v5778_v17 = vld [vmem:[#allocation2 + $0x8c] sm:$0xff] }
 0x30b   : > { %12094 = vmatpush3.bf16.msra.mxu1 %v12091_v36  ;;  %11826 = vmatprep.mubr.msk.f32.mxu1 %vm1131_vm5, %v16475_v2  ;;  %v5982_v36 = vld [vmem:[%s16416_s5 + $0x48] sm:$0xff] }
 0x30c   : > { %11845 = vmatprep.subr.msk.mxu1 %vm1210_vm4, %v10176_v24  ;;  %v12123_v55 = vpack.c.bf16 %v5986_v37, %v5982_v36  ;;  %v5767_v36 = vld [vmem:[#allocation2 + $0x34] sm:$0xff]  ;;  %v5768_v37 = vld [vmem:[#allocation2 + $0x3c] sm:$0xff] }
 0x30e   : > { %11827 = vmatmul.mubr.msk.f32.gmra.mrb[10].mxu1 %vm1131_vm5, %v16476_v57  ;;  %12124 = vmatprep.subr.bf16.mxu0 %v12123_v55  ;;  %v5993_v57 = vld [vmem:[%s16416_s5 + $0xa0] sm:$0xff] }
 0x30f   : > { %11829 = vmatprep.mubr.msk.f32.mxu1 %vm1131_vm5, %v16477_v19  ;;  %11846 = vmatpush3.msk.msra.mxu1 %vm1210_vm4, %v10176_v24  ;;  %v5990_v24 = vld [vmem:[%s16416_s5 + $0x88] sm:$0xff]  ;;  %v4818_v19 = vld [vmem:[#allocation2 + $0x80] sm:$0xff] }
 0x310   : > { %12096 = vmatprep.subr.bf16.mxu1 %v12095_v39  ;;  %v12127_v2 = vpack.c.bf16 %v5994_v62, %v5990_v24  ;;  %12126 = vmatpush1.bf16.msra.mxu0 %v12125_v46  ;;  %v5773_v55 = vld [vmem:[#allocation2 + $0x64] sm:$0xff]  ;;  %v5976_v24 = vld [vmem:[%s16416_s5 + $0x18] sm:$0xff] }
 0x312   : > { %11830 = vmatmul.mubr.msk.f32.gmra.mrb[12].mxu1 %vm1131_vm5, %v16478_v52  ;;  %12128 = vmatprep.subr.bf16.mxu0 %v12127_v2 }
 0x313   : > { %11832 = vmatprep.mubr.msk.f32.mxu1 %vm1131_vm5, %v16479_v63  ;;  %v10224_v63 = vld [vmem:[%s16414_s3 + $0x208] sm:$0xf] }
 0x316   : > { %11833 = vmatmul.mubr.msk.f32.gmra.mrb[14].mxu1 %vm1131_vm5, %v16480_v44  ;;  %v10238_v44 = vld [vmem:[%s16414_s3 + $0x210] sm:$0xff] }
 0x317   : > { %11835 = vmatprep.mubr.msk.f32.mxu1 %vm1131_vm5, %v16481_v42  ;;  %v10239_v42 = vld [vmem:[%s16414_s3 + $0x218] sm:$0xff] }
 0x31a   : > { %11836 = vmatmul.mubr.msk.f32.gmra.mrb[16].mxu1 %vm1131_vm5, %v4432_v8  ;;  %v5998_v8 = vld [vmem:[%s16416_s5 + $0xc8] sm:$0x3] }
 0x31b   : > { %11838 = vmatprep.mubr.msk.f32.mxu1 %vm1131_vm5, %v4433_v41  ;;  %v5997_v41 = vld [vmem:[%s16416_s5 + $0xc0] sm:$0x3] }
 0x31e   : > { %11839 = vmatmul.mubr.msk.f32.gmra.mrb[18].mxu1 %vm1131_vm5, %v4434_v1  ;;  %v12107_v1 = vpack.c.bf16 %v10239_v42, %v10238_v44 }
 0x31f   : > { %11847 = vmatprep.mubr.msk.f32.mxu1 %vm1131_vm5, %v13970_v26  ;;  %v12099_v26 = vpack.c.bf16 %v10207_v13, %v10206_v22  ;;  %v5191_v22 = vld [vmem:[#allocation2 + $0x31] sm:$0xff]  ;;  %v5192_v13 = vld [vmem:[#allocation2 + $0x39] sm:$0xff] }
 0x322   : > { %11848 = vmatmul.mubr.msk.f32.vlgmr.msra.gmra.mrb[8].mxu1 %vm1131_vm5, %v13974_v38  ;;  %v16484_v38 = vld [vmem:[#allocation18_spill] sm:$0xff] }
 0x323   : > { %12098 = vmatpush3.bf16.msra.mxu1 %v12095_v39  ;;  %11850 = vmatprep.mubr.msk.f32.mxu1 %vm1131_vm5, %v13979_v7  ;;  %v16486_v7 = vld [vmem:[#allocation20_spill] sm:$0xff]  ;;  %v5989_v39 = vld [vmem:[%s16416_s5 + $0x80] sm:$0xff] }
 0x324   : > { %11869 = vmatprep.subr.msk.mxu1 %vm1210_vm4, %v10192_v25  ;;  %v12129_v52 = vpack.c.bf16 %v5993_v57, %v5989_v39 }
 0x326   : > { %11851 = vmatmul.mubr.msk.f32.gmra.mrb[10].mxu1 %vm1131_vm5, %v16482_v53  ;;  %12130 = vmatpush1.bf16.msra.mxu0 %v12129_v52 }
 0x327   : > { %11853 = vmatprep.mubr.msk.f32.mxu1 %vm1131_vm5, %v13987_v11  ;;  %11870 = vmatpush3.msk.msra.mxu1 %vm1210_vm4, %v10192_v25  ;;  %v4626_v11 = vld [vmem:[#allocation2 + $0x7f] sm:$0xff]  ;;  %v5010_v25 = vld [vmem:[#allocation2 + $0x88] sm:$0xff] }
 0x328   : > { %12100 = vmatprep.subr.bf16.mxu1 %v12099_v26  ;;  %10286 = vmatprep.subr.msk.mxu0 %vm6005_vm6, %v5998_v8 }
 0x32a   : > { %11854 = vmatmul.mubr.msk.f32.gmra.mrb[12].mxu1 %vm1131_vm5, %v16483_v58  ;;  %10287 = vmatpush1.msk.msra.mxu0 %vm6005_vm6, %v5997_v41  ;;  %v5194_v58 = vld [vmem:[#allocation2 + $0x49] sm:$0xff] }
 0x32b   : > { %11856 = vmatprep.mubr.msk.f32.mxu1 %vm1131_vm5, %v16484_v38  ;;  %v5195_v38 = vld [vmem:[#allocation2 + $0x51] sm:$0xff] }
 0x32e   : > { %11857 = vmatmul.mubr.msk.f32.gmra.mrb[14].mxu1 %vm1131_vm5, %v16485_v5  ;;  %v5196_v5 = vld [vmem:[#allocation2 + $0x59] sm:$0xff] }
 0x32f   : > { %11859 = vmatprep.mubr.msk.f32.mxu1 %vm1131_vm5, %v16486_v7  ;;  %v5200_v7 = vld [vmem:[#allocation2 + $0x79] sm:$0xff] }
 0x332   : > { %11860 = vmatmul.mubr.msk.f32.gmra.mrb[16].mxu1 %vm1131_vm5, %v4624_v27  ;;  %v5201_v27 = vld [vmem:[#allocation2 + $0x81] sm:$0xff] }
 0x333   : > { %11862 = vmatprep.mubr.msk.f32.mxu1 %vm1131_vm5, %v4625_v30  ;;  %v5202_v30 = vld [vmem:[#allocation2 + $0x89] sm:$0xff] }
 0x336   : > { %11863 = vmatmul.mubr.msk.f32.gmra.mrb[18].mxu1 %vm1131_vm5, %v4626_v11  ;;  %v5383_v11 = vld [vmem:[#allocation2 + $0x32] sm:$0xff] }
 0x337   : > { %11871 = vmatprep.mubr.msk.f32.mxu1 %vm1131_vm5, %v4807_v31  ;;  %v5384_v31 = vld [vmem:[#allocation2 + $0x3a] sm:$0xff] }
 0x33a   : > { %11872 = vmatmul.mubr.msk.f32.vlgmr.msra.gmra.mrb[8].mxu1 %vm1131_vm5, %v4808_v60 }
 0x33b   : > { %12102 = vmatpush3.bf16.msra.mxu1 %v12099_v26  ;;  %11874 = vmatprep.mubr.msk.f32.mxu1 %vm1131_vm5, %v4809_v4  ;;  %v5193_v26 = vld [vmem:[#allocation2 + $0x41] sm:$0xff] }
 0x33c   : > { %11893 = vmatprep.subr.msk.mxu1 %vm1210_vm4, %v10208_v48 }
 0x33e   : > { %11875 = vmatmul.mubr.msk.f32.gmra.mrb[10].mxu1 %vm1131_vm5, %v4810_v35 }
 0x33f   : > { %11877 = vmatprep.mubr.msk.f32.mxu1 %vm1131_vm5, %v4811_v10  ;;  %11894 = vmatpush3.msk.msra.mxu1 %vm1210_vm4, %v10208_v48 }
 0x340   : > { %12104 = vmatprep.subr.bf16.mxu1 %v12103_v28 }
 0x342   : > { %11878 = vmatmul.mubr.msk.f32.gmra.mrb[12].mxu1 %vm1131_vm5, %v4812_v45 }
 0x343   : > { %11880 = vmatprep.mubr.msk.f32.mxu1 %vm1131_vm5, %v4813_v29 }
 0x346   : > { %11881 = vmatmul.mubr.msk.f32.gmra.mrb[14].mxu1 %vm1131_vm5, %v14038_v9 }
 0x347   : > { %11883 = vmatprep.mubr.msk.f32.mxu1 %vm1131_vm5, %v14042_v0 }
 0x34a   : > { %11884 = vmatmul.mubr.msk.f32.gmra.mrb[16].mxu1 %vm1131_vm5, %v14079_v20 }
 0x34b   : > { %11886 = vmatprep.mubr.msk.f32.mxu1 %vm1131_vm5, %v4817_v6 }
 0x34e   : > { %11887 = vmatmul.mubr.msk.f32.gmra.mrb[18].mxu1 %vm1131_vm5, %v4818_v19 }
 0x34f   : > { %11895 = vmatprep.mubr.msk.f32.mxu1 %vm1131_vm5, %v4808_v60  ;;  %v5385_v60 = vld [vmem:[#allocation2 + $0x42] sm:$0xff] }
 0x352   : > { %11896 = vmatmul.mubr.msk.f32.vlgmr.msra.gmra.mrb[8].mxu1 %vm1131_vm5, %v4809_v4  ;;  %v5388_v4 = vld [vmem:[#allocation2 + $0x5a] sm:$0xff] }
 0x353   : > { %12106 = vmatpush3.bf16.msra.mxu1 %v12103_v28  ;;  %11898 = vmatprep.mubr.msk.f32.mxu1 %vm1131_vm5, %v4810_v35  ;;  %v5392_v28 = vld [vmem:[#allocation2 + $0x7a] sm:$0xff]  ;;  %v5393_v35 = vld [vmem:[#allocation2 + $0x82] sm:$0xff] }
 0x354   : > { %11917 = vmatprep.subr.msk.mxu1 %vm1210_vm4, %v10224_v63 }
 0x356   : > { %11899 = vmatmul.mubr.msk.f32.gmra.mrb[10].mxu1 %vm1131_vm5, %v4811_v10  ;;  %v5394_v10 = vld [vmem:[#allocation2 + $0x8a] sm:$0xff] }
 0x357   : > { %11901 = vmatprep.mubr.msk.f32.mxu1 %vm1131_vm5, %v4812_v45  ;;  %11918 = vmatpush3.msk.msra.mxu1 %vm1210_vm4, %v10224_v63  ;;  %v5575_v45 = vld [vmem:[#allocation2 + $0x33] sm:$0xff] }
 0x358   : > { %12108 = vmatprep.subr.bf16.mxu1 %v12107_v1 }
 0x35a   : > { %11902 = vmatmul.mubr.msk.f32.gmra.mrb[12].mxu1 %vm1131_vm5, %v4813_v29  ;;  %v5576_v29 = vld [vmem:[#allocation2 + $0x3b] sm:$0xff] }
 0x35b   : > { %11904 = vmatprep.mubr.msk.f32.mxu1 %vm1131_vm5, %v14038_v9  ;;  %v10240_v9 = vld [vmem:[%s16414_s3 + $0x220] sm:$0xf] }
 0x35e   : > { %11905 = vmatmul.mubr.msk.f32.gmra.mrb[14].mxu1 %vm1131_vm5, %v14042_v0  ;;  %v10254_v0 = vld [vmem:[%s16414_s3 + $0x228] sm:$0xff] }
 0x35f   : > { %11907 = vmatprep.mubr.msk.f32.mxu1 %vm1131_vm5, %v14079_v20  ;;  %v10255_v20 = vld [vmem:[%s16414_s3 + $0x230] sm:$0xff] }
 0x360   : > { %v12111_v53 = vpack.c.bf16 %v10255_v20, %v10254_v0  ;;  %v5988_v0 = vld [vmem:[%s16416_s5 + $0x78] sm:$0xff] }
 0x362   : > { %11908 = vmatmul.mubr.msk.f32.gmra.mrb[16].mxu1 %vm1131_vm5, %v4817_v6 }
 0x363   : > { %11910 = vmatprep.mubr.msk.f32.mxu1 %vm1131_vm5, %v4818_v19 }
 0x366   : > { %11911 = vmatmul.mubr.msk.f32.gmra.mrb[18].mxu1 %vm1131_vm5, %v5010_v25  ;;  %v5979_v25 = vld [vmem:[%s16416_s5 + $0x30] sm:$0xff] }
 0x367   : > { %11919 = vmatprep.mubr.msk.f32.mxu1 %vm1131_vm5, %v5191_v22 }
 0x36a   : > { %11920 = vmatmul.mubr.msk.f32.vlgmr.msra.gmra.mrb[8].mxu1 %vm1131_vm5, %v5192_v13 }
 0x36b   : > { %12110 = vmatpush3.bf16.msra.mxu1 %v12107_v1  ;;  %11922 = vmatprep.mubr.msk.f32.mxu1 %vm1131_vm5, %v5193_v26  ;;  %v5975_v1 = vld [vmem:[%s16416_s5 + $0x10] sm:$0xff] }
 0x36c   : > { %11941 = vmatprep.subr.msk.mxu1 %vm1210_vm4, %v10240_v9 }
 0x36e   : > { %11923 = vmatmul.mubr.msk.f32.gmra.mrb[10].mxu1 %vm1131_vm5, %v5194_v58 }
 0x36f   : > { %11925 = vmatprep.mubr.msk.f32.mxu1 %vm1131_vm5, %v5195_v38  ;;  %11942 = vmatpush3.msk.msra.mxu1 %vm1210_vm4, %v10240_v9  ;;  %v5984_v9 = vld [vmem:[%s16416_s5 + $0x58] sm:$0xff] }
 0x370   : > { %12112 = vmatprep.subr.bf16.mxu1 %v12111_v53 }
 0x372   : > { %11926 = vmatmul.mubr.msk.f32.gmra.mrb[12].mxu1 %vm1131_vm5, %v5196_v5  ;;  %v12133_v5 = vpack.c.bf16 %v5979_v25, %v5975_v1 }
 0x373   : > { %11928 = vmatprep.mubr.msk.f32.mxu1 %vm1131_vm5, %v14112_v40  ;;  %v10256_v40 = vld [vmem:[%s16414_s3 + $0x238] sm:$0xf] }
 0x376   : > { %11929 = vmatmul.mubr.msk.f32.gmra.mrb[14].mxu1 %vm1131_vm5, %v14116_v23  ;;  %v10270_v23 = vld [vmem:[%s16414_s3 + $0x240] sm:$0xff] }
 0x377   : > { %11931 = vmatprep.mubr.msk.f32.mxu1 %vm1131_vm5, %v14120_v51  ;;  %v10271_v51 = vld [vmem:[%s16414_s3 + $0x248] sm:$0xff] }
 0x378   : > { %v12115_v48 = vpack.c.bf16 %v10271_v51, %v10270_v23 }
 0x37a   : > { %11932 = vmatmul.mubr.msk.f32.gmra.mrb[16].mxu1 %vm1131_vm5, %v5200_v7  ;;  %v5983_v7 = vld [vmem:[%s16416_s5 + $0x50] sm:$0xff] }
 0x37b   : > { %11934 = vmatprep.mubr.msk.f32.mxu1 %vm1131_vm5, %v5201_v27  ;;  %v5987_v27 = vld [vmem:[%s16416_s5 + $0x70] sm:$0xff] }
 0x37e   : > { %11935 = vmatmul.mubr.msk.f32.gmra.mrb[18].mxu1 %vm1131_vm5, %v5202_v30 }
 0x37f   : > { %11943 = vmatprep.mubr.msk.f32.mxu1 %vm1131_vm5, %v5383_v11 }
 0x382   : > { %11944 = vmatmul.mubr.msk.f32.vlgmr.msra.gmra.mrb[8].mxu1 %vm1131_vm5, %v5384_v31 }
 0x383   : > { %12114 = vmatpush3.bf16.msra.mxu1 %v12111_v53  ;;  %11946 = vmatprep.mubr.msk.f32.mxu1 %vm1131_vm5, %v5385_v60 }
 0x384   : > { %11965 = vmatprep.subr.msk.mxu1 %vm1210_vm4, %v10256_v40 }
 0x386   : > { %11947 = vmatmul.mubr.msk.f32.gmra.mrb[10].mxu1 %vm1131_vm5, %v5386_v50  ;;  %v5996_v50 = vld [vmem:[%s16416_s5 + $0xb8] sm:$0xff] }
 0x387   : > { %11949 = vmatprep.mubr.msk.f32.mxu1 %vm1131_vm5, %v5387_v34  ;;  %11966 = vmatpush3.msk.msra.mxu1 %vm1210_vm4, %v10256_v40  ;;  %v12135_v40 = vpack.c.bf16 %v5988_v0, %v5984_v9  ;;  %v10300_v0 = vld [vmem:[%s16416_s5 + $0x120] sm:$0xff] }
 0x388   : > { %12116 = vmatprep.subr.bf16.mxu1 %v12115_v48 }
 0x38a   : > { %11950 = vmatmul.mubr.msk.f32.gmra.mrb[12].mxu1 %vm1131_vm5, %v5388_v4 }
 0x38b   : > { %11952 = vmatprep.mubr.msk.f32.mxu1 %vm1131_vm5, %v14153_v43  ;;  %v10272_v43 = vld [vmem:[%s16414_s3 + $0x250] sm:$0xf] }
 0x38e   : > { %11953 = vmatmul.mubr.msk.f32.gmra.mrb[14].mxu1 %vm1131_vm5, %v14157_v61  ;;  %v5577_v61 = vld [vmem:[#allocation2 + $0x43] sm:$0xff] }
 0x38f   : > { %11955 = vmatprep.mubr.msk.f32.mxu1 %vm1131_vm5, %v14161_v59  ;;  %v5578_v59 = vld [vmem:[#allocation2 + $0x4b] sm:$0xff] }
 0x392   : > { %11956 = vmatmul.mubr.msk.f32.gmra.mrb[16].mxu1 %vm1131_vm5, %v5392_v28 }
 0x393   : > { %11958 = vmatprep.mubr.msk.f32.mxu1 %vm1131_vm5, %v5393_v35  ;;  %v12137_v35 = vpack.c.bf16 %v5987_v27, %v5983_v7  ;;  %v10313_v7 = vld [vmem:[%s16416_s5 + $0x188] sm:$0xff] }
 0x396   : > { %11959 = vmatmul.mubr.msk.f32.gmra.mrb[18].mxu1 %vm1131_vm5, %v5394_v10 }
 0x397   : > { %11967 = vmatprep.mubr.msk.f32.mxu1 %vm1131_vm5, %v5575_v45 }
 0x39a   : > { %11968 = vmatmul.mubr.msk.f32.vlgmr.msra.gmra.mrb[8].mxu1 %vm1131_vm5, %v5576_v29 }
 0x39b   : > { %12118 = vmatpush3.bf16.msra.mxu1 %v12115_v48  ;;  %11970 = vmatprep.mubr.msk.f32.mxu1 %vm1131_vm5, %v5577_v61  ;;  %v5992_v48 = vld [vmem:[%s16416_s5 + $0x98] sm:$0xff] }
 0x39c   : > { %11989 = vmatprep.subr.msk.mxu1 %vm1210_vm4, %v10272_v43 }
 0x39e   : > { %11971 = vmatmul.mubr.msk.f32.gmra.mrb[10].mxu1 %vm1131_vm5, %v5578_v59 }
 0x39f   : > { %11973 = vmatprep.mubr.msk.f32.mxu1 %vm1131_vm5, %v5579_v33  ;;  %11990 = vmatpush3.msk.msra.mxu1 %vm1210_vm4, %v10272_v43  ;;  %v16487_v43 = vmov 0.0  }
 0x3a2   : > { %11974 = vmatmul.mubr.msk.f32.gmra.mrb[12].mxu1 %vm1131_vm5, %v5580_v47  ;;  %v12139_v47 = vpack.c.bf16 %v5996_v50, %v5992_v48  ;;  %v10312_v48 = vld [vmem:[%s16416_s5 + $0x180] sm:$0xff] }
 0x3a3   : > { %11976 = vmatprep.mubr.msk.f32.mxu1 %vm1131_vm5, %v14194_v32  ;;  %v5769_v32 = vld [vmem:[#allocation2 + $0x44] sm:$0xff] }
 0x3a6   : > { %11977 = vmatmul.mubr.msk.f32.gmra.mrb[14].mxu1 %vm1131_vm5, %v14198_v16  ;;  %v5770_v16 = vld [vmem:[#allocation2 + $0x4c] sm:$0xff] }
 0x3a7   : > { %11979 = vmatprep.mubr.msk.f32.mxu1 %vm1131_vm5, %v14202_v3  ;;  %v5771_v3 = vld [vmem:[#allocation2 + $0x54] sm:$0xff] }
 0x3aa   : > { %11980 = vmatmul.mubr.msk.f32.gmra.mrb[16].mxu1 %vm1131_vm5, %v5584_v49  ;;  %v5991_v49 = vld [vmem:[%s16416_s5 + $0x90] sm:$0xff] }
 0x3ab   : > { %11982 = vmatprep.mubr.msk.f32.mxu1 %vm1131_vm5, %v5585_v15  ;;  %v5995_v15 = vld [vmem:[%s16416_s5 + $0xb0] sm:$0xff] }
 0x3ae   : > { %11983 = vmatmul.mubr.msk.f32.gmra.mrb[18].mxu1 %vm1131_vm5, %v5586_v18 }
 0x3af   : > { %11991 = vmatprep.mubr.msk.f32.mxu1 %vm1131_vm5, %v5767_v36 }
 0x3b2   : > { %11992 = vmatmul.mubr.msk.f32.vlgmr.msra.gmra.mrb[8].mxu1 %vm1131_vm5, %v5768_v37 }
 0x3b3   : > { %11994 = vmatprep.mubr.msk.f32.mxu1 %vm1131_vm5, %v5769_v32 }
 0x3b6   : > { %11995 = vmatmul.mubr.msk.f32.gmra.mrb[10].mxu1 %vm1131_vm5, %v5770_v16 }
 0x3b7   : > { %11997 = vmatprep.mubr.msk.f32.mxu1 %vm1131_vm5, %v5771_v3 }
 0x3ba   : > { %11998 = vmatmul.mubr.msk.f32.gmra.mrb[12].mxu1 %vm1131_vm5, %v5772_v54 }
 0x3bb   : > { %12000 = vmatprep.mubr.msk.f32.mxu1 %vm1131_vm5, %v5773_v55 }
 0x3be   : > { %12001 = vmatmul.mubr.msk.f32.gmra.mrb[14].mxu1 %vm1131_vm5, %v14237_v12  ;;  %v5980_v12 = vld [vmem:[%s16416_s5 + $0x38] sm:$0xff] }
 0x3bf   : > { %12003 = vmatprep.mubr.msk.f32.mxu1 %vm1131_vm5, %v14241_v56  ;;  %v12131_v62 = vpack.c.bf16 %v5980_v12, %v5976_v24  ;;  %v14570_v56 = vld [vmem:[%s16415_s4] ss:$0 sm:$0xff] }
 0x3c1   : > { %12132 = vmatprep.subr.bf16.mxu0 %v12131_v62  ;;  %v6000_v62 = vld [vmem:[%s16416_s5 + $0xd8] sm:$0x3] }
 0x3c2   : > { %12004 = vmatmul.mubr.msk.f32.gmra.mrb[16].mxu1 %vm1131_vm5, %v14278_v14 }
 0x3c3   : > { %12006 = vmatprep.mubr.msk.f32.mxu1 %vm1131_vm5, %v5777_v21 }
 0x3c6   : > { %12007 = vmatmul.mubr.msk.f32.gmra.mrb[18].mxu1 %vm1131_vm5, %v5778_v17  ;;  %v12141_v17 = vpack.c.bf16 %v5995_v15, %v5991_v49 }
 0x485   : > { %v11993_v14 = vpop.f32.mrb[8].mxu1 }
 0x486   : > { %v12584_v6 = vadd.f32 %v11993_v14, %v14570_v56  ;;  %v5888_v46 = vpop.f32.mrb[9].mxu1  ;;  %v10293_v14 = vld [vmem:[%s16416_s5 + $0xe8] sm:$0xff] }
 0x487   : > { %v12585_v2 = vadd.f32 %v14570_v56, %v5888_v46  ;;  %v10297_v46 = vld [vmem:[%s16416_s5 + $0x108] sm:$0xff] }
 0x488   : > { %v5965_v39 = vrot.slane %v12584_v6, 1  ;;  %v12143_v1 = vpack.c.bf16 %v10297_v46, %v10293_v14  ;;  %v10327_v14 = vld [vmem:[%s16416_s5 + $0x1c8] sm:$0xff]  ;;  %v10326_v46 = vld [vmem:[%s16416_s5 + $0x1c0] sm:$0xff] }
 0x489   : > { %v5961_v57 = vrot.slane %v12585_v2, 1  ;;  %v11996_v19 = vpop.f32.mrb[10].mxu1 }
 0x48a   : > { %v5967_v52 = vmax.f32 %v12584_v6, %v5965_v39  ;;  %v12586_v63 = vadd.f32 %v11996_v19, %v14570_v56  ;;  %v5898_v44 = vpop.f32.mrb[11].mxu1  ;;  %v10296_v39 = vld [vmem:[%s16416_s5 + $0x100] sm:$0xff] }
 0x48b   : > { %v5963_v42 = vmax.f32 %v12585_v2, %v5961_v57  ;;  %v12587_v8 = vadd.f32 %v14570_v56, %v5898_v44  ;;  %v10292_v2 = vld [vmem:[%s16416_s5 + $0xe0] sm:$0xff] }
 0x48c   : > { %v5969_v41 = vrot.slane %v5967_v52, 4  ;;  %v6849_v11 = vrot.slane %v12586_v63, 1  ;;  %v12145_v25 = vpack.c.bf16 %v10296_v39, %v10292_v2  ;;  %v10330_v2 = vld [vmem:[%s16416_s5 + $0x1e0] sm:$0xff]  ;;  %v10335_v39 = vld [vmem:[%s16416_s5 + $0x208] sm:$0xff] }
 0x48d   : > { %v6407_v22 = vrot.slane %v12587_v8, 1  ;;  %v11999_v13 = vpop.f32.mrb[12].mxu1 }
 0x48e   : > { %v5971_v20 = vmax.f32 %v5963_v42, %v5969_v41  ;;  %v12588_v26 = vadd.f32 %v11999_v13, %v14570_v56  ;;  %v5908_v53 = vpop.f32.mrb[13].mxu1  ;;  %v6851_v61 = vmax.f32 %v12586_v63, %v6849_v11  ;;  %v5999_v41 = vld [vmem:[%s16416_s5 + $0xd0] sm:$0x3] }
 0x48f   : > { %v6409_v58 = vmax.f32 %v12587_v8, %v6407_v22  ;;  %v12589_v38 = vadd.f32 %v14570_v56, %v5908_v53  ;;  %v10305_v8 = vld [vmem:[%s16416_s5 + $0x148] sm:$0xff] }
 0x490   : > { %v14596_v30 = vmax.f32 %v5971_v20, 0.0  ;;  %v7294_v31 = vrot.slane %v12588_v26, 1  ;;  %v10304_v20 = vld [vmem:[%s16416_s5 + $0x140] sm:$0xff] }
 0x491   : > { %v6411_v23 = vrot.slane %v6409_v58, 4  ;;  %v6853_v51 = vrot.slane %v12589_v38, 1  ;;  %v12002_v60 = vpop.f32.mrb[14].mxu1  ;;  %v12149_v27 = vpack.c.bf16 %v10304_v20, %v10300_v0  ;;  %v10351_v20 = vld [vmem:[%s16416_s5 + $0x288] sm:$0x3] }
 0x492   : > { %v7296_v34 = vmax.f32 %v12588_v26, %v7294_v31  ;;  %v12590_v4 = vadd.f32 %v12002_v60, %v14570_v56  ;;  %v5918_v28 = vpop.f32.mrb[15].mxu1  ;;  %10288 = vmatmul.mubr.msk.f32.vlgmr.msra.gmra.mrb[64].mxu0 %vm6001_vm7, %v14596_v30  ;;  %v10308_v60 = vld [vmem:[%s16416_s5 + $0x160] sm:$0xff] }
 0x493   : > { %v14607_v10 = vmax.f32 %v5963_v42, %v6411_v23  ;;  %v6855_v45 = vmax.f32 %v12589_v38, %v6853_v51  ;;  %v12591_v29 = vadd.f32 %v14570_v56, %v5918_v28  ;;  %12134 = vmatpush1.bf16.msra.mxu0 %v12133_v5  ;;  %6153 = vmatprep.mubr.f32.mxu0 %v16487_v43  ;;  %v10301_v42 = vld [vmem:[%s16416_s5 + $0x128] sm:$0xff] }
 0x494   : > { %v7298_v59 = vrot.slane %v7296_v34, 4  ;;  %v7740_v33 = vrot.slane %v12590_v4, 1  ;;  %12136 = vmatprep.subr.bf16.mxu0 %v12135_v40  ;;  %v12147_v26 = vpack.c.bf16 %v10305_v8, %v10301_v42  ;;  %v10309_v5 = vld [vmem:[%s16416_s5 + $0x168] sm:$0xff]  ;;  %v10334_v8 = vld [vmem:[%s16416_s5 + $0x200] sm:$0xff] }
 0x495   : > { %v6857_v18 = vrot.slane %v6855_v45, 4  ;;  %v7736_v36 = vrot.slane %v12591_v29, 1  ;;  %v12005_v37 = vpop.f32.mrb[16].mxu1  ;;  %v12151_v51 = vpack.c.bf16 %v10313_v7, %v10309_v5  ;;  %v10317_v28 = vld [vmem:[%s16416_s5 + $0x1a8] sm:$0x3]  ;;  %v10299_v45 = vld [vmem:[%s16416_s5 + $0x118] sm:$0xff] }
 0x496   : > { %v14617_v32 = vmax.f32 %v6851_v61, %v7298_v59  ;;  %v7742_v16 = vmax.f32 %v12590_v4, %v7740_v33  ;;  %v12592_v3 = vadd.f32 %v12005_v37, %v14570_v56  ;;  %v5928_v54 = vpop.f32.mrb[17].mxu1  ;;  %v12153_v4 = vpack.c.bf16 %v10312_v48, %v10308_v60  ;;  %v10303_v59 = vld [vmem:[%s16416_s5 + $0x138] sm:$0xff]  ;;  %v10302_v37 = vld [vmem:[%s16416_s5 + $0x130] sm:$0xff] }
 0x497   : > { %v14620_v55 = vmax.f32 %v6851_v61, %v6857_v18  ;;  %v7738_v21 = vmax.f32 %v12591_v29, %v7736_v36  ;;  %12138 = vmatpush1.bf16.msra.mxu0 %v12137_v35  ;;  %v12593_v12 = vadd.f32 %v14570_v56, %v5928_v54  ;;  %v10295_v35 = vld [vmem:[%s16416_s5 + $0xf8] sm:$0xff]  ;;  %v10294_v29 = vld [vmem:[%s16416_s5 + $0xf0] sm:$0xff]  ;;  %v6219_v18 = vrot.slane %v14596_v30, 2 }
 0x498   : > { %v7744_v24 = vrot.slane %v7742_v16, 4  ;;  %12140 = vmatprep.subr.bf16.mxu0 %v12139_v47  ;;  %v8623_v22 = vrot.slane %v12592_v3, 1  ;;  %v10298_v61 = vld [vmem:[%s16416_s5 + $0x110] sm:$0xff]  ;;  %v10307_v33 = vld [vmem:[%s16416_s5 + $0x158] sm:$0xff]  ;;  %v10316_v47 = vld [vmem:[%s16416_s5 + $0x1a0] sm:$0x3]  ;;  %v12155_v49 = vpack.c.bf16 %v10299_v45, %v10295_v35 }
 0x499   : > { %v12008_v6 = vpop.f32.mrb[18].mxu1  ;;  %v8181_v52 = vrot.slane %v12593_v12, 1  ;;  %v12157_v15 = vpack.c.bf16 %v10298_v61, %v10294_v29  ;;  %v12159_v36 = vpack.c.bf16 %v10307_v33, %v10303_v59  ;;  %v10306_v16 = vld [vmem:[%s16416_s5 + $0x150] sm:$0xff]  ;;  %v10315_v54 = vld [vmem:[%s16416_s5 + $0x198] sm:$0xff] }
 0x49a   : > { %v14638_v57 = vmax.f32 %v7738_v21, %v7744_v24  ;;  %v5938_v19 = vpop.f32.mrb[19].mxu1  ;;  %v12594_v63 = vadd.f32 %v12008_v6, %v14570_v56  ;;  %v8625_v11 = vmax.f32 %v12592_v3, %v8623_v22  ;;  %v10311_v3 = vld [vmem:[%s16416_s5 + $0x178] sm:$0xff]  ;;  %v10314_v24 = vld [vmem:[%s16416_s5 + $0x190] sm:$0xff]  ;;  %v10331_v6 = vld [vmem:[%s16416_s5 + $0x1e8] sm:$0xff] }
 0x49b   : > { %v12595_v44 = vadd.f32 %v14570_v56, %v5938_v19  ;;  %12142 = vmatpush1.bf16.msra.mxu0 %v12141_v17  ;;  %v8183_v13 = vmax.f32 %v12593_v12, %v8181_v52  ;;  %v10310_v17 = vld [vmem:[%s16416_s5 + $0x170] sm:$0xff]  ;;  %v10339_v19 = vld [vmem:[%s16416_s5 + $0x228] sm:$0xff]  ;;  %v10337_v7 = vld [vmem:[%s16416_s5 + $0x218] sm:$0xff] }
 0x49c   : > { %10289 = vmatprep.subr.msk.mxu0 %vm6005_vm6, %v6000_v62  ;;  %v9068_v56 = vrot.slane %v12594_v63, 1  ;;  %v12165_v12 = vpack.c.bf16 %v10314_v24, %v10310_v17  ;;  %v10319_v62 = vld [vmem:[%s16416_s5 + $0x1b8] sm:$0x3]  ;;  %v10318_v52 = vld [vmem:[%s16416_s5 + $0x1b0] sm:$0x3]  ;;  %v12171_v42 = vpack.c.bf16 %v10339_v19, %v10335_v39  ;;  %v10368_v17 = vld [vmem:[%s16416_s5 + $0x2e0] sm:$0xff] }
 0x49d   : > { %v8627_v9 = vrot.slane %v12595_v44, 1  ;;  %v8185_v53 = vrot.slane %v8183_v13, 4  ;;  %v10332_v5 = vld [vmem:[%s16416_s5 + $0x1f0] sm:$0xff]  ;;  %v10349_v35 = vld [vmem:[%s16416_s5 + $0x278] sm:$0xff]  ;;  %v10372_v24 = vld [vmem:[%s16416_s5 + $0x300] sm:$0xff] }
 0x49e   : > { %v9070_v58 = vmax.f32 %v12594_v63, %v9068_v56  ;;  %v12167_v63 = vpack.c.bf16 %v10331_v6, %v10327_v14  ;;  %v10342_v56 = vld [vmem:[%s16416_s5 + $0x240] sm:$0xff]  ;;  %v10336_v48 = vld [vmem:[%s16416_s5 + $0x210] sm:$0xff]  ;;  %v12197_v14 = vpack.c.bf16 %v10372_v24, %v10368_v17  ;;  %v10385_v19 = vld [vmem:[%s16416_s5 + $0x368] sm:$0x3] }
 0x49f   : > { %v8629_v38 = vmax.f32 %v12595_v44, %v8627_v9  ;;  %10290 = vmatpush1.msk.msra.mxu0 %vm6005_vm6, %v5999_v41  ;;  %v14667_v31 = vmax.f32 %v7738_v21, %v8185_v53  ;;  %v12163_v21 = vpack.c.bf16 %v10315_v54, %v10311_v3  ;;  %v12169_v44 = vpack.c.bf16 %v10330_v2, %v10326_v46  ;;  %v10338_v41 = vld [vmem:[%s16416_s5 + $0x220] sm:$0xff]  ;;  %v10333_v53 = vld [vmem:[%s16416_s5 + $0x1f8] sm:$0xff]  ;;  %v10344_v61 = vld [vmem:[%s16416_s5 + $0x250] sm:$0xff] }
 0x4a0   : > { %10291 = vmatmul.mubr.msk.f32.vlgmr.msra.gmra.mrb[66].mxu0 %vm6001_vm7, %v14596_v30  ;;  %12144 = vmatprep.subr.bf16.mxu0 %v12143_v1  ;;  %v9072_v40 = vrot.slane %v9070_v58, 4  ;;  %v12161_v30 = vpack.c.bf16 %v10306_v16, %v10302_v37  ;;  %v10343_v1 = vld [vmem:[%s16416_s5 + $0x248] sm:$0xff]  ;;  %v12173_v22 = vpack.c.bf16 %v10338_v41, %v10334_v8  ;;  %v10346_v9 = vld [vmem:[%s16416_s5 + $0x260] sm:$0xff]  ;;  %v6414_v58 = vmax.f32 %v14607_v10, 0.0  ;;  %v10348_v59 = vld [vmem:[%s16416_s5 + $0x270] sm:$0xff] }
 0x4a1   : > { %v8631_v23 = vrot.slane %v8629_v38, 4  ;;  %12146 = vmatpush1.bf16.msra.mxu0 %v12145_v25  ;;  %6298 = vmatprep.mubr.f32.mxu0 %v16487_v43  ;;  %v10347_v25 = vld [vmem:[%s16416_s5 + $0x268] sm:$0xff]  ;;  %v12177_v0 = vpack.c.bf16 %v10346_v9, %v10342_v56  ;;  %v10328_v38 = vld [vmem:[%s16416_s5 + $0x1d0] sm:$0xff]  ;;  %v12189_v33 = vpack.c.bf16 %v10348_v59, %v10344_v61  ;;  %v10376_v46 = vld [vmem:[%s16416_s5 + $0x320] sm:$0xff] }
 0x4a2   : > { %12148 = vmatprep.subr.bf16.mxu0 %v12147_v26  ;;  %v14676_v50 = vmax.f32 %v8625_v11, %v9072_v40  ;;  %v12175_v13 = vpack.c.bf16 %v10347_v25, %v10343_v1  ;;  %v10329_v26 = vld [vmem:[%s16416_s5 + $0x1d8] sm:$0xff]  ;;  %v10369_v37 = vld [vmem:[%s16416_s5 + $0x2e8] sm:$0xff]  ;;  %v10352_v3 = vld [vmem:[%s16416_s5 + $0x290] sm:$0x3] }
 0x4a3   : > { %v14678_v34 = vmax.f32 %v8625_v11, %v8631_v23  ;;  %v10350_v11 = vld [vmem:[%s16416_s5 + $0x280] sm:$0x3]  ;;  %v12179_v40 = vpack.c.bf16 %v10333_v53, %v10329_v26  ;;  %v12181_v23 = vpack.c.bf16 %v10332_v5, %v10328_v38  ;;  %v10373_v16 = vld [vmem:[%s16416_s5 + $0x308] sm:$0xff]  ;;  %v10371_v8 = vld [vmem:[%s16416_s5 + $0x2f8] sm:$0xff] }
 0x4a4   : > { %v10380_v2 = vld [vmem:[%s16416_s5 + $0x340] sm:$0xff]  ;;  %v10375_v41 = vld [vmem:[%s16416_s5 + $0x318] sm:$0xff]  ;;  %v10370_v9 = vld [vmem:[%s16416_s5 + $0x2f0] sm:$0xff] }
 0x4a5   : > { %12150 = vmatpush1.bf16.msra.mxu0 %v12149_v27  ;;  %v10341_v27 = vld [vmem:[%s16416_s5 + $0x238] sm:$0xff]  ;;  %v12201_v39 = vpack.c.bf16 %v10380_v2, %v10376_v46  ;;  %v10384_v1 = vld [vmem:[%s16416_s5 + $0x360] sm:$0x3]  ;;  %v12207_v56 = vpack.c.bf16 %v10375_v41, %v10371_v8  ;;  %v10382_v38 = vld [vmem:[%s16416_s5 + $0x350] sm:$0xff] }
 0x4a6   : > { %12152 = vmatprep.subr.bf16.mxu0 %v12151_v51  ;;  %v6445_v51 = vrot.slane %v6414_v58, 4  ;;  %v12183_v60 = vpack.c.bf16 %v10341_v27, %v10337_v7  ;;  %v10383_v10 = vld [vmem:[%s16416_s5 + $0x358] sm:$0xff]  ;;  %v10395_v27 = vld [vmem:[%s16416_s5 + $0x388] sm:$0xff]  ;;  %v10418_v17 = vld [vmem:[%s16416_s5 + $0x440] sm:$0x3] }
 0x4a7   : > { %v10387_v7 = vld [vmem:[%s16416_s5 + $0x378] sm:$0x3]  ;;  %v10411_v61 = vld [vmem:[%s16416_s5 + $0x408] sm:$0xff]  ;;  %v10408_v46 = vld [vmem:[%s16416_s5 + $0x3f0] sm:$0xff] }
 0x4a8   : > { %v10415_v59 = vld [vmem:[%s16416_s5 + $0x428] sm:$0xff]  ;;  %v10413_v2 = vld [vmem:[%s16416_s5 + $0x418] sm:$0xff] }
 0x4a9   : > { %12154 = vmatpush1.bf16.msra.mxu0 %v12153_v4  ;;  %v10340_v4 = vld [vmem:[%s16416_s5 + $0x230] sm:$0xff]  ;;  %v10429_v8 = vld [vmem:[%s16416_s5 + $0x468] sm:$0xff] }
 0x4aa   : > { %10320 = vmatprep.subr.msk.mxu0 %vm6005_vm6, %v10317_v28  ;;  %v10345_v28 = vld [vmem:[%s16416_s5 + $0x258] sm:$0xff]  ;;  %v12185_v45 = vpack.c.bf16 %v10340_v4, %v10336_v48  ;;  %v10386_v48 = vld [vmem:[%s16416_s5 + $0x370] sm:$0x3]  ;;  %v10433_v41 = vld [vmem:[%s16416_s5 + $0x488] sm:$0xff] }
 0x4ab   : > { %v12187_v29 = vpack.c.bf16 %v10349_v35, %v10345_v28 }
 0x4ad   : > { %10321 = vmatpush1.msk.msra.mxu0 %vm6005_vm6, %v10316_v47  ;;  %v10353_v47 = vld [vmem:[%s16416_s5 + $0x298] sm:$0x3] }
 0x4ae   : > { %10322 = vmatmul.mubr.msk.f32.vlgmr.msra.gmra.mrb[68].mxu0 %vm6001_vm7, %v6219_v18  ;;  %12156 = vmatprep.subr.bf16.mxu0 %v12155_v49  ;;  %v10361_v49 = vld [vmem:[%s16416_s5 + $0x2a8] sm:$0xff] }
 0x4af   : > { %12158 = vmatpush1.bf16.msra.mxu0 %v12157_v15  ;;  %6369 = vmatprep.mubr.f32.mxu0 %v16487_v43  ;;  %v10365_v15 = vld [vmem:[%s16416_s5 + $0x2c8] sm:$0xff] }
 0x4b0   : > { %12160 = vmatprep.subr.bf16.mxu0 %v12159_v36  ;;  %v10364_v36 = vld [vmem:[%s16416_s5 + $0x2c0] sm:$0xff]  ;;  %v12191_v54 = vpack.c.bf16 %v10365_v15, %v10361_v49 }
 0x4b1   : > { %v10410_v49 = vld [vmem:[%s16416_s5 + $0x400] sm:$0xff] }
 0x4b2   : > { %v10414_v15 = vld [vmem:[%s16416_s5 + $0x420] sm:$0xff] }
 0x4b3   : > { %12162 = vmatpush1.bf16.msra.mxu0 %v12161_v30 }
 0x4b4   : > { %12164 = vmatprep.subr.bf16.mxu0 %v12163_v21  ;;  %v12195_v21 = vpack.c.bf16 %v10373_v16, %v10369_v37  ;;  %v10397_v37 = vld [vmem:[%s16416_s5 + $0x398] sm:$0xff] }
 0x4b5   : > { %v10401_v16 = vld [vmem:[%s16416_s5 + $0x3b8] sm:$0xff] }
 0x4b6   : > { %v12227_v24 = vpack.c.bf16 %v10401_v16, %v10397_v37  ;;  %v10446_v37 = vld [vmem:[%s16416_s5 + $0x4f0] sm:$0xff] }
 0x4b7   : > { %12166 = vmatpush1.bf16.msra.mxu0 %v12165_v12  ;;  %v10377_v12 = vld [vmem:[%s16416_s5 + $0x328] sm:$0xff]  ;;  %v10450_v16 = vld [vmem:[%s16416_s5 + $0x510] sm:$0xff] }
 0x4b8   : > { %10323 = vmatprep.subr.msk.mxu0 %vm6005_vm6, %v10319_v62  ;;  %v10381_v62 = vld [vmem:[%s16416_s5 + $0x348] sm:$0xff] }
 0x4b9   : > { %v12199_v6 = vpack.c.bf16 %v10381_v62, %v10377_v12  ;;  %v14988_v62 = vmax.f32 %v14620_v55, 0.0  ;;  %v10417_v55 = vld [vmem:[%s16416_s5 + $0x438] sm:$0xff] }
 0x4bb   : > { %10324 = vmatpush1.msk.msra.mxu0 %vm6005_vm6, %v10318_v52  ;;  %v10363_v52 = vld [vmem:[%s16416_s5 + $0x2b8] sm:$0xff] }
 0x4bc   : > { %10325 = vmatmul.mubr.msk.f32.vlgmr.msra.gmra.mrb[70].mxu0 %vm6001_vm7, %v6219_v18  ;;  %12168 = vmatprep.subr.bf16.mxu0 %v12167_v63  ;;  %v10360_v18 = vld [vmem:[%s16416_s5 + $0x2a0] sm:$0xff]  ;;  %v10367_v63 = vld [vmem:[%s16416_s5 + $0x2d8] sm:$0xff] }
 0x4bd   : > { %12170 = vmatpush1.bf16.msra.mxu0 %v12169_v44  ;;  %6524 = vmatprep.mubr.f32.mxu0 %v16487_v43  ;;  %v12193_v30 = vpack.c.bf16 %v10364_v36, %v10360_v18  ;;  %v10362_v44 = vld [vmem:[%s16416_s5 + $0x2b0] sm:$0xff]  ;;  %v12203_v25 = vpack.c.bf16 %v10367_v63, %v10363_v52  ;;  %v12225_v18 = vpack.c.bf16 %v10414_v15, %v10410_v49  ;;  %v10419_v36 = vld [vmem:[%s16416_s5 + $0x448] sm:$0x3]  ;;  %v10447_v49 = vld [vmem:[%s16416_s5 + $0x4f8] sm:$0xff] }
 0x4be   : > { %12172 = vmatprep.subr.bf16.mxu0 %v12171_v42  ;;  %v10366_v42 = vld [vmem:[%s16416_s5 + $0x2d0] sm:$0xff]  ;;  %v10451_v15 = vld [vmem:[%s16416_s5 + $0x518] sm:$0xff] }
 0x4bf   : > { %v10412_v52 = vld [vmem:[%s16416_s5 + $0x410] sm:$0xff] }
 0x4c0   : > { %v10416_v63 = vld [vmem:[%s16416_s5 + $0x430] sm:$0xff] }
 0x4c1   : > { %12174 = vmatpush1.bf16.msra.mxu0 %v12173_v22  ;;  %v12205_v22 = vpack.c.bf16 %v10366_v42, %v10362_v44  ;;  %v12237_v44 = vpack.c.bf16 %v10416_v63, %v10412_v52  ;;  %v10421_v42 = vld [vmem:[%s16416_s5 + $0x458] sm:$0x3]  ;;  %v10483_v52 = vld [vmem:[%s16416_s5 + $0x5e8] sm:$0xff] }
 0x4c2   : > { %12176 = vmatprep.subr.bf16.mxu0 %v12175_v13  ;;  %v6661_v13 = vrot.slane %v6414_v58, 6  ;;  %v10378_v58 = vld [vmem:[%s16416_s5 + $0x330] sm:$0xff] }
 0x4c3   : > { %v12213_v5 = vpack.c.bf16 %v10382_v38, %v10378_v58  ;;  %v10449_v58 = vld [vmem:[%s16416_s5 + $0x508] sm:$0xff] }
 0x4c5   : > { %12178 = vmatpush1.bf16.msra.mxu0 %v12177_v0  ;;  %v10374_v0 = vld [vmem:[%s16416_s5 + $0x310] sm:$0xff] }
 0x4c6   : > { %10354 = vmatprep.subr.msk.mxu0 %vm6005_vm6, %v10351_v20  ;;  %v10379_v20 = vld [vmem:[%s16416_s5 + $0x338] sm:$0xff]  ;;  %v12209_v26 = vpack.c.bf16 %v10374_v0, %v10370_v9  ;;  %v12239_v9 = vpack.c.bf16 %v10433_v41, %v10429_v8  ;;  %v10482_v8 = vld [vmem:[%s16416_s5 + $0x5e0] sm:$0xff] }
 0x4c7   : > { %v12211_v53 = vpack.c.bf16 %v10383_v10, %v10379_v20  ;;  %v10436_v10 = vld [vmem:[%s16416_s5 + $0x4a0] sm:$0xff] }
 0x4c9   : > { %10355 = vmatpush1.msk.msra.mxu0 %vm6005_vm6, %v10350_v11  ;;  %v10399_v11 = vld [vmem:[%s16416_s5 + $0x3a8] sm:$0xff] }
 0x4ca   : > { %10356 = vmatmul.mubr.msk.f32.vlgmr.msra.gmra.mrb[72].mxu0 %vm6001_vm7, %v6445_v51  ;;  %12180 = vmatprep.subr.bf16.mxu0 %v12179_v40  ;;  %v10394_v40 = vld [vmem:[%s16416_s5 + $0x380] sm:$0xff]  ;;  %v12215_v4 = vpack.c.bf16 %v10399_v11, %v10395_v27 }
 0x4cb   : > { %12182 = vmatpush1.bf16.msra.mxu0 %v12181_v23  ;;  %6595 = vmatprep.mubr.f32.mxu0 %v16487_v43  ;;  %v10398_v23 = vld [vmem:[%s16416_s5 + $0x3a0] sm:$0xff] }
 0x4cc   : > { %12184 = vmatprep.subr.bf16.mxu0 %v12183_v60  ;;  %v10407_v60 = vld [vmem:[%s16416_s5 + $0x3e8] sm:$0xff]  ;;  %v12217_v28 = vpack.c.bf16 %v10398_v23, %v10394_v40  ;;  %v10448_v27 = vld [vmem:[%s16416_s5 + $0x500] sm:$0xff]  ;;  %v10431_v23 = vld [vmem:[%s16416_s5 + $0x478] sm:$0xff] }
 0x4cd   : > { %v10453_v40 = vld [vmem:[%s16416_s5 + $0x528] sm:$0x3] }
 0x4cf   : > { %12186 = vmatpush1.bf16.msra.mxu0 %v12185_v45  ;;  %v10402_v45 = vld [vmem:[%s16416_s5 + $0x3c0] sm:$0xff] }
 0x4d0   : > { %12188 = vmatprep.subr.bf16.mxu0 %v12187_v29  ;;  %v10406_v29 = vld [vmem:[%s16416_s5 + $0x3e0] sm:$0xff] }
 0x4d3   : > { %12190 = vmatpush1.bf16.msra.mxu0 %v12189_v33  ;;  %v12221_v33 = vpack.c.bf16 %v10406_v29, %v10402_v45 }
 0x4d4   : > { %10357 = vmatprep.subr.msk.mxu0 %vm6005_vm6, %v10353_v47  ;;  %v12223_v47 = vpack.c.bf16 %v10415_v59, %v10411_v61  ;;  %v7106_v61 = vrot.slane %v14988_v62, 2 }
 0x4d7   : > { %10358 = vmatpush1.msk.msra.mxu0 %vm6005_vm6, %v10352_v3  ;;  %v10396_v3 = vld [vmem:[%s16416_s5 + $0x390] sm:$0xff] }
 0x4d8   : > { %10359 = vmatmul.mubr.msk.f32.vlgmr.msra.gmra.mrb[74].mxu0 %vm6001_vm7, %v6445_v51  ;;  %12192 = vmatprep.subr.bf16.mxu0 %v12191_v54  ;;  %v10403_v51 = vld [vmem:[%s16416_s5 + $0x3c8] sm:$0xff]  ;;  %v10400_v54 = vld [vmem:[%s16416_s5 + $0x3b0] sm:$0xff] }
 0x4d9   : > { %12194 = vmatpush1.bf16.msra.mxu0 %v12193_v30  ;;  %6740 = vmatprep.mubr.f32.mxu0 %v16487_v43  ;;  %v12219_v35 = vpack.c.bf16 %v10407_v60, %v10403_v51  ;;  %v10405_v30 = vld [vmem:[%s16416_s5 + $0x3d8] sm:$0xff]  ;;  %v12229_v12 = vpack.c.bf16 %v10400_v54, %v10396_v3  ;;  %v10430_v60 = vld [vmem:[%s16416_s5 + $0x470] sm:$0xff]  ;;  %v12261_v3 = vpack.c.bf16 %v10450_v16, %v10446_v37  ;;  %v10513_v37 = vld [vmem:[%s16416_s5 + $0x6a8] sm:$0xff] }
 0x4da   : > { %12196 = vmatprep.subr.bf16.mxu0 %v12195_v21  ;;  %v10409_v21 = vld [vmem:[%s16416_s5 + $0x3f8] sm:$0xff]  ;;  %v10517_v16 = vld [vmem:[%s16416_s5 + $0x6c8] sm:$0xff] }
 0x4db   : > { %v10435_v51 = vld [vmem:[%s16416_s5 + $0x498] sm:$0xff] }
 0x4dc   : > { %v12251_v45 = vpack.c.bf16 %v10435_v51, %v10431_v23  ;;  %v10455_v54 = vld [vmem:[%s16416_s5 + $0x538] sm:$0x3]  ;;  %v10480_v51 = vld [vmem:[%s16416_s5 + $0x5d0] sm:$0xff] }
 0x4dd   : > { %12198 = vmatpush1.bf16.msra.mxu0 %v12197_v14  ;;  %v12231_v14 = vpack.c.bf16 %v10409_v21, %v10405_v30  ;;  %v10463_v30 = vld [vmem:[%s16416_s5 + $0x548] sm:$0xff] }
 0x4de   : > { %12200 = vmatprep.subr.bf16.mxu0 %v12199_v6  ;;  %v10404_v6 = vld [vmem:[%s16416_s5 + $0x3d0] sm:$0xff]  ;;  %v10467_v21 = vld [vmem:[%s16416_s5 + $0x568] sm:$0xff] }
 0x4e1   : > { %12202 = vmatpush1.bf16.msra.mxu0 %v12201_v39  ;;  %v12233_v39 = vpack.c.bf16 %v10408_v46, %v10404_v6  ;;  %v12263_v6 = vpack.c.bf16 %v10467_v21, %v10463_v30  ;;  %v10512_v30 = vld [vmem:[%s16416_s5 + $0x6a0] sm:$0xff] }
 0x4e2   : > { %10388 = vmatprep.subr.msk.mxu0 %vm6005_vm6, %v10385_v19  ;;  %v12235_v19 = vpack.c.bf16 %v10417_v55, %v10413_v2  ;;  %v10470_v55 = vld [vmem:[%s16416_s5 + $0x580] sm:$0xff] }
 0x4e3   : > { %v10516_v21 = vld [vmem:[%s16416_s5 + $0x6c0] sm:$0xff] }
 0x4e5   : > { %10389 = vmatpush1.msk.msra.mxu0 %vm6005_vm6, %v10384_v1  ;;  %v10428_v1 = vld [vmem:[%s16416_s5 + $0x460] sm:$0xff] }
 0x4e6   : > { %10390 = vmatmul.mubr.msk.f32.vlgmr.msra.gmra.mrb[76].mxu0 %vm6001_vm7, %v6661_v13  ;;  %12204 = vmatprep.subr.bf16.mxu0 %v12203_v25  ;;  %v10432_v25 = vld [vmem:[%s16416_s5 + $0x480] sm:$0xff] }
 0x4e7   : > { %12206 = vmatpush1.bf16.msra.mxu0 %v12205_v22  ;;  %6811 = vmatprep.mubr.f32.mxu0 %v16487_v43  ;;  %v10437_v22 = vld [vmem:[%s16416_s5 + $0x4a8] sm:$0xff]  ;;  %v12241_v0 = vpack.c.bf16 %v10432_v25, %v10428_v1  ;;  %v10465_v25 = vld [vmem:[%s16416_s5 + $0x558] sm:$0xff] }
 0x4e8   : > { %12208 = vmatprep.subr.bf16.mxu0 %v12207_v56  ;;  %v10420_v56 = vld [vmem:[%s16416_s5 + $0x450] sm:$0x3]  ;;  %v10487_v1 = vld [vmem:[%s16416_s5 + $0x608] sm:$0x3] }
 0x4eb   : > { %12210 = vmatpush1.bf16.msra.mxu0 %v12209_v26  ;;  %v10440_v26 = vld [vmem:[%s16416_s5 + $0x4c0] sm:$0xff] }
 0x4ec   : > { %12212 = vmatprep.subr.bf16.mxu0 %v12211_v53  ;;  %v10445_v53 = vld [vmem:[%s16416_s5 + $0x4e8] sm:$0xff]  ;;  %v12245_v38 = vpack.c.bf16 %v10440_v26, %v10436_v10  ;;  %v10486_v10 = vld [vmem:[%s16416_s5 + $0x600] sm:$0x3] }
 0x4ef   : > { %12214 = vmatpush1.bf16.msra.mxu0 %v12213_v5  ;;  %v12247_v5 = vpack.c.bf16 %v10449_v58, %v10445_v53 }
 0x4f0   : > { %10391 = vmatprep.subr.msk.mxu0 %vm6005_vm6, %v10387_v7  ;;  %v10444_v7 = vld [vmem:[%s16416_s5 + $0x4e0] sm:$0xff] }
 0x4f1   : > { %v12249_v11 = vpack.c.bf16 %v10448_v27, %v10444_v7  ;;  %v10476_v7 = vld [vmem:[%s16416_s5 + $0x5b0] sm:$0xff]  ;;  %v10481_v27 = vld [vmem:[%s16416_s5 + $0x5d8] sm:$0xff] }
 0x4f3   : > { %10392 = vmatpush1.msk.msra.mxu0 %vm6005_vm6, %v10386_v48  ;;  %v10434_v48 = vld [vmem:[%s16416_s5 + $0x490] sm:$0xff] }
 0x4f4   : > { %10393 = vmatmul.mubr.msk.f32.vlgmr.msra.gmra.mrb[78].mxu0 %vm6001_vm7, %v6661_v13  ;;  %12216 = vmatprep.subr.bf16.mxu0 %v12215_v4  ;;  %v10441_v13 = vld [vmem:[%s16416_s5 + $0x4c8] sm:$0xff]  ;;  %v10439_v4 = vld [vmem:[%s16416_s5 + $0x4b8] sm:$0xff]  ;;  %v12253_v29 = vpack.c.bf16 %v10434_v48, %v10430_v60  ;;  %v10484_v60 = vld [vmem:[%s16416_s5 + $0x5f0] sm:$0xff] }
 0x4f5   : > { %12218 = vmatpush1.bf16.msra.mxu0 %v12217_v28  ;;  %6969 = vmatprep.mubr.f32.mxu0 %v16487_v43  ;;  %v12243_v20 = vpack.c.bf16 %v10441_v13, %v10437_v22  ;;  %v10443_v28 = vld [vmem:[%s16416_s5 + $0x4d8] sm:$0xff]  ;;  %v7301_v13 = vmax.f32 %v14617_v32, 0.0  ;;  %v12285_v48 = vpack.c.bf16 %v10484_v60, %v10480_v51 }
 0x4f6   : > { %12220 = vmatprep.subr.bf16.mxu0 %v12219_v35  ;;  %v10452_v35 = vld [vmem:[%s16416_s5 + $0x520] sm:$0x3]  ;;  %v12255_v59 = vpack.c.bf16 %v10443_v28, %v10439_v4  ;;  %v10469_v22 = vld [vmem:[%s16416_s5 + $0x578] sm:$0xff]  ;;  %v10497_v28 = vld [vmem:[%s16416_s5 + $0x628] sm:$0xff] }
 0x4f7   : > { %v12275_v26 = vpack.c.bf16 %v10469_v22, %v10465_v25  ;;  %v7332_v58 = vrot.slane %v7301_v13, 4  ;;  %v10489_v4 = vld [vmem:[%s16416_s5 + $0x618] sm:$0x3]  ;;  %v10514_v25 = vld [vmem:[%s16416_s5 + $0x6b0] sm:$0xff] }
 0x4f8   : > { %v10519_v32 = vld [vmem:[%s16416_s5 + $0x6d8] sm:$0xff]  ;;  %v10518_v22 = vld [vmem:[%s16416_s5 + $0x6d0] sm:$0xff] }
 0x4f9   : > { %12222 = vmatpush1.bf16.msra.mxu0 %v12221_v33  ;;  %v10438_v33 = vld [vmem:[%s16416_s5 + $0x4b0] sm:$0xff] }
 0x4fa   : > { %12224 = vmatprep.subr.bf16.mxu0 %v12223_v47  ;;  %v10442_v47 = vld [vmem:[%s16416_s5 + $0x4d0] sm:$0xff] }
 0x4fd   : > { %12226 = vmatpush1.bf16.msra.mxu0 %v12225_v18  ;;  %v12257_v18 = vpack.c.bf16 %v10442_v47, %v10438_v33  ;;  %v10488_v33 = vld [vmem:[%s16416_s5 + $0x610] sm:$0x3] }
 0x4fe   : > { %10422 = vmatprep.subr.msk.mxu0 %vm6005_vm6, %v10419_v36  ;;  %v12259_v36 = vpack.c.bf16 %v10451_v15, %v10447_v49 }
 0x501   : > { %10423 = vmatpush1.msk.msra.mxu0 %vm6005_vm6, %v10418_v17  ;;  %v10462_v17 = vld [vmem:[%s16416_s5 + $0x540] sm:$0xff] }
 0x502   : > { %10424 = vmatmul.mubr.msk.f32.vlgmr.msra.gmra.mrb[80].mxu0 %vm6001_vm7, %v14988_v62  ;;  %12228 = vmatprep.subr.bf16.mxu0 %v12227_v24  ;;  %v10466_v24 = vld [vmem:[%s16416_s5 + $0x560] sm:$0xff] }
 0x503   : > { %12230 = vmatpush1.bf16.msra.mxu0 %v12229_v12  ;;  %7040 = vmatprep.mubr.f32.mxu0 %v16487_v43  ;;  %v10471_v12 = vld [vmem:[%s16416_s5 + $0x588] sm:$0xff]  ;;  %v12265_v46 = vpack.c.bf16 %v10466_v24, %v10462_v17  ;;  %v12297_v17 = vpack.c.bf16 %v10516_v21, %v10512_v30 }
 0x504   : > { %12232 = vmatprep.subr.bf16.mxu0 %v12231_v14  ;;  %v10454_v14 = vld [vmem:[%s16416_s5 + $0x530] sm:$0x3]  ;;  %v10521_v24 = vld [vmem:[%s16416_s5 + $0x6e8] sm:$0x3] }
 0x507   : > { %12234 = vmatpush1.bf16.msra.mxu0 %v12233_v39  ;;  %v10474_v39 = vld [vmem:[%s16416_s5 + $0x5a0] sm:$0xff] }
 0x508   : > { %12236 = vmatprep.subr.bf16.mxu0 %v12235_v19  ;;  %v10479_v19 = vld [vmem:[%s16416_s5 + $0x5c8] sm:$0xff]  ;;  %v12269_v63 = vpack.c.bf16 %v10474_v39, %v10470_v55  ;;  %v10520_v55 = vld [vmem:[%s16416_s5 + $0x6e0] sm:$0x3] }
 0x50b   : > { %12238 = vmatpush1.bf16.msra.mxu0 %v12237_v44  ;;  %v12271_v44 = vpack.c.bf16 %v10483_v52, %v10479_v19  ;;  %v7548_v52 = vrot.slane %v7301_v13, 6  ;;  %v12309_v13 = vpack.c.bf16 %v10518_v22, %v10514_v25  ;;  %v10565_v25 = vld [vmem:[%s16416_s5 + $0x7e8] sm:$0xff] }
 0x50c   : > { %10425 = vmatprep.subr.msk.mxu0 %vm6005_vm6, %v10421_v42  ;;  %v10478_v42 = vld [vmem:[%s16416_s5 + $0x5c0] sm:$0xff]  ;;  %v10569_v22 = vld [vmem:[%s16416_s5 + $0x808] sm:$0xff] }
 0x50d   : > { %v12273_v41 = vpack.c.bf16 %v10482_v8, %v10478_v42  ;;  %v10510_v42 = vld [vmem:[%s16416_s5 + $0x690] sm:$0xff]  ;;  %v10515_v8 = vld [vmem:[%s16416_s5 + $0x6b8] sm:$0xff] }
 0x50f   : > { %10426 = vmatpush1.msk.msra.mxu0 %vm6005_vm6, %v10420_v56  ;;  %v10464_v56 = vld [vmem:[%s16416_s5 + $0x550] sm:$0xff] }
 0x510   : > { %10427 = vmatmul.mubr.msk.f32.vlgmr.msra.gmra.mrb[82].mxu0 %vm6001_vm7, %v14988_v62  ;;  %12240 = vmatprep.subr.bf16.mxu0 %v12239_v9  ;;  %v10475_v62 = vld [vmem:[%s16416_s5 + $0x5a8] sm:$0xff]  ;;  %v10468_v9 = vld [vmem:[%s16416_s5 + $0x570] sm:$0xff] }
 0x511   : > { %12242 = vmatpush1.bf16.msra.mxu0 %v12241_v0  ;;  %7185 = vmatprep.mubr.f32.mxu0 %v16487_v43  ;;  %v12267_v2 = vpack.c.bf16 %v10475_v62, %v10471_v12  ;;  %v10473_v0 = vld [vmem:[%s16416_s5 + $0x598] sm:$0xff]  ;;  %v12277_v53 = vpack.c.bf16 %v10468_v9, %v10464_v56  ;;  %v10531_v9 = vld [vmem:[%s16416_s5 + $0x708] sm:$0xff] }
 0x512   : > { %12244 = vmatprep.subr.bf16.mxu0 %v12243_v20  ;;  %v10477_v20 = vld [vmem:[%s16416_s5 + $0x5b8] sm:$0xff] }
 0x513   : > { %v10499_v12 = vld [vmem:[%s16416_s5 + $0x638] sm:$0xff] }
 0x514   : > { %v10503_v62 = vld [vmem:[%s16416_s5 + $0x658] sm:$0xff] }
 0x515   : > { %12246 = vmatpush1.bf16.msra.mxu0 %v12245_v38  ;;  %v12279_v38 = vpack.c.bf16 %v10477_v20, %v10473_v0  ;;  %v12299_v39 = vpack.c.bf16 %v10503_v62, %v10499_v12  ;;  %v10523_v56 = vld [vmem:[%s16416_s5 + $0x6f8] sm:$0x3]  ;;  %v10535_v0 = vld [vmem:[%s16416_s5 + $0x728] sm:$0xff]  ;;  %v10530_v20 = vld [vmem:[%s16416_s5 + $0x700] sm:$0xff] }
 0x516   : > { %12248 = vmatprep.subr.bf16.mxu0 %v12247_v5  ;;  %v10472_v5 = vld [vmem:[%s16416_s5 + $0x590] sm:$0xff] }
 0x517   : > { %v10540_v62 = vld [vmem:[%s16416_s5 + $0x750] sm:$0xff] }
 0x519   : > { %12250 = vmatpush1.bf16.msra.mxu0 %v12249_v11  ;;  %v10485_v11 = vld [vmem:[%s16416_s5 + $0x5f8] sm:$0xff] }
 0x51a   : > { %10456 = vmatprep.subr.msk.mxu0 %vm6005_vm6, %v10453_v40  ;;  %v12281_v40 = vpack.c.bf16 %v10476_v7, %v10472_v5  ;;  %v12283_v23 = vpack.c.bf16 %v10485_v11, %v10481_v27  ;;  %v10538_v27 = vld [vmem:[%s16416_s5 + $0x740] sm:$0xff] }
 0x51b   : > { %v10542_v11 = vld [vmem:[%s16416_s5 + $0x760] sm:$0xff] }
 0x51c   : > { %v12317_v60 = vpack.c.bf16 %v10542_v11, %v10538_v27 }
 0x51d   : > { %10457 = vmatpush1.msk.msra.mxu0 %vm6005_vm6, %v10452_v35  ;;  %v10501_v35 = vld [vmem:[%s16416_s5 + $0x648] sm:$0xff] }
 0x51e   : > { %10458 = vmatmul.mubr.msk.f32.vlgmr.msra.gmra.mrb[84].mxu0 %vm6001_vm7, %v7106_v61  ;;  %12252 = vmatprep.subr.bf16.mxu0 %v12251_v45  ;;  %v10496_v45 = vld [vmem:[%s16416_s5 + $0x620] sm:$0xff]  ;;  %v12287_v47 = vpack.c.bf16 %v10501_v35, %v10497_v28 }
 0x51f   : > { %12254 = vmatpush1.bf16.msra.mxu0 %v12253_v29  ;;  %7256 = vmatprep.mubr.f32.mxu0 %v16487_v43  ;;  %v10500_v29 = vld [vmem:[%s16416_s5 + $0x640] sm:$0xff] }
 0x520   : > { %12256 = vmatprep.subr.bf16.mxu0 %v12255_v59  ;;  %v10509_v59 = vld [vmem:[%s16416_s5 + $0x688] sm:$0xff]  ;;  %v12289_v49 = vpack.c.bf16 %v10500_v29, %v10496_v45  ;;  %v10546_v28 = vld [vmem:[%s16416_s5 + $0x780] sm:$0xff] }
 0x521   : > { %v10550_v35 = vld [vmem:[%s16416_s5 + $0x7a0] sm:$0xff] }
 0x522   : > { %v12321_v29 = vpack.c.bf16 %v10550_v35, %v10546_v28  ;;  %v10589_v28 = vld [vmem:[%s16416_s5 + $0x8a8] sm:$0x3]  ;;  %v10567_v35 = vld [vmem:[%s16416_s5 + $0x7f8] sm:$0xff] }
 0x523   : > { %12258 = vmatpush1.bf16.msra.mxu0 %v12257_v18  ;;  %v10504_v18 = vld [vmem:[%s16416_s5 + $0x660] sm:$0xff] }
 0x524   : > { %12260 = vmatprep.subr.bf16.mxu0 %v12259_v36  ;;  %v10508_v36 = vld [vmem:[%s16416_s5 + $0x680] sm:$0xff] }
 0x527   : > { %12262 = vmatpush1.bf16.msra.mxu0 %v12261_v3  ;;  %v12293_v3 = vpack.c.bf16 %v10508_v36, %v10504_v18  ;;  %v10532_v18 = vld [vmem:[%s16416_s5 + $0x710] sm:$0xff] }
 0x528   : > { %10459 = vmatprep.subr.msk.mxu0 %vm6005_vm6, %v10455_v54  ;;  %v12295_v54 = vpack.c.bf16 %v10517_v16, %v10513_v37  ;;  %v10536_v36 = vld [vmem:[%s16416_s5 + $0x730] sm:$0xff]  ;;  %v10541_v37 = vld [vmem:[%s16416_s5 + $0x758] sm:$0xff] }
 0x529   : > { %v10545_v16 = vld [vmem:[%s16416_s5 + $0x778] sm:$0xff] }
 0x52a   : > { %v12327_v12 = vpack.c.bf16 %v10545_v16, %v10541_v37  ;;  %v10574_v37 = vld [vmem:[%s16416_s5 + $0x830] sm:$0xff] }
 0x52b   : > { %10460 = vmatpush1.msk.msra.mxu0 %vm6005_vm6, %v10454_v14  ;;  %v10498_v14 = vld [vmem:[%s16416_s5 + $0x630] sm:$0xff] }
 0x52c   : > { %10461 = vmatmul.mubr.msk.f32.vlgmr.msra.gmra.mrb[86].mxu0 %vm6001_vm7, %v7106_v61  ;;  %12264 = vmatprep.subr.bf16.mxu0 %v12263_v6  ;;  %v10505_v61 = vld [vmem:[%s16416_s5 + $0x668] sm:$0xff]  ;;  %v10502_v6 = vld [vmem:[%s16416_s5 + $0x650] sm:$0xff] }
 0x52d   : > { %12266 = vmatpush1.bf16.msra.mxu0 %v12265_v46  ;;  %7411 = vmatprep.mubr.f32.mxu0 %v16487_v43  ;;  %v12291_v15 = vpack.c.bf16 %v10509_v59, %v10505_v61  ;;  %v10507_v46 = vld [vmem:[%s16416_s5 + $0x678] sm:$0xff]  ;;  %v12301_v19 = vpack.c.bf16 %v10502_v6, %v10498_v14  ;;  %v12994_v61 = vmov 1966171168   ;;  %v10544_v14 = vld [vmem:[%s16416_s5 + $0x770] sm:$0xff] }
 0x52e   : > { %12268 = vmatprep.subr.bf16.mxu0 %v12267_v2  ;;  %v10511_v2 = vld [vmem:[%s16416_s5 + $0x698] sm:$0xff]  ;;  %v6167_v59 = vunpack.c.l.s4 %v12994_v61  ;;  %v10570_v61 = vld [vmem:[%s16416_s5 + $0x810] sm:$0xff] }
 0x52f   : > { %v10549_v6 = vld [vmem:[%s16416_s5 + $0x798] sm:$0xff]  ;;  %v10578_v16 = vld [vmem:[%s16416_s5 + $0x850] sm:$0xff] }
 0x530   : > { %v6168_v30 = vunpack.c.0.s8 %v6167_v59  ;;  %v10575_v59 = vld [vmem:[%s16416_s5 + $0x838] sm:$0xff] }
 0x531   : > { %12270 = vmatpush1.bf16.msra.mxu0 %v12269_v63  ;;  %v12303_v63 = vpack.c.bf16 %v10511_v2, %v10507_v46 }
 0x532   : > { %12272 = vmatprep.subr.bf16.mxu0 %v12271_v44  ;;  %v10506_v44 = vld [vmem:[%s16416_s5 + $0x670] sm:$0xff] }
 0x535   : > { %12274 = vmatpush1.bf16.msra.mxu0 %v12273_v41  ;;  %v12305_v41 = vpack.c.bf16 %v10510_v42, %v10506_v44 }
 0x536   : > { %10490 = vmatprep.subr.msk.mxu0 %vm6005_vm6, %v10487_v1  ;;  %v12307_v1 = vpack.c.bf16 %v10519_v32, %v10515_v8 }
 0x539   : > { %10491 = vmatpush1.msk.msra.mxu0 %vm6005_vm6, %v10486_v10  ;;  %v10534_v10 = vld [vmem:[%s16416_s5 + $0x720] sm:$0xff] }
 0x53a   : > { %10492 = vmatmul.mubr.msk.f32.vlgmr.msra.gmra.mrb[88].mxu0 %vm6001_vm7, %v7332_v58  ;;  %12276 = vmatprep.subr.bf16.mxu0 %v12275_v26  ;;  %v10539_v26 = vld [vmem:[%s16416_s5 + $0x748] sm:$0xff]  ;;  %v12313_v5 = vpack.c.bf16 %v10534_v10, %v10530_v20  ;;  %v10556_v20 = vld [vmem:[%s16416_s5 + $0x7d0] sm:$0x3]  ;;  %v12335_v10 = vpack.c.bf16 %v10569_v22, %v10565_v25 }
 0x53b   : > { %12278 = vmatpush1.bf16.msra.mxu0 %v12277_v53  ;;  %7482 = vmatprep.mubr.f32.mxu0 %v16487_v43  ;;  %v10543_v53 = vld [vmem:[%s16416_s5 + $0x768] sm:$0xff] }
 0x53c   : > { %12280 = vmatprep.subr.bf16.mxu0 %v12279_v38  ;;  %v12311_v38 = vpack.c.bf16 %v10535_v0, %v10531_v9  ;;  %v12315_v7 = vpack.c.bf16 %v10543_v53, %v10539_v26  ;;  %v10573_v9 = vld [vmem:[%s16416_s5 + $0x828] sm:$0xff] }
 0x53d   : > { %v10577_v0 = vld [vmem:[%s16416_s5 + $0x848] sm:$0xff] }
 0x53e   : > { %v12339_v53 = vpack.c.bf16 %v10577_v0, %v10573_v9  ;;  %v10607_v25 = vld [vmem:[%s16416_s5 + $0x908] sm:$0xff] }
 0x53f   : > { %12282 = vmatpush1.bf16.msra.mxu0 %v12281_v40  ;;  %v10547_v40 = vld [vmem:[%s16416_s5 + $0x788] sm:$0xff] }
 0x540   : > { %12284 = vmatprep.subr.bf16.mxu0 %v12283_v23  ;;  %v10551_v23 = vld [vmem:[%s16416_s5 + $0x7a8] sm:$0xff] }
 0x541   : > { %v10611_v22 = vld [vmem:[%s16416_s5 + $0x928] sm:$0xff] }
 0x543   : > { %12286 = vmatpush1.bf16.msra.mxu0 %v12285_v48 }
 0x544   : > { %10493 = vmatprep.subr.msk.mxu0 %vm6005_vm6, %v10489_v4  ;;  %v12319_v4 = vpack.c.bf16 %v10551_v23, %v10547_v40 }
 0x547   : > { %10494 = vmatpush1.msk.msra.mxu0 %vm6005_vm6, %v10488_v33  ;;  %v6169_v33 = vlaneseq }
 0x548   : > { %10495 = vmatmul.mubr.msk.f32.vlgmr.msra.gmra.mrb[90].mxu0 %vm6001_vm7, %v7332_v58  ;;  %12288 = vmatprep.subr.bf16.mxu0 %v12287_v47  ;;  %v10522_v58 = vld [vmem:[%s16416_s5 + $0x6f0] sm:$0x3]  ;;  %v10555_v47 = vld [vmem:[%s16416_s5 + $0x7c8] sm:$0x3] }
 0x549   : > { %12290 = vmatpush1.bf16.msra.mxu0 %v12289_v49  ;;  %7627 = vmatprep.mubr.f32.mxu0 %v16487_v43  ;;  %v10533_v49 = vld [vmem:[%s16416_s5 + $0x718] sm:$0xff]  ;;  %v15366_v21 = vshrl.u32 %v6169_v33, 7 }
 0x54a   : > { %12292 = vmatprep.subr.bf16.mxu0 %v12291_v15  ;;  %v10537_v15 = vld [vmem:[%s16416_s5 + $0x738] sm:$0xff] }
 0x54b   : > { %v15387_v46 = vsub.s32 %v6168_v30, %v15366_v21  ;;  %v10579_v33 = vld [vmem:[%s16416_s5 + $0x858] sm:$0xff] }
 0x54d   : > { %12294 = vmatpush1.bf16.msra.mxu0 %v12293_v3  ;;  %v10554_v3 = vld [vmem:[%s16416_s5 + $0x7c0] sm:$0x3] }
 0x54e   : > { %12296 = vmatprep.subr.bf16.mxu0 %v12295_v54  ;;  %v12323_v54 = vpack.c.bf16 %v10537_v15, %v10533_v49 }
 0x551   : > { %12298 = vmatpush1.bf16.msra.mxu0 %v12297_v17  ;;  %v12325_v17 = vpack.c.bf16 %v10536_v36, %v10532_v18  ;;  %v12351_v36 = vpack.c.bf16 %v10579_v33, %v10575_v59  ;;  %v10622_v59 = vld [vmem:[%s16416_s5 + $0x980] sm:$0x3] }
 0x552   : > { %10524 = vmatprep.subr.msk.mxu0 %vm6005_vm6, %v10521_v24  ;;  %v15369_v24 = vmax.f32 %v14638_v57, 0.0  ;;  %v10553_v57 = vld [vmem:[%s16416_s5 + $0x7b8] sm:$0xff] }
 0x554   : > { %v7993_v18 = vrot.slane %v15369_v24, 2 }
 0x555   : > { %10525 = vmatpush1.msk.msra.mxu0 %vm6005_vm6, %v10520_v55  ;;  %v12329_v55 = vpack.c.bf16 %v10544_v14, %v10540_v62  ;;  %v10582_v62 = vld [vmem:[%s16416_s5 + $0x870] sm:$0xff] }
 0x556   : > { %10526 = vmatmul.mubr.msk.f32.vlgmr.msra.gmra.mrb[92].mxu0 %vm6001_vm7, %v7548_v52  ;;  %12300 = vmatprep.subr.bf16.mxu0 %v12299_v39  ;;  %v10586_v14 = vld [vmem:[%s16416_s5 + $0x890] sm:$0xff] }
 0x557   : > { %12302 = vmatpush1.bf16.msra.mxu0 %v12301_v19  ;;  %7698 = vmatprep.mubr.f32.mxu0 %v16487_v43  ;;  %v12331_v19 = vpack.c.bf16 %v10553_v57, %v10549_v6 }
 0x558   : > { %12304 = vmatprep.subr.bf16.mxu0 %v12303_v63  ;;  %v10552_v63 = vld [vmem:[%s16416_s5 + $0x7b0] sm:$0xff] }
 0x55b   : > { %12306 = vmatpush1.bf16.msra.mxu0 %v12305_v41 }
 0x55c   : > { %12308 = vmatprep.subr.bf16.mxu0 %v12307_v1  ;;  %v10557_v1 = vld [vmem:[%s16416_s5 + $0x7d8] sm:$0x3] }
 0x55f   : > { %12310 = vmatpush1.bf16.msra.mxu0 %v12309_v13  ;;  %v10564_v13 = vld [vmem:[%s16416_s5 + $0x7e0] sm:$0xff] }
 0x560   : > { %10527 = vmatprep.subr.msk.mxu0 %vm6005_vm6, %v10523_v56  ;;  %v10568_v56 = vld [vmem:[%s16416_s5 + $0x800] sm:$0xff] }
 0x561   : > { %v12337_v26 = vpack.c.bf16 %v10568_v56, %v10564_v13  ;;  %v10590_v13 = vld [vmem:[%s16416_s5 + $0x8b0] sm:$0x3] }
 0x563   : > { %10528 = vmatpush1.msk.msra.mxu0 %vm6005_vm6, %v10522_v58  ;;  %v10572_v58 = vld [vmem:[%s16416_s5 + $0x820] sm:$0xff] }
 0x564   : > { %10529 = vmatmul.mubr.msk.f32.vlgmr.msra.gmra.mrb[94].mxu0 %vm6001_vm7, %v7548_v52  ;;  %12312 = vmatprep.subr.bf16.mxu0 %v12311_v38  ;;  %v10548_v52 = vld [vmem:[%s16416_s5 + $0x790] sm:$0xff]  ;;  %v10576_v38 = vld [vmem:[%s16416_s5 + $0x840] sm:$0xff] }
 0x565   : > { %12314 = vmatpush1.bf16.msra.mxu0 %v12313_v5  ;;  %v6084_v51 = vpop.f32.mrb[64].mxu0  ;;  %7856 = vmatprep.mubr.f32.mxu0 %v16487_v43  ;;  %v12333_v32 = vpack.c.bf16 %v10552_v63, %v10548_v52  ;;  %v10581_v5 = vld [vmem:[%s16416_s5 + $0x868] sm:$0xff]  ;;  %v12341_v11 = vpack.c.bf16 %v10576_v38, %v10572_v58  ;;  %v10591_v63 = vld [vmem:[%s16416_s5 + $0x8b8] sm:$0x3] }
 0x566   : > { %v6086_v48 = vpop.f32.mrb[65].mxu0  ;;  %12316 = vmatprep.subr.bf16.mxu0 %v12315_v7  ;;  %v10585_v7 = vld [vmem:[%s16416_s5 + $0x888] sm:$0xff] }
 0x567   : > { %v6164_v45 = vcombine.low %v6084_v51, %v6086_v48  ;;  %v12343_v23 = vpack.c.bf16 %v10585_v7, %v10581_v5  ;;  %v10580_v51 = vld [vmem:[%s16416_s5 + $0x860] sm:$0xff]  ;;  %v10619_v58 = vld [vmem:[%s16416_s5 + $0x968] sm:$0xff] }
 0x569   : > { %12318 = vmatpush1.bf16.msra.mxu0 %v12317_v60  ;;  %v15397_v42 = vrot.slane %v6164_v45, %v15387_v46  ;;  %v10584_v60 = vld [vmem:[%s16416_s5 + $0x880] sm:$0xff]  ;;  %v10571_v45 = vld [vmem:[%s16416_s5 + $0x818] sm:$0xff] }
 0x56a   : > { %12320 = vmatprep.subr.bf16.mxu0 %v12319_v4  ;;  %v12345_v4 = vpack.c.bf16 %v10584_v60, %v10580_v51  ;;  %v12347_v49 = vpack.c.bf16 %v10571_v45, %v10567_v35  ;;  %v10623_v60 = vld [vmem:[%s16416_s5 + $0x988] sm:$0x3]  ;;  %v10600_v35 = vld [vmem:[%s16416_s5 + $0x8d0] sm:$0xff] }
 0x56b   : > { %v10604_v45 = vld [vmem:[%s16416_s5 + $0x8f0] sm:$0xff] }
 0x56d   : > { %12322 = vmatpush1.bf16.msra.mxu0 %v12321_v29  ;;  %v10566_v29 = vld [vmem:[%s16416_s5 + $0x7f0] sm:$0xff] }
 0x56e   : > { %10558 = vmatprep.subr.msk.mxu0 %vm6005_vm6, %v10555_v47  ;;  %v10588_v47 = vld [vmem:[%s16416_s5 + $0x8a0] sm:$0x3]  ;;  %v12349_v15 = vpack.c.bf16 %v10570_v61, %v10566_v29  ;;  %v10609_v29 = vld [vmem:[%s16416_s5 + $0x918] sm:$0xff] }
 0x56f   : > { %v10613_v61 = vld [vmem:[%s16416_s5 + $0x938] sm:$0xff] }
 0x571   : > { %10559 = vmatpush1.msk.msra.mxu0 %vm6005_vm6, %v10554_v3  ;;  %v10583_v3 = vld [vmem:[%s16416_s5 + $0x878] sm:$0xff] }
 0x572   : > { %10560 = vmatmul.mubr.msk.f32.vlgmr.msra.gmra.mrb[96].mxu0 %vm6001_vm7, %v15369_v24  ;;  %12324 = vmatprep.subr.bf16.mxu0 %v12323_v54  ;;  %v10587_v54 = vld [vmem:[%s16416_s5 + $0x898] sm:$0xff] }
 0x573   : > { %v6155_v2 = vpop.f32.mrb[66].mxu0  ;;  %12326 = vmatpush1.bf16.msra.mxu0 %v12325_v17  ;;  %7927 = vmatprep.mubr.f32.mxu0 %v16487_v43  ;;  %v12353_v17 = vpack.c.bf16 %v10578_v16, %v10574_v37  ;;  %v10617_v37 = vld [vmem:[%s16416_s5 + $0x958] sm:$0xff] }
 0x574   : > { %v6157_v39 = vpop.f32.mrb[67].mxu0  ;;  %12328 = vmatprep.subr.bf16.mxu0 %v12327_v12  ;;  %v12355_v12 = vpack.c.bf16 %v10587_v54, %v10583_v3  ;;  %v10621_v16 = vld [vmem:[%s16416_s5 + $0x978] sm:$0xff] }
 0x575   : > { %v6165_v44 = vcombine.low %v6155_v2, %v6157_v39  ;;  %v12357_v39 = vpack.c.bf16 %v10586_v14, %v10582_v62 }
 0x577   : > { %v15400_v8 = vrot.slane %v6165_v44, %v15387_v46  ;;  %12330 = vmatpush1.bf16.msra.mxu0 %v12329_v55  ;;  %v10599_v44 = vld [vmem:[%s16416_s5 + $0x8c8] sm:$0xff] }
 0x578   : > { %12332 = vmatprep.subr.bf16.mxu0 %v12331_v19  ;;  %v5959_v19 = vld [vmem:[%s16417_s6] sm:$0xf] }
 0x579   : > { %v6180_v41 = vcombine.low %v15397_v42, %v15400_v8  ;;  %v10603_v42 = vld [vmem:[%s16416_s5 + $0x8e8] sm:$0xff]  ;;  %v10598_v8 = vld [vmem:[%s16416_s5 + $0x8c0] sm:$0xff] }
 0x57a   : > { %v12359_v56 = vpack.c.bf16 %v10603_v42, %v10599_v44  ;;  %v10641_v42 = vld [vmem:[%s16416_s5 + $0x9e8] sm:$0xff] }
 0x57b   : > { %12334 = vmatpush1.bf16.msra.mxu0 %v12333_v32  ;;  %v6187_v57 = vrot.slane %v6180_v41, %v15387_v46  ;;  %v10602_v32 = vld [vmem:[%s16416_s5 + $0x8e0] sm:$0xff] }
 0x57c   : > { %10561 = vmatprep.subr.msk.mxu0 %vm6005_vm6, %v10557_v1  ;;  %v12361_v0 = vpack.c.bf16 %v10602_v32, %v10598_v8  ;;  %v10645_v8 = vld [vmem:[%s16416_s5 + $0xa08] sm:$0xff]  ;;  %v10624_v32 = vld [vmem:[%s16416_s5 + $0x990] sm:$0x3] }
 0x57d   : > { %v6189_v41 = vadd.f32 %v6187_v57, %v5959_v19  ;;  %v10637_v19 = vld [vmem:[%s16416_s5 + $0x9c8] sm:$0xff] }
 0x57f   : > { %10562 = vmatpush1.msk.msra.mxu0 %vm6005_vm6, %v10556_v20  ;;  %v12363_v20 = vpack.c.bf16 %v10611_v22, %v10607_v25  ;;  %v12387_v22 = vpack.c.bf16 %v10645_v8, %v10641_v42  ;;  %v10674_v42 = vld [vmem:[%s16416_s5 + $0xac0] sm:$0xff] }
 0x580   : > { %10563 = vmatmul.mubr.msk.f32.vlgmr.msra.gmra.mrb[98].mxu0 %vm6001_vm7, %v15369_v24  ;;  %12336 = vmatprep.subr.bf16.mxu0 %v12335_v10  ;;  %v10606_v10 = vld [vmem:[%s16416_s5 + $0x900] sm:$0xff] }
 0x581   : > { %v6300_v27 = vpop.f32.mrb[68].mxu0  ;;  %12338 = vmatpush1.bf16.msra.mxu0 %v12337_v26  ;;  %8072 = vmatprep.mubr.f32.mxu0 %v16487_v43  ;;  %v10610_v26 = vld [vmem:[%s16416_s5 + $0x920] sm:$0xff] }
 0x582   : > { %v6302_v40 = vpop.f32.mrb[69].mxu0  ;;  %12340 = vmatprep.subr.bf16.mxu0 %v12339_v53  ;;  %v10615_v53 = vld [vmem:[%s16416_s5 + $0x948] sm:$0xff]  ;;  %v12365_v5 = vpack.c.bf16 %v10610_v26, %v10606_v10  ;;  %v10678_v8 = vld [vmem:[%s16416_s5 + $0xae0] sm:$0xff] }
 0x583   : > { %v6380_v48 = vcombine.low %v6300_v27, %v6302_v40  ;;  %v12367_v27 = vpack.c.bf16 %v10619_v58, %v10615_v53  ;;  %v10618_v40 = vld [vmem:[%s16416_s5 + $0x960] sm:$0xff] }
 0x584   : > { %v10648_v58 = vld [vmem:[%s16416_s5 + $0xa20] sm:$0xff] }
 0x585   : > { %12342 = vmatpush1.bf16.msra.mxu0 %v12341_v11  ;;  %v6388_v2 = vrot.slane %v6380_v48, %v15387_v46  ;;  %v10614_v11 = vld [vmem:[%s16416_s5 + $0x940] sm:$0xff]  ;;  %v10601_v48 = vld [vmem:[%s16416_s5 + $0x8d8] sm:$0xff] }
 0x586   : > { %12344 = vmatprep.subr.bf16.mxu0 %v12343_v23  ;;  %v12369_v51 = vpack.c.bf16 %v10618_v40, %v10614_v11  ;;  %v10635_v11 = vld [vmem:[%s16416_s5 + $0x9b8] sm:$0xff] }
 0x587   : > { %v10639_v40 = vld [vmem:[%s16416_s5 + $0x9d8] sm:$0xff] }
 0x589   : > { %12346 = vmatpush1.bf16.msra.mxu0 %v12345_v4  ;;  %v10605_v4 = vld [vmem:[%s16416_s5 + $0x8f8] sm:$0xff] }
 0x58a   : > { %10592 = vmatprep.subr.msk.mxu0 %vm6005_vm6, %v10589_v28  ;;  %v8188_v28 = vmax.f32 %v14667_v31, 0.0  ;;  %v12371_v33 = vpack.c.bf16 %v10605_v4, %v10601_v48  ;;  %v10647_v48 = vld [vmem:[%s16416_s5 + $0xa18] sm:$0xff]  ;;  %v10656_v4 = vld [vmem:[%s16416_s5 + $0xa60] sm:$0x3] }
 0x58b   : > { %v10655_v31 = vld [vmem:[%s16416_s5 + $0xa58] sm:$0xff] }
 0x58d   : > { %10593 = vmatpush1.msk.msra.mxu0 %vm6005_vm6, %v10588_v47  ;;  %v12373_v47 = vpack.c.bf16 %v10604_v45, %v10600_v35  ;;  %v12395_v35 = vpack.c.bf16 %v10639_v40, %v10635_v11 }
 0x58e   : > { %10594 = vmatmul.mubr.msk.f32.vlgmr.msra.gmra.mrb[100].mxu0 %vm6001_vm7, %v7993_v18  ;;  %12348 = vmatprep.subr.bf16.mxu0 %v12347_v49  ;;  %v8219_v49 = vrot.slane %v8188_v28, 4 }
 0x58f   : > { %v6371_v30 = vpop.f32.mrb[70].mxu0  ;;  %12350 = vmatpush1.bf16.msra.mxu0 %v12349_v15  ;;  %8143 = vmatprep.mubr.f32.mxu0 %v16487_v43  ;;  %v12375_v15 = vpack.c.bf16 %v10613_v61, %v10609_v29  ;;  %v8435_v29 = vrot.slane %v8188_v28, 6 }
 0x590   : > { %v6373_v24 = vpop.f32.mrb[71].mxu0  ;;  %12352 = vmatprep.subr.bf16.mxu0 %v12351_v36  ;;  %v10612_v36 = vld [vmem:[%s16416_s5 + $0x930] sm:$0xff] }
 0x591   : > { %v6381_v6 = vcombine.low %v6371_v30, %v6373_v24  ;;  %v10616_v24 = vld [vmem:[%s16416_s5 + $0x950] sm:$0xff] }
 0x593   : > { %v6395_v55 = vrot.slane %v6381_v6, %v15387_v46  ;;  %12354 = vmatpush1.bf16.msra.mxu0 %v12353_v17  ;;  %v12379_v17 = vpack.c.bf16 %v10621_v16, %v10617_v37  ;;  %v10654_v37 = vld [vmem:[%s16416_s5 + $0xa50] sm:$0xff] }
 0x594   : > { %12356 = vmatprep.subr.bf16.mxu0 %v12355_v12  ;;  %v10620_v12 = vld [vmem:[%s16416_s5 + $0x970] sm:$0xff] }
 0x595   : > { %v6396_v52 = vcombine.low %v6388_v2, %v6395_v55  ;;  %v12381_v57 = vpack.c.bf16 %v10620_v12, %v10616_v24  ;;  %v10625_v55 = vld [vmem:[%s16416_s5 + $0x998] sm:$0x3]  ;;  %v10667_v12 = vld [vmem:[%s16416_s5 + $0xa88] sm:$0xff] }
 0x596   : > { %v10659_v24 = vld [vmem:[%s16416_s5 + $0xa78] sm:$0x3] }
 0x597   : > { %v6403_v1 = vrot.slane %v6396_v52, %v15387_v46  ;;  %12358 = vmatpush1.bf16.msra.mxu0 %v12357_v39  ;;  %v10633_v39 = vld [vmem:[%s16416_s5 + $0x9a8] sm:$0xff]  ;;  %v10632_v52 = vld [vmem:[%s16416_s5 + $0x9a0] sm:$0xff] }
 0x598   : > { %10595 = vmatprep.subr.msk.mxu0 %vm6005_vm6, %v10591_v63  ;;  %v10636_v63 = vld [vmem:[%s16416_s5 + $0x9c0] sm:$0xff] }
 0x599   : > { %v15533_v9 = vadd.f32 %v6403_v1, %v6189_v41  ;;  %v12383_v41 = vpack.c.bf16 %v10637_v19, %v10633_v39  ;;  %v12385_v25 = vpack.c.bf16 %v10636_v63, %v10632_v52  ;;  %v10658_v39 = vld [vmem:[%s16416_s5 + $0xa70] sm:$0x3] }
 0x59b   : > { %10596 = vmatpush1.msk.msra.mxu0 %vm6005_vm6, %v10590_v13  ;;  %v10640_v13 = vld [vmem:[%s16416_s5 + $0x9e0] sm:$0xff] }
 0x59c   : > { %10597 = vmatmul.mubr.msk.f32.vlgmr.msra.gmra.mrb[102].mxu0 %vm6001_vm7, %v7993_v18  ;;  %12360 = vmatprep.subr.bf16.mxu0 %v12359_v56  ;;  %v10608_v18 = vld [vmem:[%s16416_s5 + $0x910] sm:$0xff]  ;;  %v10644_v56 = vld [vmem:[%s16416_s5 + $0xa00] sm:$0xff] }
 0x59d   : > { %v6526_v38 = vpop.f32.mrb[72].mxu0  ;;  %12362 = vmatpush1.bf16.msra.mxu0 %v12361_v0  ;;  %8298 = vmatprep.mubr.f32.mxu0 %v16487_v43  ;;  %v12377_v54 = vpack.c.bf16 %v10612_v36, %v10608_v18  ;;  %v10649_v0 = vld [vmem:[%s16416_s5 + $0xa28] sm:$0xff]  ;;  %v12389_v10 = vpack.c.bf16 %v10644_v56, %v10640_v13  ;;  %v10650_v36 = vld [vmem:[%s16416_s5 + $0xa30] sm:$0xff]  ;;  %v10682_v56 = vld [vmem:[%s16416_s5 + $0xb00] sm:$0xff] }
 0x59e   : > { %v6528_v7 = vpop.f32.mrb[73].mxu0  ;;  %12364 = vmatprep.subr.bf16.mxu0 %v12363_v20 }
 0x59f   : > { %v6606_v23 = vcombine.low %v6526_v38, %v6528_v7  ;;  %v10652_v38 = vld [vmem:[%s16416_s5 + $0xa40] sm:$0xff] }
 0x5a0   : > { %v12393_v7 = vpack.c.bf16 %v10652_v38, %v10648_v58  ;;  %v10668_v58 = vld [vmem:[%s16416_s5 + $0xa90] sm:$0xff] }
 0x5a1   : > { %12366 = vmatpush1.bf16.msra.mxu0 %v12365_v5  ;;  %v6614_v14 = vrot.slane %v6606_v23, %v15387_v46  ;;  %v10634_v23 = vld [vmem:[%s16416_s5 + $0x9b0] sm:$0xff] }
 0x5a2   : > { %12368 = vmatprep.subr.bf16.mxu0 %v12367_v27  ;;  %v10657_v27 = vld [vmem:[%s16416_s5 + $0xa68] sm:$0x3]  ;;  %v10672_v38 = vld [vmem:[%s16416_s5 + $0xab0] sm:$0xff] }
 0x5a3   : > { %v12421_v40 = vpack.c.bf16 %v10672_v38, %v10668_v58  ;;  %v10710_v38 = vld [vmem:[%s16416_s5 + $0xbb0] sm:$0xff] }
 0x5a5   : > { %12370 = vmatpush1.bf16.msra.mxu0 %v12369_v51  ;;  %v10638_v51 = vld [vmem:[%s16416_s5 + $0x9d0] sm:$0xff] }
 0x5a6   : > { %10626 = vmatprep.subr.msk.mxu0 %vm6005_vm6, %v10623_v60  ;;  %v10643_v60 = vld [vmem:[%s16416_s5 + $0x9f8] sm:$0xff]  ;;  %v12397_v45 = vpack.c.bf16 %v10638_v51, %v10634_v23  ;;  %v15783_v23 = vmax.f32 %v14678_v34, 0.0 }
 0x5a7   : > { %v12399_v61 = vpack.c.bf16 %v10647_v48, %v10643_v60  ;;  %v10676_v60 = vld [vmem:[%s16416_s5 + $0xad0] sm:$0xff]  ;;  %v10689_v34 = vld [vmem:[%s16416_s5 + $0xb38] sm:$0xff] }
 0x5a8   : > { %v10680_v48 = vld [vmem:[%s16416_s5 + $0xaf0] sm:$0xff] }
 0x5a9   : > { %10627 = vmatpush1.msk.msra.mxu0 %vm6005_vm6, %v10622_v59  ;;  %v10642_v59 = vld [vmem:[%s16416_s5 + $0x9f0] sm:$0xff] }
 0x5aa   : > { %10628 = vmatmul.mubr.msk.f32.vlgmr.msra.gmra.mrb[104].mxu0 %vm6001_vm7, %v8219_v49  ;;  %12372 = vmatprep.subr.bf16.mxu0 %v12371_v33  ;;  %v10646_v33 = vld [vmem:[%s16416_s5 + $0xa10] sm:$0xff] }
 0x5ab   : > { %v6597_v3 = vpop.f32.mrb[74].mxu0  ;;  %12374 = vmatpush1.bf16.msra.mxu0 %v12373_v47  ;;  %8369 = vmatprep.mubr.f32.mxu0 %v16487_v43  ;;  %v10651_v47 = vld [vmem:[%s16416_s5 + $0xa38] sm:$0xff] }
 0x5ac   : > { %v6599_v30 = vpop.f32.mrb[75].mxu0  ;;  %12376 = vmatprep.subr.bf16.mxu0 %v12375_v15  ;;  %v12403_v18 = vpack.c.bf16 %v10655_v31, %v10651_v47 }
 0x5ad   : > { %v6607_v62 = vcombine.low %v6597_v3, %v6599_v30  ;;  %v12405_v30 = vpack.c.bf16 %v10654_v37, %v10650_v36  ;;  %v10701_v36 = vld [vmem:[%s16416_s5 + $0xb68] sm:$0xff] }
 0x5ae   : > { %v10705_v37 = vld [vmem:[%s16416_s5 + $0xb88] sm:$0xff] }
 0x5af   : > { %v6621_v6 = vrot.slane %v6607_v62, %v15387_v46  ;;  %12378 = vmatpush1.bf16.msra.mxu0 %v12377_v54  ;;  %v10671_v62 = vld [vmem:[%s16416_s5 + $0xaa8] sm:$0xff] }
 0x5b0   : > { %12380 = vmatprep.subr.bf16.mxu0 %v12379_v17  ;;  %v12407_v19 = vpack.c.bf16 %v10671_v62, %v10667_v12  ;;  %v12431_v12 = vpack.c.bf16 %v10705_v37, %v10701_v36 }
 0x5b1   : > { %v6622_v2 = vcombine.low %v6614_v14, %v6621_v6  ;;  %v10666_v14 = vld [vmem:[%s16416_s5 + $0xa80] sm:$0xff] }
 0x5b2   : > { %v10670_v6 = vld [vmem:[%s16416_s5 + $0xaa0] sm:$0xff] }
 0x5b3   : > { %v6629_v44 = vrot.slane %v6622_v2, %v15387_v46  ;;  %12382 = vmatpush1.bf16.msra.mxu0 %v12381_v57  ;;  %v10675_v2 = vld [vmem:[%s16416_s5 + $0xac8] sm:$0xff]  ;;  %v12409_v63 = vpack.c.bf16 %v10670_v6, %v10666_v14 }
 0x5b4   : > { %10629 = vmatprep.subr.msk.mxu0 %vm6005_vm6, %v10625_v55  ;;  %v10679_v55 = vld [vmem:[%s16416_s5 + $0xae8] sm:$0xff] }
 0x5b5   : > { %v15634_v1 = vadd.f32 %v6629_v44, %v15533_v9  ;;  %v10653_v9 = vld [vmem:[%s16416_s5 + $0xa48] sm:$0xff]  ;;  %v12411_v44 = vpack.c.bf16 %v10679_v55, %v10675_v2  ;;  %v10712_v2 = vld [vmem:[%s16416_s5 + $0xbc0] sm:$0xff] }
 0x5b6   : > { %v12391_v53 = vpack.c.bf16 %v10653_v9, %v10649_v0  ;;  %v10686_v0 = vld [vmem:[%s16416_s5 + $0xb20] sm:$0xff]  ;;  %v10717_v55 = vld [vmem:[%s16416_s5 + $0xbe8] sm:$0xff] }
 0x5b7   : > { %10630 = vmatpush1.msk.msra.mxu0 %vm6005_vm6, %v10624_v32  ;;  %v10683_v32 = vld [vmem:[%s16416_s5 + $0xb08] sm:$0xff] }
 0x5b8   : > { %10631 = vmatmul.mubr.msk.f32.vlgmr.msra.gmra.mrb[106].mxu0 %vm6001_vm7, %v8219_v49  ;;  %12384 = vmatprep.subr.bf16.mxu0 %v12383_v41  ;;  %v12401_v49 = vpack.c.bf16 %v10646_v33, %v10642_v59  ;;  %v10687_v41 = vld [vmem:[%s16416_s5 + $0xb28] sm:$0xff]  ;;  %v10684_v59 = vld [vmem:[%s16416_s5 + $0xb10] sm:$0xff] }
 0x5b9   : > { %v6742_v20 = vpop.f32.mrb[76].mxu0  ;;  %12386 = vmatpush1.bf16.msra.mxu0 %v12385_v25  ;;  %8514 = vmatprep.mubr.f32.mxu0 %v16487_v43  ;;  %v12413_v25 = vpack.c.bf16 %v10678_v8, %v10674_v42  ;;  %v12415_v13 = vpack.c.bf16 %v10687_v41, %v10683_v32  ;;  %v10688_v33 = vld [vmem:[%s16416_s5 + $0xb30] sm:$0xff]  ;;  %v10716_v42 = vld [vmem:[%s16416_s5 + $0xbe0] sm:$0xff] }
 0x5ba   : > { %v6744_v26 = vpop.f32.mrb[77].mxu0  ;;  %12388 = vmatprep.subr.bf16.mxu0 %v12387_v22  ;;  %v10720_v8 = vld [vmem:[%s16416_s5 + $0xc00] sm:$0xff] }
 0x5bb   : > { %v6822_v5 = vcombine.low %v6742_v20, %v6744_v26  ;;  %v12417_v20 = vpack.c.bf16 %v10686_v0, %v10682_v56  ;;  %v10669_v26 = vld [vmem:[%s16416_s5 + $0xa98] sm:$0xff]  ;;  %v12441_v41 = vpack.c.bf16 %v10720_v8, %v10716_v42  ;;  %v10706_v56 = vld [vmem:[%s16416_s5 + $0xb90] sm:$0xff] }
 0x5bc   : > { %v10711_v0 = vld [vmem:[%s16416_s5 + $0xbb8] sm:$0xff]  ;;  %v10736_v42 = vld [vmem:[%s16416_s5 + $0xc50] sm:$0xff] }
 0x5bd   : > { %12390 = vmatpush1.bf16.msra.mxu0 %v12389_v10  ;;  %v6830_v3 = vrot.slane %v6822_v5, %v15387_v46  ;;  %v10691_v10 = vld [vmem:[%s16416_s5 + $0xb48] sm:$0x3]  ;;  %v10677_v5 = vld [vmem:[%s16416_s5 + $0xad8] sm:$0xff]  ;;  %v10740_v8 = vld [vmem:[%s16416_s5 + $0xc70] sm:$0xff] }
 0x5be   : > { %12392 = vmatprep.subr.bf16.mxu0 %v12391_v53  ;;  %v10673_v53 = vld [vmem:[%s16416_s5 + $0xab8] sm:$0xff] }
 0x5bf   : > { %v12419_v11 = vpack.c.bf16 %v10673_v53, %v10669_v26  ;;  %v8880_v53 = vrot.slane %v15783_v23, 2 }
 0x5c1   : > { %12394 = vmatpush1.bf16.msra.mxu0 %v12393_v7  ;;  %v10681_v7 = vld [vmem:[%s16416_s5 + $0xaf8] sm:$0xff] }
 0x5c2   : > { %10660 = vmatprep.subr.msk.mxu0 %vm6005_vm6, %v10657_v27  ;;  %v10690_v27 = vld [vmem:[%s16416_s5 + $0xb40] sm:$0x3]  ;;  %v12423_v51 = vpack.c.bf16 %v10681_v7, %v10677_v5  ;;  %v10714_v5 = vld [vmem:[%s16416_s5 + $0xbd0] sm:$0xff]  ;;  %v10719_v7 = vld [vmem:[%s16416_s5 + $0xbf8] sm:$0xff] }
 0x5c5   : > { %10661 = vmatpush1.msk.msra.mxu0 %vm6005_vm6, %v10656_v4  ;;  %v10685_v4 = vld [vmem:[%s16416_s5 + $0xb18] sm:$0xff] }
 0x5c6   : > { %10662 = vmatmul.mubr.msk.f32.vlgmr.msra.gmra.mrb[108].mxu0 %vm6001_vm7, %v8435_v29  ;;  %12396 = vmatprep.subr.bf16.mxu0 %v12395_v35 }
 0x5c7   : > { %v6813_v28 = vpop.f32.mrb[78].mxu0  ;;  %12398 = vmatpush1.bf16.msra.mxu0 %v12397_v45  ;;  %8585 = vmatprep.mubr.f32.mxu0 %v16487_v43  ;;  %v12425_v45 = vpack.c.bf16 %v10680_v48, %v10676_v60  ;;  %v10718_v60 = vld [vmem:[%s16416_s5 + $0xbf0] sm:$0xff] }
 0x5c8   : > { %v6815_v15 = vpop.f32.mrb[79].mxu0  ;;  %12400 = vmatprep.subr.bf16.mxu0 %v12399_v61  ;;  %v12427_v61 = vpack.c.bf16 %v10689_v34, %v10685_v4  ;;  %v10722_v48 = vld [vmem:[%s16416_s5 + $0xc10] sm:$0xff] }
 0x5c9   : > { %v6823_v16 = vcombine.low %v6813_v28, %v6815_v15 }
 0x5cb   : > { %v6837_v54 = vrot.slane %v6823_v16, %v15387_v46  ;;  %12402 = vmatpush1.bf16.msra.mxu0 %v12401_v49  ;;  %v12429_v49 = vpack.c.bf16 %v10688_v33, %v10684_v59  ;;  %v10700_v16 = vld [vmem:[%s16416_s5 + $0xb60] sm:$0xff]  ;;  %v10735_v59 = vld [vmem:[%s16416_s5 + $0xc48] sm:$0xff] }
 0x5cc   : > { %12404 = vmatprep.subr.bf16.mxu0 %v12403_v18  ;;  %v10693_v18 = vld [vmem:[%s16416_s5 + $0xb58] sm:$0x3]  ;;  %v10739_v33 = vld [vmem:[%s16416_s5 + $0xc68] sm:$0xff] }
 0x5cd   : > { %v6838_v17 = vcombine.low %v6830_v3, %v6837_v54  ;;  %v10704_v3 = vld [vmem:[%s16416_s5 + $0xb80] sm:$0xff]  ;;  %v12455_v36 = vpack.c.bf16 %v10739_v33, %v10735_v59  ;;  %v10760_v59 = vld [vmem:[%s16416_s5 + $0xd10] sm:$0x3] }
 0x5ce   : > { %v12433_v14 = vpack.c.bf16 %v10704_v3, %v10700_v16 }
 0x5cf   : > { %v6845_v57 = vrot.slane %v6838_v17, %v15387_v46  ;;  %12406 = vmatpush1.bf16.msra.mxu0 %v12405_v30  ;;  %v10709_v30 = vld [vmem:[%s16416_s5 + $0xba8] sm:$0xff] }
 0x5d0   : > { %10663 = vmatprep.subr.msk.mxu0 %vm6005_vm6, %v10659_v24  ;;  %v10713_v17 = vld [vmem:[%s16416_s5 + $0xbc8] sm:$0xff]  ;;  %v10692_v24 = vld [vmem:[%s16416_s5 + $0xb50] sm:$0x3] }
 0x5d1   : > { %v15734_v52 = vadd.f32 %v6845_v57, %v15634_v1  ;;  %v12435_v6 = vpack.c.bf16 %v10713_v17, %v10709_v30  ;;  %v10708_v57 = vld [vmem:[%s16416_s5 + $0xba0] sm:$0xff]  ;;  %v10751_v17 = vld [vmem:[%s16416_s5 + $0xcc8] sm:$0xff] }
 0x5d2   : > { %v10746_v30 = vld [vmem:[%s16416_s5 + $0xca0] sm:$0xff] }
 0x5d3   : > { %10664 = vmatpush1.msk.msra.mxu0 %vm6005_vm6, %v10658_v39  ;;  %v10721_v39 = vld [vmem:[%s16416_s5 + $0xc08] sm:$0xff] }
 0x5d4   : > { %10665 = vmatmul.mubr.msk.f32.vlgmr.msra.gmra.mrb[110].mxu0 %vm6001_vm7, %v8435_v29  ;;  %12408 = vmatprep.subr.bf16.mxu0 %v12407_v19 }
 0x5d5   : > { %v6971_v1 = vpop.f32.mrb[80].mxu0  ;;  %12410 = vmatpush1.bf16.msra.mxu0 %v12409_v63  ;;  %8743 = vmatprep.mubr.f32.mxu0 %v16487_v43 }
 0x5d6   : > { %v6973_v22 = vpop.f32.mrb[81].mxu0  ;;  %12412 = vmatprep.subr.bf16.mxu0 %v12411_v44  ;;  %v12439_v44 = vpack.c.bf16 %v10721_v39, %v10717_v55 }
 0x5d7   : > { %v7051_v9 = vcombine.low %v6971_v1, %v6973_v22  ;;  %v10725_v1 = vld [vmem:[%s16416_s5 + $0xc28] sm:$0x3]  ;;  %v10707_v22 = vld [vmem:[%s16416_s5 + $0xb98] sm:$0xff] }
 0x5d9   : > { %12414 = vmatpush1.bf16.msra.mxu0 %v12413_v25  ;;  %v7059_v31 = vrot.slane %v7051_v9, %v15387_v46  ;;  %v10703_v25 = vld [vmem:[%s16416_s5 + $0xb78] sm:$0xff] }
 0x5da   : > { %12416 = vmatprep.subr.bf16.mxu0 %v12415_v13  ;;  %v10702_v13 = vld [vmem:[%s16416_s5 + $0xb70] sm:$0xff]  ;;  %v10715_v9 = vld [vmem:[%s16416_s5 + $0xbd8] sm:$0xff] }
 0x5db   : > { %v12445_v26 = vpack.c.bf16 %v10706_v56, %v10702_v13  ;;  %v12447_v58 = vpack.c.bf16 %v10715_v9, %v10711_v0  ;;  %v10744_v0 = vld [vmem:[%s16416_s5 + $0xc90] sm:$0xff] }
 0x5dc   : > { %v10748_v9 = vld [vmem:[%s16416_s5 + $0xcb0] sm:$0xff] }
 0x5dd   : > { %12418 = vmatpush1.bf16.msra.mxu0 %v12417_v20  ;;  %v10724_v20 = vld [vmem:[%s16416_s5 + $0xc20] sm:$0x3] }
 0x5de   : > { %10694 = vmatprep.subr.msk.mxu0 %vm6005_vm6, %v10691_v10  ;;  %v12443_v10 = vpack.c.bf16 %v10707_v22, %v10703_v25  ;;  %v12469_v22 = vpack.c.bf16 %v10740_v8, %v10736_v42 }
 0x5e1   : > { %10695 = vmatpush1.msk.msra.mxu0 %vm6005_vm6, %v10690_v27  ;;  %v10723_v27 = vld [vmem:[%s16416_s5 + $0xc18] sm:$0xff] }
 0x5e2   : > { %10696 = vmatmul.mubr.msk.f32.vlgmr.msra.gmra.mrb[112].mxu0 %vm6001_vm7, %v15783_v23  ;;  %12420 = vmatprep.subr.bf16.mxu0 %v12419_v11 }
 0x5e3   : > { %v7042_v35 = vpop.f32.mrb[82].mxu0  ;;  %12422 = vmatpush1.bf16.msra.mxu0 %v12421_v40  ;;  %8814 = vmatprep.mubr.f32.mxu0 %v16487_v43  ;;  %v12449_v40 = vpack.c.bf16 %v10714_v5, %v10710_v38  ;;  %v10752_v5 = vld [vmem:[%s16416_s5 + $0xcd0] sm:$0xff] }
 0x5e4   : > { %v7044_v29 = vpop.f32.mrb[83].mxu0  ;;  %12424 = vmatprep.subr.bf16.mxu0 %v12423_v51  ;;  %v12451_v51 = vpack.c.bf16 %v10723_v27, %v10719_v7  ;;  %v10756_v7 = vld [vmem:[%s16416_s5 + $0xcf0] sm:$0xff] }
 0x5e5   : > { %v7052_v47 = vcombine.low %v7042_v35, %v7044_v29 }
 0x5e7   : > { %v7066_v28 = vrot.slane %v7052_v47, %v15387_v46  ;;  %12426 = vmatpush1.bf16.msra.mxu0 %v12425_v45  ;;  %v12453_v45 = vpack.c.bf16 %v10722_v48, %v10718_v60  ;;  %v10734_v47 = vld [vmem:[%s16416_s5 + $0xc40] sm:$0xff]  ;;  %v10761_v60 = vld [vmem:[%s16416_s5 + $0xd18] sm:$0x3]  ;;  %v10769_v48 = vld [vmem:[%s16416_s5 + $0xd28] sm:$0xff] }
 0x5e8   : > { %12428 = vmatprep.subr.bf16.mxu0 %v12427_v61  ;;  %v10727_v61 = vld [vmem:[%s16416_s5 + $0xc38] sm:$0x3] }
 0x5e9   : > { %v7067_v15 = vcombine.low %v7059_v31, %v7066_v28  ;;  %v10738_v31 = vld [vmem:[%s16416_s5 + $0xc60] sm:$0xff] }
 0x5ea   : > { %v12457_v16 = vpack.c.bf16 %v10738_v31, %v10734_v47 }
 0x5eb   : > { %v7074_v54 = vrot.slane %v7067_v15, %v15387_v46  ;;  %12430 = vmatpush1.bf16.msra.mxu0 %v12429_v49  ;;  %v10743_v49 = vld [vmem:[%s16416_s5 + $0xc88] sm:$0xff] }
 0x5ec   : > { %10697 = vmatprep.subr.msk.mxu0 %vm6005_vm6, %v10693_v18  ;;  %v10747_v15 = vld [vmem:[%s16416_s5 + $0xca8] sm:$0xff]  ;;  %v10726_v18 = vld [vmem:[%s16416_s5 + $0xc30] sm:$0x3] }
 0x5ed   : > { %v15836_v62 = vadd.f32 %v7074_v54, %v15734_v52  ;;  %v12437_v52 = vpack.c.bf16 %v10712_v2, %v10708_v57  ;;  %v12459_v3 = vpack.c.bf16 %v10747_v15, %v10743_v49  ;;  %v10742_v54 = vld [vmem:[%s16416_s5 + $0xc80] sm:$0xff] }
 0x5ee   : > { %v10750_v57 = vld [vmem:[%s16416_s5 + $0xcc0] sm:$0xff] }
 0x5ef   : > { %10698 = vmatpush1.msk.msra.mxu0 %vm6005_vm6, %v10692_v24  ;;  %v10755_v24 = vld [vmem:[%s16416_s5 + $0xce8] sm:$0xff]  ;;  %v10754_v2 = vld [vmem:[%s16416_s5 + $0xce0] sm:$0xff] }
 0x5f0   : > { %10699 = vmatmul.mubr.msk.f32.vlgmr.msra.gmra.mrb[114].mxu0 %vm6001_vm7, %v15783_v23  ;;  %12432 = vmatprep.subr.bf16.mxu0 %v12431_v12  ;;  %v12465_v39 = vpack.c.bf16 %v10754_v2, %v10750_v57  ;;  %v10776_v49 = vld [vmem:[%s16416_s5 + $0xd60] sm:$0xff]  ;;  %v10770_v57 = vld [vmem:[%s16416_s5 + $0xd30] sm:$0xff] }
 0x5f1   : > { %v7187_v19 = vpop.f32.mrb[84].mxu0  ;;  %12434 = vmatpush1.bf16.msra.mxu0 %v12433_v14  ;;  %8959 = vmatprep.mubr.f32.mxu0 %v16487_v43  ;;  %v10780_v15 = vld [vmem:[%s16416_s5 + $0xd80] sm:$0xff]  ;;  %v10774_v2 = vld [vmem:[%s16416_s5 + $0xd50] sm:$0xff] }
 0x5f2   : > { %v7189_v63 = vpop.f32.mrb[85].mxu0  ;;  %12436 = vmatprep.subr.bf16.mxu0 %v12435_v6  ;;  %v12463_v6 = vpack.c.bf16 %v10755_v24, %v10751_v17  ;;  %v10788_v17 = vld [vmem:[%s16416_s5 + $0xdc0] sm:$0xff] }
 0x5f3   : > { %v7267_v32 = vcombine.low %v7187_v19, %v7189_v63  ;;  %v10759_v19 = vld [vmem:[%s16416_s5 + $0xd08] sm:$0x3]  ;;  %v10741_v63 = vld [vmem:[%s16416_s5 + $0xc78] sm:$0xff] }
 0x5f5   : > { %12438 = vmatpush1.bf16.msra.mxu0 %v12437_v52  ;;  %v7275_v34 = vrot.slane %v7267_v32, %v15387_v46  ;;  %v10737_v52 = vld [vmem:[%s16416_s5 + $0xc58] sm:$0xff] }
 0x5f6   : > { %12440 = vmatprep.subr.bf16.mxu0 %v12439_v44  ;;  %v9075_v44 = vmax.f32 %v14676_v50, 0.0  ;;  %v10745_v32 = vld [vmem:[%s16416_s5 + $0xc98] sm:$0xff]  ;;  %v12467_v25 = vpack.c.bf16 %v10741_v63, %v10737_v52  ;;  %v12493_v63 = vpack.c.bf16 %v10774_v2, %v10770_v57  ;;  %v9549_v57 = vld [vmem:[%s16418_s7 + $0x140] sm:$0xff]  ;;  %v9550_v2 = vld [vmem:[%s16418_s7 + $0x148] sm:$0xff] }
 0x5f7   : > { %v10791_v50 = vld [vmem:[%s16416_s5 + $0xdd8] sm:$0xff] }
 0x5f8   : > { %v9106_v13 = vrot.slane %v9075_v44, 4  ;;  %v9322_v42 = vrot.slane %v9075_v44, 6 }
 0x5f9   : > { %12442 = vmatpush1.bf16.msra.mxu0 %v12441_v41  ;;  %v10749_v41 = vld [vmem:[%s16416_s5 + $0xcb8] sm:$0xff] }
 0x5fa   : > { %10728 = vmatprep.subr.msk.mxu0 %vm6005_vm6, %v10725_v1  ;;  %v10758_v1 = vld [vmem:[%s16416_s5 + $0xd00] sm:$0x3]  ;;  %v12471_v56 = vpack.c.bf16 %v10749_v41, %v10745_v32  ;;  %v10778_v32 = vld [vmem:[%s16416_s5 + $0xd70] sm:$0xff] }
 0x5fb   : > { %v10782_v41 = vld [vmem:[%s16416_s5 + $0xd90] sm:$0xff] }
 0x5fd   : > { %10729 = vmatpush1.msk.msra.mxu0 %vm6005_vm6, %v10724_v20  ;;  %v10753_v20 = vld [vmem:[%s16416_s5 + $0xcd8] sm:$0xff] }
 0x5fe   : > { %10730 = vmatmul.mubr.msk.f32.vlgmr.msra.gmra.mrb[116].mxu0 %vm6001_vm7, %v8880_v53  ;;  %12444 = vmatprep.subr.bf16.mxu0 %v12443_v10  ;;  %v10757_v10 = vld [vmem:[%s16416_s5 + $0xcf8] sm:$0xff] }
 0x5ff   : > { %v7258_v11 = vpop.f32.mrb[86].mxu0  ;;  %12446 = vmatpush1.bf16.msra.mxu0 %v12445_v26  ;;  %9030 = vmatprep.mubr.f32.mxu0 %v16487_v43  ;;  %v12475_v38 = vpack.c.bf16 %v10757_v10, %v10753_v20 }
 0x600   : > { %v7260_v23 = vpop.f32.mrb[87].mxu0  ;;  %12448 = vmatprep.subr.bf16.mxu0 %v12447_v58 }
 0x601   : > { %v7268_v4 = vcombine.low %v7258_v11, %v7260_v23  ;;  %v12477_v23 = vpack.c.bf16 %v10756_v7, %v10752_v5  ;;  %v10794_v5 = vld [vmem:[%s16416_s5 + $0xdf0] sm:$0x3] }
 0x603   : > { %v7282_v35 = vrot.slane %v7268_v4, %v15387_v46  ;;  %12450 = vmatpush1.bf16.msra.mxu0 %v12449_v40  ;;  %v10773_v4 = vld [vmem:[%s16416_s5 + $0xd48] sm:$0xff] }
 0x604   : > { %12452 = vmatprep.subr.bf16.mxu0 %v12451_v51  ;;  %v12479_v33 = vpack.c.bf16 %v10773_v4, %v10769_v48 }
 0x605   : > { %v7283_v29 = vcombine.low %v7275_v34, %v7282_v35  ;;  %v10768_v34 = vld [vmem:[%s16416_s5 + $0xd20] sm:$0xff] }
 0x606   : > { %v10772_v35 = vld [vmem:[%s16416_s5 + $0xd40] sm:$0xff] }
 0x607   : > { %v7290_v28 = vrot.slane %v7283_v29, %v15387_v46  ;;  %12454 = vmatpush1.bf16.msra.mxu0 %v12453_v45  ;;  %v10777_v29 = vld [vmem:[%s16416_s5 + $0xd68] sm:$0xff]  ;;  %v12481_v31 = vpack.c.bf16 %v10772_v35, %v10768_v34 }
 0x608   : > { %10731 = vmatprep.subr.msk.mxu0 %vm6005_vm6, %v10727_v61  ;;  %v10781_v61 = vld [vmem:[%s16416_s5 + $0xd88] sm:$0xff] }
 0x609   : > { %v15936_v37 = vadd.f32 %v7290_v28, %v15836_v62  ;;  %v12461_v62 = vpack.c.bf16 %v10746_v30, %v10742_v54  ;;  %v12483_v28 = vpack.c.bf16 %v10781_v61, %v10777_v29  ;;  %v10784_v30 = vld [vmem:[%s16416_s5 + $0xda0] sm:$0xff] }
 0x60b   : > { %10732 = vmatpush1.msk.msra.mxu0 %vm6005_vm6, %v10726_v18  ;;  %v10785_v18 = vld [vmem:[%s16416_s5 + $0xda8] sm:$0xff] }
 0x60c   : > { %10733 = vmatmul.mubr.msk.f32.vlgmr.msra.gmra.mrb[118].mxu0 %vm6001_vm7, %v8880_v53  ;;  %12456 = vmatprep.subr.bf16.mxu0 %v12455_v36  ;;  %v12473_v53 = vpack.c.bf16 %v10748_v9, %v10744_v0  ;;  %v10789_v36 = vld [vmem:[%s16416_s5 + $0xdc8] sm:$0xff]  ;;  %v10790_v0 = vld [vmem:[%s16416_s5 + $0xdd0] sm:$0xff] }
 0x60d   : > { %v7413_v12 = vpop.f32.mrb[88].mxu0  ;;  %12458 = vmatpush1.bf16.msra.mxu0 %v12457_v16  ;;  %9185 = vmatprep.mubr.f32.mxu0 %v16487_v43  ;;  %v12485_v16 = vpack.c.bf16 %v10780_v15, %v10776_v49  ;;  %v12487_v54 = vpack.c.bf16 %v10789_v36, %v10785_v18  ;;  %v9543_v49 = vld [vmem:[%s16418_s7 + $0x110] sm:$0xff]  ;;  %v9544_v15 = vld [vmem:[%s16418_s7 + $0x118] sm:$0xff] }
 0x60e   : > { %v7415_v14 = vpop.f32.mrb[89].mxu0  ;;  %12460 = vmatprep.subr.bf16.mxu0 %v12459_v3  ;;  %v12539_v18 = vpack.c.bf16 %v9544_v15, %v9543_v49  ;;  %v9531_v15 = vld [vmem:[%s16418_s7 + $0xb0] sm:$0xff] }
 0x60f   : > { %v7493_v55 = vcombine.low %v7413_v12, %v7415_v14  ;;  %v12489_v12 = vpack.c.bf16 %v10788_v17, %v10784_v30  ;;  %v10771_v14 = vld [vmem:[%s16416_s5 + $0xd38] sm:$0xff]  ;;  %v9547_v30 = vld [vmem:[%s16418_s7 + $0x130] sm:$0xff] }
 0x611   : > { %12462 = vmatpush1.bf16.msra.mxu0 %v12461_v62  ;;  %v7501_v11 = vrot.slane %v7493_v55, %v15387_v46  ;;  %v10793_v62 = vld [vmem:[%s16416_s5 + $0xde8] sm:$0x3]  ;;  %v10779_v55 = vld [vmem:[%s16416_s5 + $0xd78] sm:$0xff] }
 0x612   : > { %12464 = vmatprep.subr.bf16.mxu0 %v12463_v6  ;;  %v10775_v6 = vld [vmem:[%s16416_s5 + $0xd58] sm:$0xff] }
 0x613   : > { %v12491_v52 = vpack.c.bf16 %v10775_v6, %v10771_v14 }
 0x615   : > { %12466 = vmatpush1.bf16.msra.mxu0 %v12465_v39  ;;  %v10783_v39 = vld [vmem:[%s16416_s5 + $0xd98] sm:$0xff] }
 0x616   : > { %10762 = vmatprep.subr.msk.mxu0 %vm6005_vm6, %v10759_v19  ;;  %v10792_v19 = vld [vmem:[%s16416_s5 + $0xde0] sm:$0x3]  ;;  %v12495_v8 = vpack.c.bf16 %v10783_v39, %v10779_v55  ;;  %v12548_v39 = vpack.c.bf16 %v9550_v2, %v9549_v57  ;;  %v9518_v2 = vld [vmem:[%s16418_s7 + $0x48] sm:$0xff] }
 0x617   : > { %v9517_v57 = vld [vmem:[%s16418_s7 + $0x40] sm:$0xff] }
 0x619   : > { %10763 = vmatpush1.msk.msra.mxu0 %vm6005_vm6, %v10758_v1  ;;  %v10787_v1 = vld [vmem:[%s16416_s5 + $0xdb8] sm:$0xff] }
 0x61a   : > { %10764 = vmatmul.mubr.msk.f32.vlgmr.msra.gmra.mrb[120].mxu0 %vm6001_vm7, %v9106_v13  ;;  %12468 = vmatprep.subr.bf16.mxu0 %v12467_v25  ;;  %v12497_v25 = vpack.c.bf16 %v10782_v41, %v10778_v32  ;;  %v9552_v32 = vld [vmem:[%s16418_s7 + $0x158] sm:$0xff]  ;;  %v9553_v41 = vld [vmem:[%s16418_s7 + $0x160] sm:$0xff] }
 0x61b   : > { %v7484_v26 = vpop.f32.mrb[90].mxu0  ;;  %12470 = vmatpush1.bf16.msra.mxu0 %v12469_v22  ;;  %9256 = vmatprep.mubr.f32.mxu0 %v16487_v43 }
 0x61c   : > { %v7486_v58 = vpop.f32.mrb[91].mxu0  ;;  %12472 = vmatprep.subr.bf16.mxu0 %v12471_v56  ;;  %v10786_v56 = vld [vmem:[%s16416_s5 + $0xdb0] sm:$0xff] }
 0x61d   : > { %v7494_v27 = vcombine.low %v7484_v26, %v7486_v58  ;;  %v12501_v26 = vpack.c.bf16 %v10790_v0, %v10786_v56  ;;  %v10795_v58 = vld [vmem:[%s16416_s5 + $0xdf8] sm:$0x3]  ;;  %v9510_v0 = vld [vmem:[%s16418_s7 + $0x8] sm:$0xff] }
 0x61f   : > { %v7508_v40 = vrot.slane %v7494_v27, %v15387_v46  ;;  %12474 = vmatpush1.bf16.msra.mxu0 %v12473_v53 }
 0x620   : > { %12476 = vmatprep.subr.bf16.mxu0 %v12475_v38 }
 0x621   : > { %v7509_v51 = vcombine.low %v7501_v11, %v7508_v40 }
 0x623   : > { %v7516_v45 = vrot.slane %v7509_v51, %v15387_v46  ;;  %12478 = vmatpush1.bf16.msra.mxu0 %v12477_v23 }
 0x624   : > { %10765 = vmatprep.subr.msk.mxu0 %vm6005_vm6, %v10761_v60 }
 0x625   : > { %v16037_v47 = vadd.f32 %v7516_v45, %v15936_v37 }
 0x627   : > { %10766 = vmatpush1.msk.msra.mxu0 %vm6005_vm6, %v10760_v59 }
 0x628   : > { %10767 = vmatmul.mubr.msk.f32.vlgmr.msra.gmra.mrb[122].mxu0 %vm6001_vm7, %v9106_v13  ;;  %12480 = vmatprep.subr.bf16.mxu0 %v12479_v33  ;;  %v12499_v13 = vpack.c.bf16 %v10791_v50, %v10787_v1  ;;  %v9541_v33 = vld [vmem:[%s16418_s7 + $0x100] sm:$0xff]  ;;  %v9554_v50 = vld [vmem:[%s16418_s7 + $0x168] sm:$0xff] }
 0x629   : > { %v7629_v37 = vpop.f32.mrb[92].mxu0  ;;  %12482 = vmatpush1.bf16.msra.mxu0 %v12481_v31  ;;  %9401 = vmatprep.mubr.f32.mxu0 %v16487_v43  ;;  %v12995_v31 = vmov 0.0|0.0  }
 0x62a   : > { %v7631_v3 = vpop.f32.mrb[93].mxu0  ;;  %12484 = vmatprep.subr.bf16.mxu0 %v12483_v28 }
 0x62b   : > { %v7709_v24 = vcombine.low %v7629_v37, %v7631_v3  ;;  %v9545_v3 = vld [vmem:[%s16418_s7 + $0x120] sm:$0xff] }
 0x62d   : > { %12486 = vmatpush1.bf16.msra.mxu0 %v12485_v16  ;;  %v7717_v20 = vrot.slane %v7709_v24, %v15387_v46  ;;  %v9548_v24 = vld [vmem:[%s16418_s7 + $0x138] sm:$0xff] }
 0x62e   : > { %12488 = vmatprep.subr.bf16.mxu0 %v12487_v54  ;;  %v9546_v54 = vld [vmem:[%s16418_s7 + $0x128] sm:$0xff]  ;;  %v12545_v14 = vpack.c.bf16 %v9548_v24, %v9547_v30 }
 0x62f   : > { %v12542_v17 = vpack.c.bf16 %v9546_v54, %v9545_v3  ;;  %v9533_v54 = vld [vmem:[%s16418_s7 + $0xc0] sm:$0xff]  ;;  %v9534_v30 = vld [vmem:[%s16418_s7 + $0xc8] sm:$0xff] }
 0x631   : > { %12490 = vmatpush1.bf16.msra.mxu0 %v12489_v12 }
 0x632   : > { %10796 = vmatprep.subr.msk.mxu0 %vm6005_vm6, %v10793_v62 }
 0x635   : > { %10797 = vmatpush1.msk.msra.mxu0 %vm6005_vm6, %v10792_v19 }
 0x636   : > { %10798 = vmatmul.mubr.msk.f32.vlgmr.msra.gmra.mrb[124].mxu0 %vm6001_vm7, %v9322_v42  ;;  %12492 = vmatprep.subr.bf16.mxu0 %v12491_v52 }
 0x637   : > { %v7700_v44 = vpop.f32.mrb[94].mxu0  ;;  %12494 = vmatpush1.bf16.msra.mxu0 %v12493_v63  ;;  %9472 = vmatprep.mubr.f32.mxu0 %v16487_v43 }
 0x638   : > { %v7702_v22 = vpop.f32.mrb[95].mxu0  ;;  %12496 = vmatprep.subr.bf16.mxu0 %v12495_v8  ;;  %v9551_v8 = vld [vmem:[%s16418_s7 + $0x150] sm:$0xff] }
 0x639   : > { %v7710_v9 = vcombine.low %v7700_v44, %v7702_v22  ;;  %v12551_v1 = vpack.c.bf16 %v9552_v32, %v9551_v8  ;;  %v9525_v44 = vld [vmem:[%s16418_s7 + $0x80] sm:$0xff] }
 0x63a   : > { %v9509_v22 = vld [vmem:[%s16418_s7] sm:$0xff] }
 0x63b   : > { %v7724_v10 = vrot.slane %v7710_v9, %v15387_v46  ;;  %12498 = vmatpush1.bf16.msra.mxu0 %v12497_v25  ;;  %v9526_v25 = vld [vmem:[%s16418_s7 + $0x88] sm:$0xff]  ;;  %v9555_v9 = vld [vmem:[%s16418_s7 + $0x170] sm:$0xff] }
 0x63c   : > { %12500 = vmatprep.subr.bf16.mxu0 %v12499_v13  ;;  %v12554_v13 = vpack.c.bf16 %v9554_v50, %v9553_v41  ;;  %v12503_v56 = vpack.c.bf16 %v9526_v25, %v9525_v44  ;;  %v9565_v41 = vld [vmem:[%s16418_s7 + $0x1c0] sm:$0xff]  ;;  %v9535_v50 = vld [vmem:[%s16418_s7 + $0xd0] sm:$0xff]  ;;  %v9536_v25 = vld [vmem:[%s16418_s7 + $0xd8] sm:$0xff] }
 0x63d   : > { %v7725_v53 = vcombine.low %v7717_v20, %v7724_v10  ;;  %v9556_v20 = vld [vmem:[%s16418_s7 + $0x178] sm:$0xff]  ;;  %v12505_v10 = vpack.c.bf16 %v9510_v0, %v9509_v22  ;;  %v9519_v22 = vld [vmem:[%s16418_s7 + $0x50] sm:$0xff] }
 0x63e   : > { %12504 = vmatprep.subr.bf16.mxu1 %v12503_v56  ;;  %v12523_v56 = vpack.c.bf16 %v9536_v25, %v9535_v50 }
 0x63f   : > { %v7732_v38 = vrot.slane %v7725_v53, %v15387_v46  ;;  %12502 = vmatpush1.bf16.msra.mxu0 %v12501_v26  ;;  %12506 = vmatpush3.bf16.msra.mxu1 %v12505_v10  ;;  %v9537_v10 = vld [vmem:[%s16418_s7 + $0xe0] sm:$0xff] }
 0x640   : > { %10799 = vmatprep.subr.msk.mxu0 %vm6005_vm6, %v10795_v58  ;;  %v12557_v58 = vpack.c.bf16 %v9556_v20, %v9555_v9  ;;  %v9567_v9 = vld [vmem:[%s16418_s7 + $0x1d0] sm:$0xff]  ;;  %v9568_v20 = vld [vmem:[%s16418_s7 + $0x1d8] sm:$0xff] }
 0x641   : > { %v7734_v7 = vadd.f32 %v7732_v38, %v16037_v47  ;;  %v9542_v47 = vld [vmem:[%s16418_s7 + $0x108] sm:$0xff]  ;;  %v9557_v38 = vld [vmem:[%s16418_s7 + $0x180] sm:$0xff] }
 0x642   : > { %v12536_v28 = vpack.c.bf16 %v9542_v47, %v9541_v33  ;;  %v9514_v33 = vld [vmem:[%s16418_s7 + $0x28] sm:$0xff] }
 0x643   : > { %10800 = vmatpush1.msk.msra.mxu0 %vm6005_vm6, %v10794_v5  ;;  %v9558_v5 = vld [vmem:[%s16418_s7 + $0x188] sm:$0xff] }
 0x644   : > { %10801 = vmatmul.mubr.msk.f32.vlgmr.msra.gmra.mrb[126].mxu0 %vm6001_vm7, %v9322_v42  ;;  %12535 = vmatprep.subr.bf16.mxu0 %v12995_v31 }
 0x645   : > { %v7858_v27 = vpop.f32.mrb[96].mxu0  ;;  %12537 = vmatpush1.bf16.msra.mxu0 %v12536_v28  ;;  %v9560_v28 = vld [vmem:[%s16418_s7 + $0x198] sm:$0xff] }
 0x646   : > { %v7860_v11 = vpop.f32.mrb[97].mxu0  ;;  %12538 = vmatprep.subr.bf16.mxu0 %v12995_v31 }
 0x647   : > { %v7938_v40 = vcombine.low %v7858_v27, %v7860_v11  ;;  %v9527_v27 = vld [vmem:[%s16418_s7 + $0x90] sm:$0xff]  ;;  %v9528_v11 = vld [vmem:[%s16418_s7 + $0x98] sm:$0xff] }
 0x649   : > { %v7946_v48 = vrot.slane %v7938_v40, %v15387_v46  ;;  %12540 = vmatpush1.bf16.msra.mxu0 %v12539_v18  ;;  %v9511_v40 = vld [vmem:[%s16418_s7 + $0x10] sm:$0xff]  ;;  %v9532_v18 = vld [vmem:[%s16418_s7 + $0xb8] sm:$0xff] }
 0x64a   : > { %12541 = vmatprep.subr.bf16.mxu0 %v12995_v31 }
 0x64d   : > { %12543 = vmatpush1.bf16.msra.mxu0 %v12542_v17 }
 0x64e   : > { %12544 = vmatprep.subr.bf16.mxu0 %v12995_v31 }
 0x651   : > { %12546 = vmatpush1.bf16.msra.mxu0 %v12545_v14 }
 0x652   : > { %12547 = vmatprep.subr.bf16.mxu0 %v12995_v31 }
 0x653   : > { %v7929_v23 = vpop.f32.mrb[98].mxu0 }
 0x654   : > { %v7931_v51 = vpop.f32.mrb[99].mxu0 }
 0x655   : > { %v7939_v60 = vcombine.low %v7929_v23, %v7931_v51  ;;  %12549 = vmatpush1.bf16.msra.mxu0 %v12548_v39  ;;  %v12507_v23 = vpack.c.bf16 %v9528_v11, %v9527_v27  ;;  %v9512_v51 = vld [vmem:[%s16418_s7 + $0x18] sm:$0xff]  ;;  %v9570_v27 = vld [vmem:[%s16418_s7 + $0x1e8] sm:$0xff]  ;;  %v9539_v11 = vld [vmem:[%s16418_s7 + $0xf0] sm:$0xff] }
 0x656   : > { %12550 = vmatprep.subr.bf16.mxu0 %v12995_v31 }
 0x657   : > { %v7953_v4 = vrot.slane %v7939_v60, %v15387_v46  ;;  %12508 = vmatprep.subr.bf16.mxu1 %v12507_v23  ;;  %v9540_v23 = vld [vmem:[%s16418_s7 + $0xf8] sm:$0xff] }
 0x659   : > { %v7954_v34 = vcombine.low %v7946_v48, %v7953_v4  ;;  %12552 = vmatpush1.bf16.msra.mxu0 %v12551_v1  ;;  %v12509_v4 = vpack.c.bf16 %v9512_v51, %v9511_v40  ;;  %v9566_v1 = vld [vmem:[%s16418_s7 + $0x1c8] sm:$0xff] }
 0x65a   : > { %12553 = vmatprep.subr.bf16.mxu0 %v12995_v31  ;;  %v12572_v44 = vpack.c.bf16 %v9566_v1, %v9565_v41 }
 0x65b   : > { %v7961_v35 = vrot.slane %v7954_v34, %v15387_v46  ;;  %v9529_v34 = vld [vmem:[%s16418_s7 + $0xa0] sm:$0xff]  ;;  %12510 = vmatpush3.bf16.msra.mxu1 %v12509_v4  ;;  %v9524_v4 = vld [vmem:[%s16418_s7 + $0x78] sm:$0xff] }
 0x65d   : > { %v7963_v45 = vadd.f32 %v7961_v35, %v7734_v7  ;;  %12555 = vmatpush1.bf16.msra.mxu0 %v12554_v13  ;;  %v9530_v35 = vld [vmem:[%s16418_s7 + $0xa8] sm:$0xff]  ;;  %v9520_v13 = vld [vmem:[%s16418_s7 + $0x58] sm:$0xff] }
 0x65e   : > { %12556 = vmatprep.subr.bf16.mxu0 %v12995_v31  ;;  %v12525_v0 = vpack.c.bf16 %v9520_v13, %v9519_v22 }
 0x661   : > { %v8074_v29 = vpop.f32.mrb[100].mxu0  ;;  %12558 = vmatpush1.bf16.msra.mxu0 %v12557_v58  ;;  %v9521_v58 = vld [vmem:[%s16418_s7 + $0x60] sm:$0xff] }
 0x662   : > { %v8076_v61 = vpop.f32.mrb[101].mxu0  ;;  %12559 = vmatprep.subr.bf16.mxu0 %v12995_v31 }
 0x663   : > { %v8154_v59 = vcombine.low %v8074_v29, %v8076_v61  ;;  %v12560_v29 = vpack.c.bf16 %v9558_v5, %v9557_v38  ;;  %v9559_v61 = vld [vmem:[%s16418_s7 + $0x190] sm:$0xff]  ;;  %v9522_v38 = vld [vmem:[%s16418_s7 + $0x68] sm:$0xff] }
 0x664   : > { %v12563_v17 = vpack.c.bf16 %v9560_v28, %v9559_v61  ;;  %v12529_v40 = vpack.c.bf16 %v9522_v38, %v9521_v58 }
 0x665   : > { %v8162_v12 = vrot.slane %v8154_v59, %v15387_v46  ;;  %v12511_v59 = vpack.c.bf16 %v9530_v35, %v9529_v34  ;;  %12561 = vmatpush1.bf16.msra.mxu0 %v12560_v29 }
 0x666   : > { %12562 = vmatprep.subr.bf16.mxu0 %v12995_v31 }
 0x667   : > { %12512 = vmatprep.subr.bf16.mxu1 %v12511_v59 }
 0x669   : > { %12564 = vmatpush1.bf16.msra.mxu0 %v12563_v17 }
 0x66a   : > { %12565 = vmatprep.subr.bf16.mxu0 %v12995_v31 }
 0x66f   : > { %v8145_v36 = vpop.f32.mrb[102].mxu0 }
 0x670   : > { %v8147_v37 = vpop.f32.mrb[103].mxu0 }
 0x671   : > { %v8155_v16 = vcombine.low %v8145_v36, %v8147_v37  ;;  %v12515_v36 = vpack.c.bf16 %v9532_v18, %v9531_v15  ;;  %v9515_v37 = vld [vmem:[%s16418_s7 + $0x30] sm:$0xff] }
 0x673   : > { %v8169_v62 = vrot.slane %v8155_v16, %v15387_v46  ;;  %v9516_v16 = vld [vmem:[%s16418_s7 + $0x38] sm:$0xff] }
 0x674   : > { %v12517_v14 = vpack.c.bf16 %v9516_v16, %v9515_v37 }
 0x675   : > { %v8170_v6 = vcombine.low %v8162_v12, %v8169_v62  ;;  %v9561_v12 = vld [vmem:[%s16418_s7 + $0x1a0] sm:$0xff]  ;;  %v9562_v62 = vld [vmem:[%s16418_s7 + $0x1a8] sm:$0xff] }
 0x677   : > { %v8177_v55 = vrot.slane %v8170_v6, %v15387_v46  ;;  %v12519_v6 = vpack.c.bf16 %v9534_v30, %v9533_v54 }
 0x679   : > { %v16161_v19 = vadd.f32 %v8177_v55, %v7963_v45  ;;  %v9513_v45 = vld [vmem:[%s16418_s7 + $0x20] sm:$0xff]  ;;  %v12566_v55 = vpack.c.bf16 %v9562_v62, %v9561_v12 }
 0x67a   : > { %v12513_v49 = vpack.c.bf16 %v9514_v33, %v9513_v45 }
 0x67b   : > { %12567 = vmatpush1.bf16.msra.mxu0 %v12566_v55 }
 0x67c   : > { %12514 = vmatpush3.bf16.msra.mxu1 %v12513_v49  ;;  %12568 = vmatprep.subr.bf16.mxu0 %v12995_v31 }
 0x67d   : > { %v8300_v52 = vpop.f32.mrb[104].mxu0  ;;  %12516 = vmatprep.subr.bf16.mxu1 %v12515_v36 }
 0x67e   : > { %v8302_v63 = vpop.f32.mrb[105].mxu0 }
 0x67f   : > { %v8380_v42 = vcombine.low %v8300_v52, %v8302_v63  ;;  %v9564_v52 = vld [vmem:[%s16418_s7 + $0x1b8] sm:$0xff]  ;;  %v12521_v63 = vpack.c.bf16 %v9518_v2, %v9517_v57 }
 0x680   : > { %12518 = vmatpush3.bf16.msra.mxu1 %v12517_v14 }
 0x681   : > { %v8388_v60 = vrot.slane %v8380_v42, %v15387_v46  ;;  %12520 = vmatprep.subr.bf16.mxu1 %v12519_v6 }
 0x684   : > { %12522 = vmatpush3.bf16.msra.mxu1 %v12521_v63 }
 0x685   : > { %12524 = vmatprep.subr.bf16.mxu1 %v12523_v56 }
 0x688   : > { %12526 = vmatpush3.bf16.msra.mxu1 %v12525_v0 }
 0x68b   : > { %v8371_v26 = vpop.f32.mrb[106].mxu0 }
 0x68c   : > { %v8373_v53 = vpop.f32.mrb[107].mxu0 }
 0x68d   : > { %v8381_v7 = vcombine.low %v8371_v26, %v8373_v53  ;;  %v12575_v26 = vpack.c.bf16 %v9568_v20, %v9567_v9  ;;  %v9538_v53 = vld [vmem:[%s16418_s7 + $0xe8] sm:$0xff] }
 0x68e   : > { %v12527_v5 = vpack.c.bf16 %v9538_v53, %v9537_v10 }
 0x68f   : > { %v8395_v48 = vrot.slane %v8381_v7, %v15387_v46  ;;  %v9569_v7 = vld [vmem:[%s16418_s7 + $0x1e0] sm:$0xff] }
 0x690   : > { %12528 = vmatprep.subr.bf16.mxu1 %v12527_v5  ;;  %v12578_v35 = vpack.c.bf16 %v9570_v27, %v9569_v7  ;;  %v9580_v5 = vsub.s32 1, %v15366_v21  ;;  %v9588_v27 = vsub.s32 3, %v15366_v21 }
 0x691   : > { %v8396_v47 = vcombine.low %v8388_v60, %v8395_v48  ;;  %v12531_v60 = vpack.c.bf16 %v9540_v23, %v9539_v11  ;;  %v9523_v48 = vld [vmem:[%s16418_s7 + $0x70] sm:$0xff]  ;;  %12530 = vmatpush3.bf16.msra.mxu1 %v12529_v40  ;;  %v9576_v11 = vsub.s32 0, %v15366_v21  ;;  %v9584_v40 = vsub.s32 2, %v15366_v21 }
 0x692   : > { %v12533_v29 = vpack.c.bf16 %v9524_v4, %v9523_v48 }
 0x693   : > { %v8403_v3 = vrot.slane %v8396_v47, %v15387_v46  ;;  %12532 = vmatprep.subr.bf16.mxu1 %v12531_v60  ;;  %v9571_v47 = vld [vmem:[%s16418_s7 + $0x1f0] sm:$0xf] }
 0x695   : > { %v16256_v24 = vadd.f32 %v8403_v3, %v16161_v19  ;;  %v9563_v19 = vld [vmem:[%s16418_s7 + $0x1b0] sm:$0xff]  ;;  %12534 = vmatpush3.bf16.msra.mxu1 %v12533_v29 }
 0x696   : > { %v12569_v32 = vpack.c.bf16 %v9564_v52, %v9563_v19 }
 0x698   : > { %12570 = vmatpush1.bf16.msra.mxu0 %v12569_v32 }
 0x699   : > { %v8516_v39 = vpop.f32.mrb[108].mxu0  ;;  %12571 = vmatprep.subr.bf16.mxu0 %v12995_v31 }
 0x69a   : > { %v8518_v42 = vpop.f32.mrb[109].mxu0 }
 0x69b   : > { %v8596_v8 = vcombine.low %v8516_v39, %v8518_v42 }
 0x69c   : > { %12573 = vmatpush1.bf16.msra.mxu0 %v12572_v44 }
 0x69d   : > { %12574 = vmatprep.subr.bf16.mxu0 %v12995_v31  ;;  %v8604_v61 = vrot.slane %v8596_v8, %v15387_v46 }
 0x6a0   : > { %12576 = vmatpush1.bf16.msra.mxu0 %v12575_v26 }
 0x6a1   : > { %12577 = vmatprep.subr.bf16.mxu0 %v12995_v31 }
 0x6a4   : > { %12579 = vmatpush1.bf16.msra.mxu0 %v12578_v35  ;;  %v9572_v35 = vld [vmem:[%s16419_s8] sm:$0x1] }
 0x6a5   : > { %9729 = vmatprep.subr.mxu0 %v16487_v43 }
 0x6a7   : > { %v8587_v51 = vpop.f32.mrb[110].mxu0 }
 0x6a8   : > { %v8589_v34 = vpop.f32.mrb[111].mxu0  ;;  %10802 = vmatpush1.msk.msra.mxu0 %vm1210_vm4, %v9571_v47 }
 0x6a9   : > { %v8597_v45 = vcombine.low %v8587_v51, %v8589_v34 }
 0x6ab   : > { %v8611_v59 = vrot.slane %v8597_v45, %v15387_v46 }
 0x6ad   : > { %v8612_v33 = vcombine.low %v8604_v61, %v8611_v59 }
 0x6af   : > { %v8619_v28 = vrot.slane %v8612_v33, %v15387_v46 }
 0x6b1   : > { %v8621_v31 = vadd.f32 %v8619_v28, %v16256_v24 }
 0x6b5   : > { %v8745_v49 = vpop.f32.mrb[112].mxu0 }
 0x6b6   : > { %v8747_v15 = vpop.f32.mrb[113].mxu0 }
 0x6b7   : > { %v8825_v18 = vcombine.low %v8745_v49, %v8747_v15 }
 0x6b9   : > { %v8833_v3 = vrot.slane %v8825_v18, %v15387_v46 }
 0x6c3   : > { %v8816_v36 = vpop.f32.mrb[114].mxu0 }
 0x6c4   : > { %v8818_v37 = vpop.f32.mrb[115].mxu0 }
 0x6c5   : > { %v8826_v16 = vcombine.low %v8816_v36, %v8818_v37 }
 0x6c7   : > { %v8840_v43 = vrot.slane %v8826_v16, %v15387_v46 }
 0x6c9   : > { %v8841_v54 = vcombine.low %v8833_v3, %v8840_v43 }
 0x6cb   : > { %v8848_v30 = vrot.slane %v8841_v54, %v15387_v46 }
 0x6cd   : > { %v8850_v17 = vadd.f32 %v8848_v30, %v8621_v31 }
 0x6d1   : > { %v8961_v12 = vpop.f32.mrb[116].mxu0 }
 0x6d2   : > { %v8963_v62 = vpop.f32.mrb[117].mxu0 }
 0x6d3   : > { %v9041_v14 = vcombine.low %v8961_v12, %v8963_v62 }
 0x6d5   : > { %v9049_v2 = vrot.slane %v9041_v14, %v15387_v46 }
 0x6df   : > { %v9032_v6 = vpop.f32.mrb[118].mxu0 }
 0x6e0   : > { %v9034_v57 = vpop.f32.mrb[119].mxu0 }
 0x6e1   : > { %v9042_v24 = vcombine.low %v9032_v6, %v9034_v57 }
 0x6e3   : > { %v9056_v55 = vrot.slane %v9042_v24, %v15387_v46 }
 0x6e5   : > { %v9057_v39 = vcombine.low %v9049_v2, %v9056_v55 }
 0x6e7   : > { %v9064_v19 = vrot.slane %v9057_v39, %v15387_v46 }
 0x6e9   : > { %v9066_v52 = vadd.f32 %v9064_v19, %v8850_v17 }
 0x6ed   : > { %v9187_v63 = vpop.f32.mrb[120].mxu0 }
 0x6ee   : > { %v9189_v42 = vpop.f32.mrb[121].mxu0 }
 0x6ef   : > { %v9267_v8 = vcombine.low %v9187_v63, %v9189_v42 }
 0x6f1   : > { %v9275_v50 = vrot.slane %v9267_v8, %v15387_v46 }
 0x6fb   : > { %v9258_v32 = vpop.f32.mrb[122].mxu0 }
 0x6fc   : > { %v9260_v41 = vpop.f32.mrb[123].mxu0 }
 0x6fd   : > { %v9268_v1 = vcombine.low %v9258_v32, %v9260_v41 }
 0x6ff   : > { %v9282_v44 = vrot.slane %v9268_v1, %v15387_v46 }
 0x701   : > { %v9283_v25 = vcombine.low %v9275_v50, %v9282_v44 }
 0x703   : > { %v9290_v22 = vrot.slane %v9283_v25, %v15387_v46 }
 0x705   : > { %v9292_v13 = vadd.f32 %v9290_v22, %v9066_v52 }
 0x709   : > { %v9403_v56 = vpop.f32.mrb[124].mxu0 }
 0x70a   : > { %v9405_v0 = vpop.f32.mrb[125].mxu0 }
 0x70b   : > { %v9483_v9 = vcombine.low %v9403_v56, %v9405_v0 }
 0x70d   : > { %v9491_v53 = vrot.slane %v9483_v9, %v15387_v46 }
 0x717   : > { %v9474_v20 = vpop.f32.mrb[126].mxu0 }
 0x718   : > { %v9476_v10 = vpop.f32.mrb[127].mxu0 }
 0x719   : > { %v9484_v26 = vcombine.low %v9474_v20, %v9476_v10 }
 0x71b   : > { %v9498_v58 = vrot.slane %v9484_v26, %v15387_v46 }
 0x71d   : > { %v9499_v38 = vcombine.low %v9491_v53, %v9498_v58 }
 0x71f   : > { %v9506_v7 = vrot.slane %v9499_v38, %v15387_v46 }
 0x721   : > { %v9508_v23 = vadd.f32 %v9506_v7, %v9292_v13 }
 0x723   : > { %v9581_v51 = vrot.slane %v9508_v23, %v9580_v5  ;;  %v9589_v60 = vrot.slane %v9508_v23, %v9588_v27  ;;  %v9577_v48 = vrot.slane %v9508_v23, %v9576_v11  ;;  %v9585_v4 = vrot.slane %v9508_v23, %v9584_v40 }
 0x725   : > { %9663 = vmatprep.mubr.f32.mxu1 %v9581_v51  ;;  %10803 = vmatprep.mubr.msk.f32.mxu0 %vm9593_vm8, %v9589_v60 }
 0x726   : > { %9664 = vmatmul.mubr.f32.vlgmr.msra.gmra.mrb[20].mxu1 %v9577_v48  ;;  %9734 = vmatmul.mubr.f32.vlgmr.msra.gmra.mrb[128].mxu0 %v9585_v4 }
 0x7f9   : > { %v11290_v34 = vpop.f32.mrb[20].mxu1  ;;  %v9735_v46 = vpop.f32.mrb[128].mxu0 }
 0x7fa   : > { %v11291_v21 = vpop.f32.mrb[21].mxu1  ;;  %v9737_v45 = vpop.f32.mrb[129].mxu0 }
 0x7fb   : > { %v11292_v29 = vadd.f32 %v11291_v21, %v11290_v34 }
 0x7fd   : > { %v9666_v61 = vadd.f32 %v11292_v29, %v9572_v35 }
 0x7ff   : > { %v9736_v59 = vadd.f32 %v9735_v46, %v9666_v61 }
 0x801   : > { %9740 = vst.msk [vmem:[%s324_s28] sm:$0x1] %vm9739_vm9, %v9736_v59 }
 0x802   : > { %12941 = shalt.err (!%p12938_p3)
}
 0x803   : > { %s12942_s24 = scalar_lea.hbm %s16369_s17, 16  ;;  %s12946_s28 = scalar_lea.hbm %s16420_s9, 32 }
 0x804   : > { %p12943_p4 = scmp.ne.s32.totalorder %s16369_s17, %s12942_s24  ;;  %p12947_p9 = scmp.lt.u32.totalorder %s16369_s17, %s16420_s9 }
 0x805   : > { %p12948_p10 = scmp.lt.u32.totalorder %s12946_s28, %s12942_s24  ;;  %p12950_p12 = scmp.lt.u32.totalorder %s12942_s24, %s16369_s17 }
 0x806   : > { %p12944_p7 = pnand %p12943_p4, %p13085_p5 }
 0x807   : > { %p12949_p11 = por %p12948_p10, %p12947_p9 }
 0x808   : > { %p12945_p8 = pneg %p12944_p7 }
 0x809   : > { %p12951_p13 = por %p12950_p12, %p12949_p11 }
 0x80b   : > { %p12952_p0 = pnand %p12951_p13, %p12945_p8 }
 0x80d   : > { %12955 = shalt.err (!%p12952_p0)
}
 0x80e   : > { %12885 = dma.vmem_to_hbm [thread:$0]  (%p13085_p5), %s16371_s29, 16, %s16369_s17, %s9742_s21  }
 0x80f PF: > { %p12891_p1 = scmp.ge.s32.totalorder %s12990_s12, 2  ;;  %s9766_s22 = sand.u32 1, %s12978_s30  }
 0x810   : > { %s9767_s13 = scalar_lea.sflag [#allocation4], %s9766_s22 }
 0x811   : > { %p12888_p2 = pnand %p12891_p1, %p13089_p6 }
 0x813   : > { %12973 = dma.done.wait (!%p12888_p2), %s9767_s13, 16  }
 0x814   : > { %12975 = vsyncadd (!%p12888_p2), %s9767_s13, 4294967280  ;;  %p19_p3 = scmp.ge.s32.totalorder %s13072_s15, 4   ;;  %s16488_s30 = smov %s12982_s10 }
 0x815   : > { %s16489_s10 = smov %s12986_s11  ;;  %s16490_s11 = smov %s13083_s18 }
 0x816   : > { %s16491_s12 = smov %s13072_s15  ;;  %21 = sbr.rel (!%p19_p3) target bundleno = 3 (0x3), region = 130 }
 0x81d   :  { %9771 = vsyncpa [#allocation4], 1 }
 0x81e   :  { %9773 = vsyncpa [#allocation4 + $0x1], 1 }

</bundles_post_ra>
